<compile_context>
chip_gen: v7x
topology: tpu7x:2x2x1
jax: 0.10.0
libtpu: 0.0.40
codegen_flags: <defaults>
</compile_context>

<pallas_src>
import numpy as np
import jax
import jax.numpy as jnp
from jax import lax
from jax.experimental import pallas as pl
from jax.experimental.pallas import tpu as pltpu

_TB_MAX = 32  # default batch tile (tunable; multiple of 8)


# ----------------------------------------------------------------------------
# Fused forward kernel (one grid step = one batch tile, all math batched)
# ----------------------------------------------------------------------------
def _lenet_kernel(x_ref, bw1_ref, c1e_ref, c1o_ref, b1_ref,
                  bw2_ref, c2e_ref, c2o_ref, b2_ref,
                  wf1_ref, bf1_ref, wf2_ref, bf2_ref, wf3_ref, bf3_ref,
                  out_ref, h1_ref):
    f32 = jnp.float32
    tb = out_ref.shape[0]

    def dot(a, b):
        return jnp.dot(a, b, preferred_element_type=f32)

    # ---- conv1: 5 banded matmuls, batched over the tile (M = 24*tb) --------
    z1 = dot(x_ref[0, 0:24 * tb, :], bw1_ref[0])
    for i in range(1, 5):
        z1 = z1 + dot(x_ref[0, i * tb:(i + 24) * tb, :], bw1_ref[i])
    # z1: (24*tb, 144), row = y*tb + b, col = o*24 + x

    # ---- pool1 columns (x-direction) via host-precomputed 0/1 selectors ----
    zc1 = jnp.maximum(dot(z1, c1e_ref[...]), dot(z1, c1o_ref[...]))  # (24*tb,128)

    # ---- pool1 rows (y-direction) + bias + relu -> h1 scratch (12*tb,128) --
    b1 = b1_ref[...]
    for yo in range(12):
        top = zc1[(2 * yo) * tb:(2 * yo + 1) * tb, :]
        bot = zc1[(2 * yo + 1) * tb:(2 * yo + 2) * tb, :]
        h1_ref[yo * tb:(yo + 1) * tb, :] = jnp.maximum(
            jnp.maximum(top, bot) + b1, 0.0)

    # ---- conv2: 5 banded matmuls (M = 8*tb, K padded to 128) ----------------
    z2 = dot(h1_ref[0:8 * tb, :], bw2_ref[0])
    for i in range(1, 5):
        z2 = z2 + dot(h1_ref[i * tb:(i + 8) * tb, :], bw2_ref[i])
    # z2: (8*tb, 128), row = y*tb + b, col = o*8 + x

    # ---- pool2 columns -------------------------------------------------------
    zc2 = jnp.maximum(dot(z2, c2e_ref[...]), dot(z2, c2o_ref[...]))  # (8*tb,128)

    # ---- pool2 rows + bias + relu, fc1 consumed chunk-by-chunk --------------
    b2 = b2_ref[...]
    y1 = None
    for yp in range(4):
        top = zc2[(2 * yp) * tb:(2 * yp + 1) * tb, :]
        bot = zc2[(2 * yp + 1) * tb:(2 * yp + 2) * tb, :]
        f_chunk = jnp.maximum(jnp.maximum(top, bot) + b2, 0.0)        # (tb, 128)
        part = dot(f_chunk, wf1_ref[yp])
        y1 = part if y1 is None else y1 + part
    y1 = jnp.maximum(y1 + bf1_ref[...], 0.0)                          # (tb, 128)

    # ---- fc2, fc3 (N padded to 128), final ReLU per the reference -----------
    y2 = jnp.maximum(dot(y1, wf2_ref[...]) + bf2_ref[...], 0.0)
    y3 = jnp.maximum(dot(y2, wf3_ref[...]) + bf3_ref[...], 0.0)

    out_ref[...] = y3     # single unmasked, lane-dense (tb, 128) store


# ----------------------------------------------------------------------------
# Wrapper: one pallas_call for the whole network
# ----------------------------------------------------------------------------
def _choose_tile(batch, tb_max=_TB_MAX):
    """Batch tile: multiple of 8, <= tb_max, >= 2 grid steps when possible."""
    tb = tb_max
    while tb > 8 and -(-batch // tb) < 2:
        tb //= 2
    return tb


@jax.jit
def lenet_forward(kp, x):
    """x: (B, 1, 28, 28) float32 -> logits (B, 10) (with relu5, as in Net)."""
    B = x.shape[0]
    tb = _choose_tile(B)
    G = -(-B // tb)
    Bp = G * tb

    xp = x[:, 0, :, :]
    if Bp != B:
        xp = jnp.pad(xp, ((0, Bp - B), (0, 0), (0, 0)))
    # Grid-flattened, y-major / batch-minor row layout: (G, 28*tb, 28).
    xg = xp.transpose(1, 0, 2).reshape(28, G, tb, 28)
    xg = xg.transpose(1, 0, 2, 3).reshape(G, 28 * tb, 28)

    def full(*shape):
        return pl.BlockSpec(shape, lambda t, _s=len(shape): (0,) * _s)

    in_specs = [
        pl.BlockSpec((1, 28 * tb, 28), lambda t: (t, 0, 0)),   # input tile
        full(5, 28, 144),                                      # bw1
        full(144, 128), full(144, 128), full(1, 128),          # c1e, c1o, b1row
        full(5, 128, 128),                                     # bw2
        full(128, 128), full(128, 128), full(1, 128),          # c2e, c2o, b2row
        full(4, 128, 128), full(1, 128),                       # wf1, bf1
        full(128, 128), full(1, 128),                          # wf2, bf2
        full(128, 128), full(1, 128),                          # wf3, bf3
    ]
    out_specs = pl.BlockSpec((tb, 128), lambda t: (t, 0))

    weight_bytes = sum(int(np.prod(v.shape)) * 4 for v in kp.values())
    macs = 86400 + 153600 + 30720 + 10080 + 840            # conv/fc MACs / sample
    sel = 24 * 144 * 128 * 2 + 8 * 128 * 128 * 2           # pool-selection MACs
    cost = pl.CostEstimate(
        flops=2 * Bp * (macs + sel), transcendentals=0,
        bytes_accessed=Bp * (28 * 28 + 128) * 4 + weight_bytes)

    out = pl.pallas_call(
        _lenet_kernel,
        out_shape=jax.ShapeDtypeStruct((Bp, 128), jnp.float32),
        grid_spec=pltpu.PrefetchScalarGridSpec(
            num_scalar_prefetch=0,
            grid=(G,),
            in_specs=in_specs,
            out_specs=out_specs,
            scratch_shapes=[pltpu.VMEM((12 * tb, 128), jnp.float32)],  # h1
        ),
        compiler_params=pltpu.CompilerParams(
            dimension_semantics=("parallel",),      # 2 TCs on v7x
        ),
        cost_estimate=cost,
    )(xg, kp["bw1"], kp["c1e"], kp["c1o"], kp["b1row"],
      kp["bw2"], kp["c2e"], kp["c2o"], kp["b2row"],
      kp["wf1"], kp["bf1"], kp["wf2"], kp["bf2"], kp["wf3"], kp["bf3"])

    return out[:B, :10]


# ----------------------------------------------------------------------------
# Parameters: PyTorch-layout init + one-time kernel re-layout
# ----------------------------------------------------------------------------
def init_torch_params(key):
    ks = jax.random.split(key, 10)

    def u(k, shape, fan_in):
        bound = 1.0 / np.sqrt(fan_in)
        return jax.random.uniform(k, shape, jnp.float32, -bound, bound)

    return {
        "conv1_w": u(ks[0], (6, 1, 5, 5), 25),
        "conv1_b": u(ks[1], (6,), 25),
        "conv2_w": u(ks[2], (16, 6, 5, 5), 150),
        "conv2_b": u(ks[3], (16,), 150),
        "fc1_w": u(ks[4], (120, 256), 256),
        "fc1_b": u(ks[5], (120,), 256),
        "fc2_w": u(ks[6], (84, 120), 120),
        "fc2_b": u(ks[7], (84,), 120),
        "fc3_w": u(ks[8], (10, 84), 84),
        "fc3_b": u(ks[9], (10,), 84),
    }


def prepare_kernel_params(pt):
    """One-time, init-only re-layout of PyTorch weights into kernel operands."""
    W1 = np.asarray(pt["conv1_w"], np.float32)
    b1 = np.asarray(pt["conv1_b"], np.float32)
    W2 = np.asarray(pt["conv2_w"], np.float32)
    b2 = np.asarray(pt["conv2_b"], np.float32)
    f1w = np.asarray(pt["fc1_w"], np.float32)
    f1b = np.asarray(pt["fc1_b"], np.float32)
    f2w = np.asarray(pt["fc2_w"], np.float32)
    f2b = np.asarray(pt["fc2_b"], np.float32)
    f3w = np.asarray(pt["fc3_w"], np.float32)
    f3b = np.asarray(pt["fc3_b"], np.float32)

    # conv1 banded weights: z1[., o*24+x] = sum_i x_row(y+i) @ bw1[i][:, o*24+x]
    bw1 = np.zeros((5, 28, 144), np.float32)
    for i in range(5):
        for o in range(6):
            for x in range(24):
                for j in range(5):
                    bw1[i, x + j, o * 24 + x] = W1[o, 0, i, j]

    # pool1 column selectors (144 -> 72 cols, zero-padded to 128 lanes)
    c1e = np.zeros((144, 128), np.float32)
    c1o = np.zeros((144, 128), np.float32)
    for m in range(72):
        c1e[2 * m, m] = 1.0
        c1o[2 * m + 1, m] = 1.0
    b1row = np.zeros((1, 128), np.float32)
    b1row[0, :72] = np.repeat(b1, 12)          # bias per h1 column c*12+xo

    # conv2 banded weights over fused (channel, x) lanes of h1; K padded to 128
    bw2 = np.zeros((5, 128, 128), np.float32)
    for i in range(5):
        for o in range(16):
            for c in range(6):
                for x in range(8):
                    for j in range(5):
                        bw2[i, c * 12 + x + j, o * 8 + x] = W2[o, c, i, j]

    # pool2 column selectors (128 -> 64 cols, zero-padded to 128 lanes)
    c2e = np.zeros((128, 128), np.float32)
    c2o = np.zeros((128, 128), np.float32)
    for m in range(64):
        c2e[2 * m, m] = 1.0
        c2o[2 * m + 1, m] = 1.0
    b2row = np.zeros((1, 128), np.float32)
    b2row[0, :64] = np.repeat(b2, 4)           # bias per f column o*4+xo

    # fc1: kernel features f_chunk[yp][b, o*4+xo] <-> PyTorch flat o*16+yp*4+xo
    wf1 = np.zeros((4, 128, 128), np.float32)
    for yp in range(4):
        for o in range(16):
            for xo in range(4):
                wf1[yp, o * 4 + xo, :120] = f1w[:, o * 16 + yp * 4 + xo]
    bf1 = np.zeros((1, 128), np.float32)
    bf1[0, :120] = f1b

    # fc2 / fc3: pre-transposed to (K, N), zero-padded to 128x128.
    wf2 = np.zeros((128, 128), np.float32)
    wf2[:120, :84] = f2w.T
    bf2 = np.zeros((1, 128), np.float32)
    bf2[0, :84] = f2b
    wf3 = np.zeros((128, 128), np.float32)
    wf3[:84, :10] = f3w.T
    bf3 = np.zeros((1, 128), np.float32)
    bf3[0, :10] = f3b

    host = dict(bw1=bw1, c1e=c1e, c1o=c1o, b1row=b1row,
                bw2=bw2, c2e=c2e, c2o=c2o, b2row=b2row,
                wf1=wf1, bf1=bf1, wf2=wf2, bf2=bf2, wf3=wf3, bf3=bf3)
    return {k: jnp.asarray(v) for k, v in host.items()}


# ----------------------------------------------------------------------------
# Plain-JAX reference (mirrors the PyTorch forward exactly) for verification
# ----------------------------------------------------------------------------
def reference_forward(pt, x):
    hi = lax.Precision.HIGHEST
    y = lax.conv_general_dilated(x, pt["conv1_w"], (1, 1), "VALID",
                                 dimension_numbers=("NCHW", "OIHW", "NCHW"),
                                 precision=hi)
    y = jnp.maximum(y + pt["conv1_b"].reshape(1, -1, 1, 1), 0.0)
    y = lax.reduce_window(y, -jnp.inf, lax.max, (1, 1, 2, 2), (1, 1, 2, 2), "VALID")
    y = lax.conv_general_dilated(y, pt["conv2_w"], (1, 1), "VALID",
                                 dimension_numbers=("NCHW", "OIHW", "NCHW"),
                                 precision=hi)
    y = jnp.maximum(y + pt["conv2_b"].reshape(1, -1, 1, 1), 0.0)
    y = lax.reduce_window(y, -jnp.inf, lax.max, (1, 1, 2, 2), (1, 1, 2, 2), "VALID")
    y = y.reshape(y.shape[0], -1)
    y = jnp.maximum(jnp.dot(y, pt["fc1_w"].T, precision=hi) + pt["fc1_b"], 0.0)
    y = jnp.maximum(jnp.dot(y, pt["fc2_w"].T, precision=hi) + pt["fc2_b"], 0.0)
    y = jnp.maximum(jnp.dot(y, pt["fc3_w"].T, precision=hi) + pt["fc3_b"], 0.0)
    return y


if __name__ == "__main__":
    key = jax.random.PRNGKey(0)
    pkey, xkey, xkey2 = jax.random.split(key, 3)

    torch_params = init_torch_params(pkey)
    kparams = prepare_kernel_params(torch_params)

    # Primary check: small batch (padded to one 8-sample tile inside the call).
    x = jax.random.normal(xkey, (4, 1, 28, 28), jnp.float32)
    out = jax.block_until_ready(lenet_forward(kparams, x))
    ref = jax.block_until_ready(reference_forward(torch_params, x))
    assert out.shape == (4, 10)
    assert bool(jnp.all(out >= 0.0))          # final relu5, as in the reference
    err = float(jnp.max(jnp.abs(out - ref)))
    assert err < 3e-3, f"mismatch vs reference: max_err={err}"

    # Secondary check: non-tile-multiple batch -> zero-padded, 2 grid steps
    # (exercises the fixed fallback path and the v7x two-TensorCore grid).
    x2 = jax.random.normal(xkey2, (40, 1, 28, 28), jnp.float32)
    out2 = jax.block_until_ready(lenet_forward(kparams, x2))
    ref2 = jax.block_until_ready(reference_forward(torch_params, x2))
    assert out2.shape == (40, 10)
    err2 = float(jnp.max(jnp.abs(out2 - ref2)))
    assert err2 < 3e-3, f"mismatch vs reference (batch=40): max_err={err2}"

    print("KERNEL_OK")
</pallas_src>

<mosaic_0001>
module attributes {stable_mosaic.version = 11 : i64} {
  func.func @_lenet_kernel(%arg0: i32, %arg1: memref<1x224x28xf32, #tpu.memory_space<vmem>>, %arg2: memref<5x28x144xf32, #tpu.memory_space<vmem>>, %arg3: memref<144x128xf32, #tpu.memory_space<vmem>>, %arg4: memref<144x128xf32, #tpu.memory_space<vmem>>, %arg5: memref<1x128xf32, #tpu.memory_space<vmem>>, %arg6: memref<5x128x128xf32, #tpu.memory_space<vmem>>, %arg7: memref<128x128xf32, #tpu.memory_space<vmem>>, %arg8: memref<128x128xf32, #tpu.memory_space<vmem>>, %arg9: memref<1x128xf32, #tpu.memory_space<vmem>>, %arg10: memref<4x128x128xf32, #tpu.memory_space<vmem>>, %arg11: memref<1x128xf32, #tpu.memory_space<vmem>>, %arg12: memref<128x128xf32, #tpu.memory_space<vmem>>, %arg13: memref<1x128xf32, #tpu.memory_space<vmem>>, %arg14: memref<128x128xf32, #tpu.memory_space<vmem>>, %arg15: memref<1x128xf32, #tpu.memory_space<vmem>>, %arg16: memref<8x128xf32, #tpu.memory_space<vmem>>, %arg17: memref<96x128xf32, #tpu.memory_space<vmem>>) attributes {dimension_semantics = [#tpu.dimension_semantics<parallel>], iteration_bounds = array<i64: 1>, scalar_prefetch = 0 : i64, scratch_operands = 1 : i64, tpu.core_type = #tpu.core_type<tc>, window_params = [{transform_indices = @transform_0, window_bounds = array<i64: 1, 224, 28>}, {pipeline_mode = #tpu.pipeline_mode<synchronous>, transform_indices = @transform_1, window_bounds = array<i64: 5, 28, 144>}, {pipeline_mode = #tpu.pipeline_mode<synchronous>, transform_indices = @transform_2, window_bounds = array<i64: 144, 128>}, {pipeline_mode = #tpu.pipeline_mode<synchronous>, transform_indices = @transform_3, window_bounds = array<i64: 144, 128>}, {pipeline_mode = #tpu.pipeline_mode<synchronous>, transform_indices = @transform_4, window_bounds = array<i64: 1, 128>}, {pipeline_mode = #tpu.pipeline_mode<synchronous>, transform_indices = @transform_5, window_bounds = array<i64: 5, 128, 128>}, {pipeline_mode = #tpu.pipeline_mode<synchronous>, transform_indices = @transform_6, window_bounds = array<i64: 128, 128>}, {pipeline_mode = #tpu.pipeline_mode<synchronous>, transform_indices = @transform_7, window_bounds = array<i64: 128, 128>}, {pipeline_mode = #tpu.pipeline_mode<synchronous>, transform_indices = @transform_8, window_bounds = array<i64: 1, 128>}, {pipeline_mode = #tpu.pipeline_mode<synchronous>, transform_indices = @transform_9, window_bounds = array<i64: 4, 128, 128>}, {pipeline_mode = #tpu.pipeline_mode<synchronous>, transform_indices = @transform_10, window_bounds = array<i64: 1, 128>}, {pipeline_mode = #tpu.pipeline_mode<synchronous>, transform_indices = @transform_11, window_bounds = array<i64: 128, 128>}, {pipeline_mode = #tpu.pipeline_mode<synchronous>, transform_indices = @transform_12, window_bounds = array<i64: 1, 128>}, {pipeline_mode = #tpu.pipeline_mode<synchronous>, transform_indices = @transform_13, window_bounds = array<i64: 128, 128>}, {pipeline_mode = #tpu.pipeline_mode<synchronous>, transform_indices = @transform_14, window_bounds = array<i64: 1, 128>}, {transform_indices = @transform_15, window_bounds = array<i64: 8, 128>}]} {
    %c0 = arith.constant 0 : index
    %c0_0 = arith.constant 0 : index
    %c0_1 = arith.constant 0 : index
    %0 = vector.load %arg1[%c0, %c0_0, %c0_1] : memref<1x224x28xf32, #tpu.memory_space<vmem>>, vector<1x192x28xf32>
    %1 = vector.shape_cast %0 : vector<1x192x28xf32> to vector<192x28xf32>
    %c0_2 = arith.constant 0 : index
    %c0_3 = arith.constant 0 : index
    %c0_4 = arith.constant 0 : index
    %2 = vector.load %arg2[%c0_2, %c0_3, %c0_4] : memref<5x28x144xf32, #tpu.memory_space<vmem>>, vector<1x28x144xf32>
    %3 = vector.shape_cast %2 : vector<1x28x144xf32> to vector<28x144xf32>
    %cst = arith.constant dense<0.000000e+00> : vector<192x144xf32>
    %4 = tpu.matmul %1, %3, %cst {dimension_numbers = #tpu.dot_dimension_numbers<[1], [0], [0], [1], [0, 0, 1, 1], [], []>} : vector<192x28xf32>, vector<28x144xf32>, vector<192x144xf32> -> vector<192x144xf32>
    %c0_5 = arith.constant 0 : index
    %c8 = arith.constant 8 : index
    %c0_6 = arith.constant 0 : index
    %5 = vector.load %arg1[%c0_5, %c8, %c0_6] : memref<1x224x28xf32, #tpu.memory_space<vmem>>, vector<1x192x28xf32>
    %6 = vector.shape_cast %5 : vector<1x192x28xf32> to vector<192x28xf32>
    %c1 = arith.constant 1 : index
    %c0_7 = arith.constant 0 : index
    %c0_8 = arith.constant 0 : index
    %7 = vector.load %arg2[%c1, %c0_7, %c0_8] : memref<5x28x144xf32, #tpu.memory_space<vmem>>, vector<1x28x144xf32>
    %8 = vector.shape_cast %7 : vector<1x28x144xf32> to vector<28x144xf32>
    %cst_9 = arith.constant dense<0.000000e+00> : vector<192x144xf32>
    %9 = tpu.matmul %6, %8, %cst_9 {dimension_numbers = #tpu.dot_dimension_numbers<[1], [0], [0], [1], [0, 0, 1, 1], [], []>} : vector<192x28xf32>, vector<28x144xf32>, vector<192x144xf32> -> vector<192x144xf32>
    %10 = arith.addf %4, %9 : vector<192x144xf32>
    %c0_10 = arith.constant 0 : index
    %c16 = arith.constant 16 : index
    %c0_11 = arith.constant 0 : index
    %11 = vector.load %arg1[%c0_10, %c16, %c0_11] : memref<1x224x28xf32, #tpu.memory_space<vmem>>, vector<1x192x28xf32>
    %12 = vector.shape_cast %11 : vector<1x192x28xf32> to vector<192x28xf32>
    %c2 = arith.constant 2 : index
    %c0_12 = arith.constant 0 : index
    %c0_13 = arith.constant 0 : index
    %13 = vector.load %arg2[%c2, %c0_12, %c0_13] : memref<5x28x144xf32, #tpu.memory_space<vmem>>, vector<1x28x144xf32>
    %14 = vector.shape_cast %13 : vector<1x28x144xf32> to vector<28x144xf32>
    %cst_14 = arith.constant dense<0.000000e+00> : vector<192x144xf32>
    %15 = tpu.matmul %12, %14, %cst_14 {dimension_numbers = #tpu.dot_dimension_numbers<[1], [0], [0], [1], [0, 0, 1, 1], [], []>} : vector<192x28xf32>, vector<28x144xf32>, vector<192x144xf32> -> vector<192x144xf32>
    %16 = arith.addf %10, %15 : vector<192x144xf32>
    %c0_15 = arith.constant 0 : index
    %c24 = arith.constant 24 : index
    %c0_16 = arith.constant 0 : index
    %17 = vector.load %arg1[%c0_15, %c24, %c0_16] : memref<1x224x28xf32, #tpu.memory_space<vmem>>, vector<1x192x28xf32>
    %18 = vector.shape_cast %17 : vector<1x192x28xf32> to vector<192x28xf32>
    %c3 = arith.constant 3 : index
    %c0_17 = arith.constant 0 : index
    %c0_18 = arith.constant 0 : index
    %19 = vector.load %arg2[%c3, %c0_17, %c0_18] : memref<5x28x144xf32, #tpu.memory_space<vmem>>, vector<1x28x144xf32>
    %20 = vector.shape_cast %19 : vector<1x28x144xf32> to vector<28x144xf32>
    %cst_19 = arith.constant dense<0.000000e+00> : vector<192x144xf32>
    %21 = tpu.matmul %18, %20, %cst_19 {dimension_numbers = #tpu.dot_dimension_numbers<[1], [0], [0], [1], [0, 0, 1, 1], [], []>} : vector<192x28xf32>, vector<28x144xf32>, vector<192x144xf32> -> vector<192x144xf32>
    %22 = arith.addf %16, %21 : vector<192x144xf32>
    %c0_20 = arith.constant 0 : index
    %c32 = arith.constant 32 : index
    %c0_21 = arith.constant 0 : index
    %23 = vector.load %arg1[%c0_20, %c32, %c0_21] : memref<1x224x28xf32, #tpu.memory_space<vmem>>, vector<1x192x28xf32>
    %24 = vector.shape_cast %23 : vector<1x192x28xf32> to vector<192x28xf32>
    %c4 = arith.constant 4 : index
    %c0_22 = arith.constant 0 : index
    %c0_23 = arith.constant 0 : index
    %25 = vector.load %arg2[%c4, %c0_22, %c0_23] : memref<5x28x144xf32, #tpu.memory_space<vmem>>, vector<1x28x144xf32>
    %26 = vector.shape_cast %25 : vector<1x28x144xf32> to vector<28x144xf32>
    %cst_24 = arith.constant dense<0.000000e+00> : vector<192x144xf32>
    %27 = tpu.matmul %24, %26, %cst_24 {dimension_numbers = #tpu.dot_dimension_numbers<[1], [0], [0], [1], [0, 0, 1, 1], [], []>} : vector<192x28xf32>, vector<28x144xf32>, vector<192x144xf32> -> vector<192x144xf32>
    %28 = arith.addf %22, %27 : vector<192x144xf32>
    %c0_25 = arith.constant 0 : index
    %c0_26 = arith.constant 0 : index
    %29 = vector.load %arg3[%c0_25, %c0_26] : memref<144x128xf32, #tpu.memory_space<vmem>>, vector<144x128xf32>
    %cst_27 = arith.constant dense<0.000000e+00> : vector<192x128xf32>
    %30 = tpu.matmul %28, %29, %cst_27 {dimension_numbers = #tpu.dot_dimension_numbers<[1], [0], [0], [1], [0, 0, 1, 1], [], []>} : vector<192x144xf32>, vector<144x128xf32>, vector<192x128xf32> -> vector<192x128xf32>
    %c0_28 = arith.constant 0 : index
    %c0_29 = arith.constant 0 : index
    %31 = vector.load %arg4[%c0_28, %c0_29] : memref<144x128xf32, #tpu.memory_space<vmem>>, vector<144x128xf32>
    %cst_30 = arith.constant dense<0.000000e+00> : vector<192x128xf32>
    %32 = tpu.matmul %28, %31, %cst_30 {dimension_numbers = #tpu.dot_dimension_numbers<[1], [0], [0], [1], [0, 0, 1, 1], [], []>} : vector<192x144xf32>, vector<144x128xf32>, vector<192x128xf32> -> vector<192x128xf32>
    %33 = arith.maximumf %30, %32 : vector<192x128xf32>
    %c0_31 = arith.constant 0 : index
    %c0_32 = arith.constant 0 : index
    %34 = vector.load %arg5[%c0_31, %c0_32] : memref<1x128xf32, #tpu.memory_space<vmem>>, vector<1x128xf32>
    %35 = vector.extract_strided_slice %33 {offsets = [0, 0], sizes = [8, 128], strides = [1, 1]} : vector<192x128xf32> to vector<8x128xf32>
    %36 = vector.extract_strided_slice %33 {offsets = [8, 0], sizes = [8, 128], strides = [1, 1]} : vector<192x128xf32> to vector<8x128xf32>
    %37 = arith.maximumf %35, %36 : vector<8x128xf32>
    %38 = vector.broadcast %34 : vector<1x128xf32> to vector<8x128xf32>
    %39 = arith.addf %37, %38 : vector<8x128xf32>
    %cst_33 = arith.constant 0.000000e+00 : f32
    %40 = vector.broadcast %cst_33 : f32 to vector<8x128xf32>
    %41 = arith.maximumf %39, %40 : vector<8x128xf32>
    %c0_34 = arith.constant 0 : index
    %c0_35 = arith.constant 0 : index
    %42 = vector.load %arg17[%c0_34, %c0_35] : memref<96x128xf32, #tpu.memory_space<vmem>>, vector<8x128xf32>
    tpu.vector_store %arg17[%c0_34, %c0_35], %41 {strides = array<i32>} : memref<96x128xf32, #tpu.memory_space<vmem>>, vector<8x128xf32>,
    %43 = vector.extract_strided_slice %33 {offsets = [16, 0], sizes = [8, 128], strides = [1, 1]} : vector<192x128xf32> to vector<8x128xf32>
    %44 = vector.extract_strided_slice %33 {offsets = [24, 0], sizes = [8, 128], strides = [1, 1]} : vector<192x128xf32> to vector<8x128xf32>
    %45 = arith.maximumf %43, %44 : vector<8x128xf32>
    %46 = vector.broadcast %34 : vector<1x128xf32> to vector<8x128xf32>
    %47 = arith.addf %45, %46 : vector<8x128xf32>
    %cst_36 = arith.constant 0.000000e+00 : f32
    %48 = vector.broadcast %cst_36 : f32 to vector<8x128xf32>
    %49 = arith.maximumf %47, %48 : vector<8x128xf32>
    %c8_37 = arith.constant 8 : index
    %c0_38 = arith.constant 0 : index
    %50 = vector.load %arg17[%c8_37, %c0_38] : memref<96x128xf32, #tpu.memory_space<vmem>>, vector<8x128xf32>
    tpu.vector_store %arg17[%c8_37, %c0_38], %49 {strides = array<i32>} : memref<96x128xf32, #tpu.memory_space<vmem>>, vector<8x128xf32>,
    %51 = vector.extract_strided_slice %33 {offsets = [32, 0], sizes = [8, 128], strides = [1, 1]} : vector<192x128xf32> to vector<8x128xf32>
    %52 = vector.extract_strided_slice %33 {offsets = [40, 0], sizes = [8, 128], strides = [1, 1]} : vector<192x128xf32> to vector<8x128xf32>
    %53 = arith.maximumf %51, %52 : vector<8x128xf32>
    %54 = vector.broadcast %34 : vector<1x128xf32> to vector<8x128xf32>
    %55 = arith.addf %53, %54 : vector<8x128xf32>
    %cst_39 = arith.constant 0.000000e+00 : f32
    %56 = vector.broadcast %cst_39 : f32 to vector<8x128xf32>
    %57 = arith.maximumf %55, %56 : vector<8x128xf32>
    %c16_40 = arith.constant 16 : index
    %c0_41 = arith.constant 0 : index
    %58 = vector.load %arg17[%c16_40, %c0_41] : memref<96x128xf32, #tpu.memory_space<vmem>>, vector<8x128xf32>
    tpu.vector_store %arg17[%c16_40, %c0_41], %57 {strides = array<i32>} : memref<96x128xf32, #tpu.memory_space<vmem>>, vector<8x128xf32>,
    %59 = vector.extract_strided_slice %33 {offsets = [48, 0], sizes = [8, 128], strides = [1, 1]} : vector<192x128xf32> to vector<8x128xf32>
    %60 = vector.extract_strided_slice %33 {offsets = [56, 0], sizes = [8, 128], strides = [1, 1]} : vector<192x128xf32> to vector<8x128xf32>
    %61 = arith.maximumf %59, %60 : vector<8x128xf32>
    %62 = vector.broadcast %34 : vector<1x128xf32> to vector<8x128xf32>
    %63 = arith.addf %61, %62 : vector<8x128xf32>
    %cst_42 = arith.constant 0.000000e+00 : f32
    %64 = vector.broadcast %cst_42 : f32 to vector<8x128xf32>
    %65 = arith.maximumf %63, %64 : vector<8x128xf32>
    %c24_43 = arith.constant 24 : index
    %c0_44 = arith.constant 0 : index
    %66 = vector.load %arg17[%c24_43, %c0_44] : memref<96x128xf32, #tpu.memory_space<vmem>>, vector<8x128xf32>
    tpu.vector_store %arg17[%c24_43, %c0_44], %65 {strides = array<i32>} : memref<96x128xf32, #tpu.memory_space<vmem>>, vector<8x128xf32>,
    %67 = vector.extract_strided_slice %33 {offsets = [64, 0], sizes = [8, 128], strides = [1, 1]} : vector<192x128xf32> to vector<8x128xf32>
    %68 = vector.extract_strided_slice %33 {offsets = [72, 0], sizes = [8, 128], strides = [1, 1]} : vector<192x128xf32> to vector<8x128xf32>
    %69 = arith.maximumf %67, %68 : vector<8x128xf32>
    %70 = vector.broadcast %34 : vector<1x128xf32> to vector<8x128xf32>
    %71 = arith.addf %69, %70 : vector<8x128xf32>
    %cst_45 = arith.constant 0.000000e+00 : f32
    %72 = vector.broadcast %cst_45 : f32 to vector<8x128xf32>
    %73 = arith.maximumf %71, %72 : vector<8x128xf32>
    %c32_46 = arith.constant 32 : index
    %c0_47 = arith.constant 0 : index
    %74 = vector.load %arg17[%c32_46, %c0_47] : memref<96x128xf32, #tpu.memory_space<vmem>>, vector<8x128xf32>
    tpu.vector_store %arg17[%c32_46, %c0_47], %73 {strides = array<i32>} : memref<96x128xf32, #tpu.memory_space<vmem>>, vector<8x128xf32>,
    %75 = vector.extract_strided_slice %33 {offsets = [80, 0], sizes = [8, 128], strides = [1, 1]} : vector<192x128xf32> to vector<8x128xf32>
    %76 = vector.extract_strided_slice %33 {offsets = [88, 0], sizes = [8, 128], strides = [1, 1]} : vector<192x128xf32> to vector<8x128xf32>
    %77 = arith.maximumf %75, %76 : vector<8x128xf32>
    %78 = vector.broadcast %34 : vector<1x128xf32> to vector<8x128xf32>
    %79 = arith.addf %77, %78 : vector<8x128xf32>
    %cst_48 = arith.constant 0.000000e+00 : f32
    %80 = vector.broadcast %cst_48 : f32 to vector<8x128xf32>
    %81 = arith.maximumf %79, %80 : vector<8x128xf32>
    %c40 = arith.constant 40 : index
    %c0_49 = arith.constant 0 : index
    %82 = vector.load %arg17[%c40, %c0_49] : memref<96x128xf32, #tpu.memory_space<vmem>>, vector<8x128xf32>
    tpu.vector_store %arg17[%c40, %c0_49], %81 {strides = array<i32>} : memref<96x128xf32, #tpu.memory_space<vmem>>, vector<8x128xf32>,
    %83 = vector.extract_strided_slice %33 {offsets = [96, 0], sizes = [8, 128], strides = [1, 1]} : vector<192x128xf32> to vector<8x128xf32>
    %84 = vector.extract_strided_slice %33 {offsets = [104, 0], sizes = [8, 128], strides = [1, 1]} : vector<192x128xf32> to vector<8x128xf32>
    %85 = arith.maximumf %83, %84 : vector<8x128xf32>
    %86 = vector.broadcast %34 : vector<1x128xf32> to vector<8x128xf32>
    %87 = arith.addf %85, %86 : vector<8x128xf32>
    %cst_50 = arith.constant 0.000000e+00 : f32
    %88 = vector.broadcast %cst_50 : f32 to vector<8x128xf32>
    %89 = arith.maximumf %87, %88 : vector<8x128xf32>
    %c48 = arith.constant 48 : index
    %c0_51 = arith.constant 0 : index
    %90 = vector.load %arg17[%c48, %c0_51] : memref<96x128xf32, #tpu.memory_space<vmem>>, vector<8x128xf32>
    tpu.vector_store %arg17[%c48, %c0_51], %89 {strides = array<i32>} : memref<96x128xf32, #tpu.memory_space<vmem>>, vector<8x128xf32>,
    %91 = vector.extract_strided_slice %33 {offsets = [112, 0], sizes = [8, 128], strides = [1, 1]} : vector<192x128xf32> to vector<8x128xf32>
    %92 = vector.extract_strided_slice %33 {offsets = [120, 0], sizes = [8, 128], strides = [1, 1]} : vector<192x128xf32> to vector<8x128xf32>
    %93 = arith.maximumf %91, %92 : vector<8x128xf32>
    %94 = vector.broadcast %34 : vector<1x128xf32> to vector<8x128xf32>
    %95 = arith.addf %93, %94 : vector<8x128xf32>
    %cst_52 = arith.constant 0.000000e+00 : f32
    %96 = vector.broadcast %cst_52 : f32 to vector<8x128xf32>
    %97 = arith.maximumf %95, %96 : vector<8x128xf32>
    %c56 = arith.constant 56 : index
    %c0_53 = arith.constant 0 : index
    %98 = vector.load %arg17[%c56, %c0_53] : memref<96x128xf32, #tpu.memory_space<vmem>>, vector<8x128xf32>
    tpu.vector_store %arg17[%c56, %c0_53], %97 {strides = array<i32>} : memref<96x128xf32, #tpu.memory_space<vmem>>, vector<8x128xf32>,
    %99 = vector.extract_strided_slice %33 {offsets = [128, 0], sizes = [8, 128], strides = [1, 1]} : vector<192x128xf32> to vector<8x128xf32>
    %100 = vector.extract_strided_slice %33 {offsets = [136, 0], sizes = [8, 128], strides = [1, 1]} : vector<192x128xf32> to vector<8x128xf32>
    %101 = arith.maximumf %99, %100 : vector<8x128xf32>
    %102 = vector.broadcast %34 : vector<1x128xf32> to vector<8x128xf32>
    %103 = arith.addf %101, %102 : vector<8x128xf32>
    %cst_54 = arith.constant 0.000000e+00 : f32
    %104 = vector.broadcast %cst_54 : f32 to vector<8x128xf32>
    %105 = arith.maximumf %103, %104 : vector<8x128xf32>
    %c64 = arith.constant 64 : index
    %c0_55 = arith.constant 0 : index
    %106 = vector.load %arg17[%c64, %c0_55] : memref<96x128xf32, #tpu.memory_space<vmem>>, vector<8x128xf32>
    tpu.vector_store %arg17[%c64, %c0_55], %105 {strides = array<i32>} : memref<96x128xf32, #tpu.memory_space<vmem>>, vector<8x128xf32>,
    %107 = vector.extract_strided_slice %33 {offsets = [144, 0], sizes = [8, 128], strides = [1, 1]} : vector<192x128xf32> to vector<8x128xf32>
    %108 = vector.extract_strided_slice %33 {offsets = [152, 0], sizes = [8, 128], strides = [1, 1]} : vector<192x128xf32> to vector<8x128xf32>
    %109 = arith.maximumf %107, %108 : vector<8x128xf32>
    %110 = vector.broadcast %34 : vector<1x128xf32> to vector<8x128xf32>
    %111 = arith.addf %109, %110 : vector<8x128xf32>
    %cst_56 = arith.constant 0.000000e+00 : f32
    %112 = vector.broadcast %cst_56 : f32 to vector<8x128xf32>
    %113 = arith.maximumf %111, %112 : vector<8x128xf32>
    %c72 = arith.constant 72 : index
    %c0_57 = arith.constant 0 : index
    %114 = vector.load %arg17[%c72, %c0_57] : memref<96x128xf32, #tpu.memory_space<vmem>>, vector<8x128xf32>
    tpu.vector_store %arg17[%c72, %c0_57], %113 {strides = array<i32>} : memref<96x128xf32, #tpu.memory_space<vmem>>, vector<8x128xf32>,
    %115 = vector.extract_strided_slice %33 {offsets = [160, 0], sizes = [8, 128], strides = [1, 1]} : vector<192x128xf32> to vector<8x128xf32>
    %116 = vector.extract_strided_slice %33 {offsets = [168, 0], sizes = [8, 128], strides = [1, 1]} : vector<192x128xf32> to vector<8x128xf32>
    %117 = arith.maximumf %115, %116 : vector<8x128xf32>
    %118 = vector.broadcast %34 : vector<1x128xf32> to vector<8x128xf32>
    %119 = arith.addf %117, %118 : vector<8x128xf32>
    %cst_58 = arith.constant 0.000000e+00 : f32
    %120 = vector.broadcast %cst_58 : f32 to vector<8x128xf32>
    %121 = arith.maximumf %119, %120 : vector<8x128xf32>
    %c80 = arith.constant 80 : index
    %c0_59 = arith.constant 0 : index
    %122 = vector.load %arg17[%c80, %c0_59] : memref<96x128xf32, #tpu.memory_space<vmem>>, vector<8x128xf32>
    tpu.vector_store %arg17[%c80, %c0_59], %121 {strides = array<i32>} : memref<96x128xf32, #tpu.memory_space<vmem>>, vector<8x128xf32>,
    %123 = vector.extract_strided_slice %33 {offsets = [176, 0], sizes = [8, 128], strides = [1, 1]} : vector<192x128xf32> to vector<8x128xf32>
    %124 = vector.extract_strided_slice %33 {offsets = [184, 0], sizes = [8, 128], strides = [1, 1]} : vector<192x128xf32> to vector<8x128xf32>
    %125 = arith.maximumf %123, %124 : vector<8x128xf32>
    %126 = vector.broadcast %34 : vector<1x128xf32> to vector<8x128xf32>
    %127 = arith.addf %125, %126 : vector<8x128xf32>
    %cst_60 = arith.constant 0.000000e+00 : f32
    %128 = vector.broadcast %cst_60 : f32 to vector<8x128xf32>
    %129 = arith.maximumf %127, %128 : vector<8x128xf32>
    %c88 = arith.constant 88 : index
    %c0_61 = arith.constant 0 : index
    %130 = vector.load %arg17[%c88, %c0_61] : memref<96x128xf32, #tpu.memory_space<vmem>>, vector<8x128xf32>
    tpu.vector_store %arg17[%c88, %c0_61], %129 {strides = array<i32>} : memref<96x128xf32, #tpu.memory_space<vmem>>, vector<8x128xf32>,
    %c0_62 = arith.constant 0 : index
    %c0_63 = arith.constant 0 : index
    %131 = vector.load %arg17[%c0_62, %c0_63] : memref<96x128xf32, #tpu.memory_space<vmem>>, vector<64x128xf32>
    %c0_64 = arith.constant 0 : index
    %c0_65 = arith.constant 0 : index
    %c0_66 = arith.constant 0 : index
    %132 = vector.load %arg6[%c0_64, %c0_65, %c0_66] : memref<5x128x128xf32, #tpu.memory_space<vmem>>, vector<1x128x128xf32>
    %133 = vector.shape_cast %132 : vector<1x128x128xf32> to vector<128x128xf32>
    %cst_67 = arith.constant dense<0.000000e+00> : vector<64x128xf32>
    %134 = tpu.matmul %131, %133, %cst_67 {dimension_numbers = #tpu.dot_dimension_numbers<[1], [0], [0], [1], [0, 0, 1, 1], [], []>} : vector<64x128xf32>, vector<128x128xf32>, vector<64x128xf32> -> vector<64x128xf32>
    %c8_68 = arith.constant 8 : index
    %c0_69 = arith.constant 0 : index
    %135 = vector.load %arg17[%c8_68, %c0_69] : memref<96x128xf32, #tpu.memory_space<vmem>>, vector<64x128xf32>
    %c1_70 = arith.constant 1 : index
    %c0_71 = arith.constant 0 : index
    %c0_72 = arith.constant 0 : index
    %136 = vector.load %arg6[%c1_70, %c0_71, %c0_72] : memref<5x128x128xf32, #tpu.memory_space<vmem>>, vector<1x128x128xf32>
    %137 = vector.shape_cast %136 : vector<1x128x128xf32> to vector<128x128xf32>
    %cst_73 = arith.constant dense<0.000000e+00> : vector<64x128xf32>
    %138 = tpu.matmul %135, %137, %cst_73 {dimension_numbers = #tpu.dot_dimension_numbers<[1], [0], [0], [1], [0, 0, 1, 1], [], []>} : vector<64x128xf32>, vector<128x128xf32>, vector<64x128xf32> -> vector<64x128xf32>
    %139 = arith.addf %134, %138 : vector<64x128xf32>
    %c16_74 = arith.constant 16 : index
    %c0_75 = arith.constant 0 : index
    %140 = vector.load %arg17[%c16_74, %c0_75] : memref<96x128xf32, #tpu.memory_space<vmem>>, vector<64x128xf32>
    %c2_76 = arith.constant 2 : index
    %c0_77 = arith.constant 0 : index
    %c0_78 = arith.constant 0 : index
    %141 = vector.load %arg6[%c2_76, %c0_77, %c0_78] : memref<5x128x128xf32, #tpu.memory_space<vmem>>, vector<1x128x128xf32>
    %142 = vector.shape_cast %141 : vector<1x128x128xf32> to vector<128x128xf32>
    %cst_79 = arith.constant dense<0.000000e+00> : vector<64x128xf32>
    %143 = tpu.matmul %140, %142, %cst_79 {dimension_numbers = #tpu.dot_dimension_numbers<[1], [0], [0], [1], [0, 0, 1, 1], [], []>} : vector<64x128xf32>, vector<128x128xf32>, vector<64x128xf32> -> vector<64x128xf32>
    %144 = arith.addf %139, %143 : vector<64x128xf32>
    %c24_80 = arith.constant 24 : index
    %c0_81 = arith.constant 0 : index
    %145 = vector.load %arg17[%c24_80, %c0_81] : memref<96x128xf32, #tpu.memory_space<vmem>>, vector<64x128xf32>
    %c3_82 = arith.constant 3 : index
    %c0_83 = arith.constant 0 : index
    %c0_84 = arith.constant 0 : index
    %146 = vector.load %arg6[%c3_82, %c0_83, %c0_84] : memref<5x128x128xf32, #tpu.memory_space<vmem>>, vector<1x128x128xf32>
    %147 = vector.shape_cast %146 : vector<1x128x128xf32> to vector<128x128xf32>
    %cst_85 = arith.constant dense<0.000000e+00> : vector<64x128xf32>
    %148 = tpu.matmul %145, %147, %cst_85 {dimension_numbers = #tpu.dot_dimension_numbers<[1], [0], [0], [1], [0, 0, 1, 1], [], []>} : vector<64x128xf32>, vector<128x128xf32>, vector<64x128xf32> -> vector<64x128xf32>
    %149 = arith.addf %144, %148 : vector<64x128xf32>
    %c32_86 = arith.constant 32 : index
    %c0_87 = arith.constant 0 : index
    %150 = vector.load %arg17[%c32_86, %c0_87] : memref<96x128xf32, #tpu.memory_space<vmem>>, vector<64x128xf32>
    %c4_88 = arith.constant 4 : index
    %c0_89 = arith.constant 0 : index
    %c0_90 = arith.constant 0 : index
    %151 = vector.load %arg6[%c4_88, %c0_89, %c0_90] : memref<5x128x128xf32, #tpu.memory_space<vmem>>, vector<1x128x128xf32>
    %152 = vector.shape_cast %151 : vector<1x128x128xf32> to vector<128x128xf32>
    %cst_91 = arith.constant dense<0.000000e+00> : vector<64x128xf32>
    %153 = tpu.matmul %150, %152, %cst_91 {dimension_numbers = #tpu.dot_dimension_numbers<[1], [0], [0], [1], [0, 0, 1, 1], [], []>} : vector<64x128xf32>, vector<128x128xf32>, vector<64x128xf32> -> vector<64x128xf32>
    %154 = arith.addf %149, %153 : vector<64x128xf32>
    %c0_92 = arith.constant 0 : index
    %c0_93 = arith.constant 0 : index
    %155 = vector.load %arg7[%c0_92, %c0_93] : memref<128x128xf32, #tpu.memory_space<vmem>>, vector<128x128xf32>
    %cst_94 = arith.constant dense<0.000000e+00> : vector<64x128xf32>
    %156 = tpu.matmul %154, %155, %cst_94 {dimension_numbers = #tpu.dot_dimension_numbers<[1], [0], [0], [1], [0, 0, 1, 1], [], []>} : vector<64x128xf32>, vector<128x128xf32>, vector<64x128xf32> -> vector<64x128xf32>
    %c0_95 = arith.constant 0 : index
    %c0_96 = arith.constant 0 : index
    %157 = vector.load %arg8[%c0_95, %c0_96] : memref<128x128xf32, #tpu.memory_space<vmem>>, vector<128x128xf32>
    %cst_97 = arith.constant dense<0.000000e+00> : vector<64x128xf32>
    %158 = tpu.matmul %154, %157, %cst_97 {dimension_numbers = #tpu.dot_dimension_numbers<[1], [0], [0], [1], [0, 0, 1, 1], [], []>} : vector<64x128xf32>, vector<128x128xf32>, vector<64x128xf32> -> vector<64x128xf32>
    %159 = arith.maximumf %156, %158 : vector<64x128xf32>
    %c0_98 = arith.constant 0 : index
    %c0_99 = arith.constant 0 : index
    %160 = vector.load %arg9[%c0_98, %c0_99] : memref<1x128xf32, #tpu.memory_space<vmem>>, vector<1x128xf32>
    %161 = vector.extract_strided_slice %159 {offsets = [0, 0], sizes = [8, 128], strides = [1, 1]} : vector<64x128xf32> to vector<8x128xf32>
    %162 = vector.extract_strided_slice %159 {offsets = [8, 0], sizes = [8, 128], strides = [1, 1]} : vector<64x128xf32> to vector<8x128xf32>
    %163 = arith.maximumf %161, %162 : vector<8x128xf32>
    %164 = vector.broadcast %160 : vector<1x128xf32> to vector<8x128xf32>
    %165 = arith.addf %163, %164 : vector<8x128xf32>
    %cst_100 = arith.constant 0.000000e+00 : f32
    %166 = vector.broadcast %cst_100 : f32 to vector<8x128xf32>
    %167 = arith.maximumf %165, %166 : vector<8x128xf32>
    %c0_101 = arith.constant 0 : index
    %c0_102 = arith.constant 0 : index
    %c0_103 = arith.constant 0 : index
    %168 = vector.load %arg10[%c0_101, %c0_102, %c0_103] : memref<4x128x128xf32, #tpu.memory_space<vmem>>, vector<1x128x128xf32>
    %169 = vector.shape_cast %168 : vector<1x128x128xf32> to vector<128x128xf32>
    %cst_104 = arith.constant dense<0.000000e+00> : vector<8x128xf32>
    %170 = tpu.matmul %167, %169, %cst_104 {dimension_numbers = #tpu.dot_dimension_numbers<[1], [0], [0], [1], [0, 0, 1, 1], [], []>} : vector<8x128xf32>, vector<128x128xf32>, vector<8x128xf32> -> vector<8x128xf32>
    %171 = vector.extract_strided_slice %159 {offsets = [16, 0], sizes = [8, 128], strides = [1, 1]} : vector<64x128xf32> to vector<8x128xf32>
    %172 = vector.extract_strided_slice %159 {offsets = [24, 0], sizes = [8, 128], strides = [1, 1]} : vector<64x128xf32> to vector<8x128xf32>
    %173 = arith.maximumf %171, %172 : vector<8x128xf32>
    %174 = vector.broadcast %160 : vector<1x128xf32> to vector<8x128xf32>
    %175 = arith.addf %173, %174 : vector<8x128xf32>
    %cst_105 = arith.constant 0.000000e+00 : f32
    %176 = vector.broadcast %cst_105 : f32 to vector<8x128xf32>
    %177 = arith.maximumf %175, %176 : vector<8x128xf32>
    %c1_106 = arith.constant 1 : index
    %c0_107 = arith.constant 0 : index
    %c0_108 = arith.constant 0 : index
    %178 = vector.load %arg10[%c1_106, %c0_107, %c0_108] : memref<4x128x128xf32, #tpu.memory_space<vmem>>, vector<1x128x128xf32>
    %179 = vector.shape_cast %178 : vector<1x128x128xf32> to vector<128x128xf32>
    %cst_109 = arith.constant dense<0.000000e+00> : vector<8x128xf32>
    %180 = tpu.matmul %177, %179, %cst_109 {dimension_numbers = #tpu.dot_dimension_numbers<[1], [0], [0], [1], [0, 0, 1, 1], [], []>} : vector<8x128xf32>, vector<128x128xf32>, vector<8x128xf32> -> vector<8x128xf32>
    %181 = arith.addf %170, %180 : vector<8x128xf32>
    %182 = vector.extract_strided_slice %159 {offsets = [32, 0], sizes = [8, 128], strides = [1, 1]} : vector<64x128xf32> to vector<8x128xf32>
    %183 = vector.extract_strided_slice %159 {offsets = [40, 0], sizes = [8, 128], strides = [1, 1]} : vector<64x128xf32> to vector<8x128xf32>
    %184 = arith.maximumf %182, %183 : vector<8x128xf32>
    %185 = vector.broadcast %160 : vector<1x128xf32> to vector<8x128xf32>
    %186 = arith.addf %184, %185 : vector<8x128xf32>
    %cst_110 = arith.constant 0.000000e+00 : f32
    %187 = vector.broadcast %cst_110 : f32 to vector<8x128xf32>
    %188 = arith.maximumf %186, %187 : vector<8x128xf32>
    %c2_111 = arith.constant 2 : index
    %c0_112 = arith.constant 0 : index
    %c0_113 = arith.constant 0 : index
    %189 = vector.load %arg10[%c2_111, %c0_112, %c0_113] : memref<4x128x128xf32, #tpu.memory_space<vmem>>, vector<1x128x128xf32>
    %190 = vector.shape_cast %189 : vector<1x128x128xf32> to vector<128x128xf32>
    %cst_114 = arith.constant dense<0.000000e+00> : vector<8x128xf32>
    %191 = tpu.matmul %188, %190, %cst_114 {dimension_numbers = #tpu.dot_dimension_numbers<[1], [0], [0], [1], [0, 0, 1, 1], [], []>} : vector<8x128xf32>, vector<128x128xf32>, vector<8x128xf32> -> vector<8x128xf32>
    %192 = arith.addf %181, %191 : vector<8x128xf32>
    %193 = vector.extract_strided_slice %159 {offsets = [48, 0], sizes = [8, 128], strides = [1, 1]} : vector<64x128xf32> to vector<8x128xf32>
    %194 = vector.extract_strided_slice %159 {offsets = [56, 0], sizes = [8, 128], strides = [1, 1]} : vector<64x128xf32> to vector<8x128xf32>
    %195 = arith.maximumf %193, %194 : vector<8x128xf32>
    %196 = vector.broadcast %160 : vector<1x128xf32> to vector<8x128xf32>
    %197 = arith.addf %195, %196 : vector<8x128xf32>
    %cst_115 = arith.constant 0.000000e+00 : f32
    %198 = vector.broadcast %cst_115 : f32 to vector<8x128xf32>
    %199 = arith.maximumf %197, %198 : vector<8x128xf32>
    %c3_116 = arith.constant 3 : index
    %c0_117 = arith.constant 0 : index
    %c0_118 = arith.constant 0 : index
    %200 = vector.load %arg10[%c3_116, %c0_117, %c0_118] : memref<4x128x128xf32, #tpu.memory_space<vmem>>, vector<1x128x128xf32>
    %201 = vector.shape_cast %200 : vector<1x128x128xf32> to vector<128x128xf32>
    %cst_119 = arith.constant dense<0.000000e+00> : vector<8x128xf32>
    %202 = tpu.matmul %199, %201, %cst_119 {dimension_numbers = #tpu.dot_dimension_numbers<[1], [0], [0], [1], [0, 0, 1, 1], [], []>} : vector<8x128xf32>, vector<128x128xf32>, vector<8x128xf32> -> vector<8x128xf32>
    %203 = arith.addf %192, %202 : vector<8x128xf32>
    %c0_120 = arith.constant 0 : index
    %c0_121 = arith.constant 0 : index
    %204 = vector.load %arg11[%c0_120, %c0_121] : memref<1x128xf32, #tpu.memory_space<vmem>>, vector<1x128xf32>
    %205 = vector.broadcast %204 : vector<1x128xf32> to vector<8x128xf32>
    %206 = arith.addf %203, %205 : vector<8x128xf32>
    %cst_122 = arith.constant 0.000000e+00 : f32
    %207 = vector.broadcast %cst_122 : f32 to vector<8x128xf32>
    %208 = arith.maximumf %206, %207 : vector<8x128xf32>
    %c0_123 = arith.constant 0 : index
    %c0_124 = arith.constant 0 : index
    %209 = vector.load %arg12[%c0_123, %c0_124] : memref<128x128xf32, #tpu.memory_space<vmem>>, vector<128x128xf32>
    %cst_125 = arith.constant dense<0.000000e+00> : vector<8x128xf32>
    %210 = tpu.matmul %208, %209, %cst_125 {dimension_numbers = #tpu.dot_dimension_numbers<[1], [0], [0], [1], [0, 0, 1, 1], [], []>} : vector<8x128xf32>, vector<128x128xf32>, vector<8x128xf32> -> vector<8x128xf32>
    %c0_126 = arith.constant 0 : index
    %c0_127 = arith.constant 0 : index
    %211 = vector.load %arg13[%c0_126, %c0_127] : memref<1x128xf32, #tpu.memory_space<vmem>>, vector<1x128xf32>
    %212 = vector.broadcast %211 : vector<1x128xf32> to vector<8x128xf32>
    %213 = arith.addf %210, %212 : vector<8x128xf32>
    %cst_128 = arith.constant 0.000000e+00 : f32
    %214 = vector.broadcast %cst_128 : f32 to vector<8x128xf32>
    %215 = arith.maximumf %213, %214 : vector<8x128xf32>
    %c0_129 = arith.constant 0 : index
    %c0_130 = arith.constant 0 : index
    %216 = vector.load %arg14[%c0_129, %c0_130] : memref<128x128xf32, #tpu.memory_space<vmem>>, vector<128x128xf32>
    %cst_131 = arith.constant dense<0.000000e+00> : vector<8x128xf32>
    %217 = tpu.matmul %215, %216, %cst_131 {dimension_numbers = #tpu.dot_dimension_numbers<[1], [0], [0], [1], [0, 0, 1, 1], [], []>} : vector<8x128xf32>, vector<128x128xf32>, vector<8x128xf32> -> vector<8x128xf32>
    %c0_132 = arith.constant 0 : index
    %c0_133 = arith.constant 0 : index
    %218 = vector.load %arg15[%c0_132, %c0_133] : memref<1x128xf32, #tpu.memory_space<vmem>>, vector<1x128xf32>
    %219 = vector.broadcast %218 : vector<1x128xf32> to vector<8x128xf32>
    %220 = arith.addf %217, %219 : vector<8x128xf32>
    %cst_134 = arith.constant 0.000000e+00 : f32
    %221 = vector.broadcast %cst_134 : f32 to vector<8x128xf32>
    %222 = arith.maximumf %220, %221 : vector<8x128xf32>
    %c0_135 = arith.constant 0 : index
    %c0_136 = arith.constant 0 : index
    %223 = vector.load %arg16[%c0_135, %c0_136] : memref<8x128xf32, #tpu.memory_space<vmem>>, vector<8x128xf32>
    tpu.vector_store %arg16[%c0_135, %c0_136], %222 {strides = array<i32>} : memref<8x128xf32, #tpu.memory_space<vmem>>, vector<8x128xf32>,
    return
  }
  func.func @transform_0(%arg0: i32) -> (i32, i32, i32) {
    %c0_i32 = arith.constant 0 : i32
    %c0_i32_0 = arith.constant 0 : i32
    %c0_i32_1 = arith.constant 0 : i32
    return %arg0, %c0_i32, %c0_i32_0 : i32, i32, i32
  }
  func.func @transform_1(%arg0: i32) -> (i32, i32, i32) {
    %c0_i32 = arith.constant 0 : i32
    %c0_i32_0 = arith.constant 0 : i32
    %c0_i32_1 = arith.constant 0 : i32
    %c0_i32_2 = arith.constant 0 : i32
    return %c0_i32, %c0_i32_0, %c0_i32_1 : i32, i32, i32
  }
  func.func @transform_2(%arg0: i32) -> (i32, i32) {
    %c0_i32 = arith.constant 0 : i32
    %c0_i32_0 = arith.constant 0 : i32
    %c0_i32_1 = arith.constant 0 : i32
    return %c0_i32, %c0_i32_0 : i32, i32
  }
  func.func @transform_3(%arg0: i32) -> (i32, i32) {
    %c0_i32 = arith.constant 0 : i32
    %c0_i32_0 = arith.constant 0 : i32
    %c0_i32_1 = arith.constant 0 : i32
    return %c0_i32, %c0_i32_0 : i32, i32
  }
  func.func @transform_4(%arg0: i32) -> (i32, i32) {
    %c0_i32 = arith.constant 0 : i32
    %c0_i32_0 = arith.constant 0 : i32
    %c0_i32_1 = arith.constant 0 : i32
    return %c0_i32, %c0_i32_0 : i32, i32
  }
  func.func @transform_5(%arg0: i32) -> (i32, i32, i32) {
    %c0_i32 = arith.constant 0 : i32
    %c0_i32_0 = arith.constant 0 : i32
    %c0_i32_1 = arith.constant 0 : i32
    %c0_i32_2 = arith.constant 0 : i32
    return %c0_i32, %c0_i32_0, %c0_i32_1 : i32, i32, i32
  }
  func.func @transform_6(%arg0: i32) -> (i32, i32) {
    %c0_i32 = arith.constant 0 : i32
    %c0_i32_0 = arith.constant 0 : i32
    %c0_i32_1 = arith.constant 0 : i32
    return %c0_i32, %c0_i32_0 : i32, i32
  }
  func.func @transform_7(%arg0: i32) -> (i32, i32) {
    %c0_i32 = arith.constant 0 : i32
    %c0_i32_0 = arith.constant 0 : i32
    %c0_i32_1 = arith.constant 0 : i32
    return %c0_i32, %c0_i32_0 : i32, i32
  }
  func.func @transform_8(%arg0: i32) -> (i32, i32) {
    %c0_i32 = arith.constant 0 : i32
    %c0_i32_0 = arith.constant 0 : i32
    %c0_i32_1 = arith.constant 0 : i32
    return %c0_i32, %c0_i32_0 : i32, i32
  }
  func.func @transform_9(%arg0: i32) -> (i32, i32, i32) {
    %c0_i32 = arith.constant 0 : i32
    %c0_i32_0 = arith.constant 0 : i32
    %c0_i32_1 = arith.constant 0 : i32
    %c0_i32_2 = arith.constant 0 : i32
    return %c0_i32, %c0_i32_0, %c0_i32_1 : i32, i32, i32
  }
  func.func @transform_10(%arg0: i32) -> (i32, i32) {
    %c0_i32 = arith.constant 0 : i32
    %c0_i32_0 = arith.constant 0 : i32
    %c0_i32_1 = arith.constant 0 : i32
    return %c0_i32, %c0_i32_0 : i32, i32
  }
  func.func @transform_11(%arg0: i32) -> (i32, i32) {
    %c0_i32 = arith.constant 0 : i32
    %c0_i32_0 = arith.constant 0 : i32
    %c0_i32_1 = arith.constant 0 : i32
    return %c0_i32, %c0_i32_0 : i32, i32
  }
  func.func @transform_12(%arg0: i32) -> (i32, i32) {
    %c0_i32 = arith.constant 0 : i32
    %c0_i32_0 = arith.constant 0 : i32
    %c0_i32_1 = arith.constant 0 : i32
    return %c0_i32, %c0_i32_0 : i32, i32
  }
  func.func @transform_13(%arg0: i32) -> (i32, i32) {
    %c0_i32 = arith.constant 0 : i32
    %c0_i32_0 = arith.constant 0 : i32
    %c0_i32_1 = arith.constant 0 : i32
    return %c0_i32, %c0_i32_0 : i32, i32
  }
  func.func @transform_14(%arg0: i32) -> (i32, i32) {
    %c0_i32 = arith.constant 0 : i32
    %c0_i32_0 = arith.constant 0 : i32
    %c0_i32_1 = arith.constant 0 : i32
    return %c0_i32, %c0_i32_0 : i32, i32
  }
  func.func @transform_15(%arg0: i32) -> (i32, i32) {
    %c0_i32 = arith.constant 0 : i32
    %c0_i32_0 = arith.constant 0 : i32
    return %arg0, %c0_i32 : i32, i32
  }
}

</mosaic_0001>

<bundles_post_ra>
// kernel: lenet_forward.1
= control target key start
LH: loop header
LB: loop body
LE: loop exit
PB: predicated region body
PF: predicated region fallthrough
CT: control target
= control target key end

     0   :  { %s7200_s0 = inlined_call_operand.vmem [shape: f32[1,224,28], index: 0, kind: input, shape index: {}]   ;;  %s7201_s1 = inlined_call_operand.hbm [shape: f32[5,28,144], index: 1, kind: input, shape index: {}]   ;;  %s7202_s2 = inlined_call_operand.hbm [shape: f32[144,128], index: 2, kind: input, shape index: {}]   ;;  %s7203_s3 = inlined_call_operand.hbm [shape: f32[144,128], index: 3, kind: input, shape index: {}]   ;;  %s7204_s4 = inlined_call_operand.vmem [shape: f32[1,128], index: 4, kind: input, shape index: {}]   ;;  %s7205_s5 = inlined_call_operand.hbm [shape: f32[5,128,128], index: 5, kind: input, shape index: {}]   ;;  %s7206_s6 = inlined_call_operand.hbm [shape: f32[128,128], index: 6, kind: input, shape index: {}]   ;;  %s7207_s7 = inlined_call_operand.hbm [shape: f32[128,128], index: 7, kind: input, shape index: {}]   ;;  %s7208_s8 = inlined_call_operand.vmem [shape: f32[1,128], index: 8, kind: input, shape index: {}]   ;;  %s7209_s9 = inlined_call_operand.vmem [shape: f32[4,128,128], index: 9, kind: input, shape index: {}]   ;;  %s7210_s10 = inlined_call_operand.vmem [shape: f32[1,128], index: 10, kind: input, shape index: {}]   ;;  %s7211_s11 = inlined_call_operand.hbm [shape: f32[128,128], index: 11, kind: input, shape index: {}]   ;;  %s7212_s12 = inlined_call_operand.vmem [shape: f32[1,128], index: 12, kind: input, shape index: {}]   ;;  %s7213_s13 = inlined_call_operand.hbm [shape: f32[128,128], index: 13, kind: input, shape index: {}]   ;;  %s7214_s14 = inlined_call_operand.vmem [shape: f32[1,128], index: 14, kind: input, shape index: {}]   ;;  %s7215_s15 = inlined_call_operand.vmem [shape: f32[8,128], index: 15, kind: output, shape index: {}]  }
   0x1   :  { %7216 = sst [smem:[#allocation21_spill]] %s7215_s15 }
   0x2   :  { %20 = vsyncpa [#allocation4], 0 }
   0x3   :  { %21 = vsyncpa [#allocation6], 0 }
   0x4   :  { %22 = vsyncpa [#allocation9], 0 }
   0x5   :  { %23 = vsyncpa [#allocation12], 0 }
   0x6   :  { %24 = vsyncpa [#allocation15], 0  ;;  %s5778_s18 = smov [#allocation5]   ;;  %s5592_s22 = scalar_lea.hbm %s7202_s2, 2304 }
   0x7   :  { %s44_s19 = sshll.u32 %s5778_s18, 4  ;;  %p5593_p0 = scmp.ne.s32.totalorder %s7202_s2, %s5592_s22  ;;  %s45_s19 = int_to_ptr.vmem [resolvable:$true] %s44_s19 }
   0x8   :  { %p5596_p1 = scmp.lt.u32.totalorder %s5592_s22, %s7202_s2 }
   0xa   :  { %p5598_p2 = pnand %p5596_p1, %p5593_p0 }
   0xc   :  { %5601 = shalt.err (!%p5598_p2)
}
   0xd   :  { %s5602_s27 = scalar_lea.vmem %s45_s19, 2304  ;;  %p5607_p4 = scmp.lt.s32.totalorder %s45_s19, %s45_s19 }
   0xe   :  { %p5603_p3 = scmp.ne.s32.totalorder %s45_s19, %s5602_s27  ;;  %p5608_p5 = scmp.lt.s32.totalorder %s5602_s27, %s5602_s27 }
  0x10   :  { %p5609_p6 = por %p5608_p5, %p5607_p4 }
  0x12   :  { %p5610_p7 = pnand %p5609_p6, %p5603_p3 }
  0x14   :  { %5613 = shalt.err (!%p5610_p7)
}
  0x15   :  { %s5779_s28 = smov 128   ;;  %s5780_s29 = smov 8  }
  0x16   :  { %50 = dma.hbm_to_vmem [thread:$0]  %s7202_s2, 2304, %s45_s19, [#allocation6], %s5779_s28, %s5779_s28, %s5780_s29  }
  0x17   :  { %s5781_s17 = smov [#allocation8]   ;;  %s5782_s20 = smov [#allocation11]  }
  0x18   :  { %s70_s18 = sshll.u32 %s5781_s17, 4  ;;  %s94_s21 = sshll.u32 %s5782_s20, 4  ;;  %s71_s18 = int_to_ptr.vmem [resolvable:$true] %s70_s18  ;;  %s95_s21 = int_to_ptr.vmem [resolvable:$true] %s94_s21 }
  0x19   :  { %s5614_s24 = scalar_lea.hbm %s7205_s5, 10240 }
  0x1a   :  { %p5615_p8 = scmp.ne.s32.totalorder %s7205_s5, %s5614_s24  ;;  %p5618_p9 = scmp.lt.u32.totalorder %s5614_s24, %s7205_s5 }
  0x1c   :  { %p5620_p10 = pnand %p5618_p9, %p5615_p8 }
  0x1e   :  { %5623 = shalt.err (!%p5620_p10)
}
  0x1f   :  { %s5624_s2 = scalar_lea.vmem %s71_s18, 10240  ;;  %p5629_p12 = scmp.lt.s32.totalorder %s71_s18, %s71_s18 }
  0x20   :  { %p5625_p11 = scmp.ne.s32.totalorder %s71_s18, %s5624_s2  ;;  %p5630_p13 = scmp.lt.s32.totalorder %s5624_s2, %s5624_s2 }
  0x22   :  { %p5631_p0 = por %p5630_p13, %p5629_p12 }
  0x24   :  { %p5632_p1 = pnand %p5631_p0, %p5625_p11 }
  0x26   :  { %5635 = shalt.err (!%p5632_p1)
}
  0x27   :  { %76 = dma.hbm_to_vmem [thread:$0]  %s7205_s5, 10240, %s71_s18, [#allocation9], %s5779_s28, %s5779_s28, %s5780_s29  }
  0x28   :  { %s5636_s17 = scalar_lea.hbm %s7207_s7, 2048 }
  0x29   :  { %p5637_p2 = scmp.ne.s32.totalorder %s7207_s7, %s5636_s17  ;;  %p5640_p3 = scmp.lt.u32.totalorder %s5636_s17, %s7207_s7 }
  0x2b   :  { %p5642_p4 = pnand %p5640_p3, %p5637_p2 }
  0x2d   :  { %5645 = shalt.err (!%p5642_p4)
}
  0x2e   :  { %s5646_s25 = scalar_lea.vmem %s95_s21, 2048  ;;  %p5651_p6 = scmp.lt.s32.totalorder %s95_s21, %s95_s21 }
  0x2f   :  { %p5647_p5 = scmp.ne.s32.totalorder %s95_s21, %s5646_s25  ;;  %p5652_p7 = scmp.lt.s32.totalorder %s5646_s25, %s5646_s25 }
  0x31   :  { %p5653_p8 = por %p5652_p7, %p5651_p6 }
  0x33   :  { %p5654_p9 = pnand %p5653_p8, %p5647_p5 }
  0x35   :  { %5657 = shalt.err (!%p5654_p9)
}
  0x36   :  { %100 = dma.hbm_to_vmem [thread:$0]  %s7207_s7, 2048, %s95_s21, [#allocation12], %s5779_s28, %s5779_s28, %s5780_s29  }
  0x37   :  { %s5783_s26 = smov [#allocation3]   ;;  %s5658_s30 = scalar_lea.hbm %s7201_s1, 5120 }
  0x38   :  { %s32_s27 = sshll.u32 %s5783_s26, 4  ;;  %p5659_p10 = scmp.ne.s32.totalorder %s7201_s1, %s5658_s30  ;;  %s33_s27 = int_to_ptr.vmem [resolvable:$true] %s32_s27 }
  0x39   :  { %p5662_p11 = scmp.lt.u32.totalorder %s5658_s30, %s7201_s1 }
  0x3b   :  { %p5664_p12 = pnand %p5662_p11, %p5659_p10 }
  0x3d   :  { %5667 = shalt.err (!%p5664_p12)
}
  0x3e   :  { %s5668_s22 = scalar_lea.vmem %s33_s27, 5120  ;;  %p5673_p0 = scmp.lt.s32.totalorder %s33_s27, %s33_s27 }
  0x3f   :  { %p5669_p13 = scmp.ne.s32.totalorder %s33_s27, %s5668_s22  ;;  %p5674_p1 = scmp.lt.s32.totalorder %s5668_s22, %s5668_s22 }
  0x41   :  { %p5675_p2 = por %p5674_p1, %p5673_p0 }
  0x43   :  { %p5676_p3 = pnand %p5675_p2, %p5669_p13 }
  0x45   :  { %5679 = shalt.err (!%p5676_p3)
}
  0x46   :  { %s5784_s7 = smov 256   ;;  %s5785_s21 = smov 16  }
  0x47   :  { %38 = dma.hbm_to_vmem [thread:$0]  %s7201_s1, 5120, %s33_s27, [#allocation4], %s5784_s7, %s5784_s7, %s5785_s21  }
  0x48   :  { %s5786_s25 = smov [#allocation7]   ;;  %s5787_s18 = smov [#allocation10]  }
  0x49   :  { %s56_s5 = sshll.u32 %s5786_s25, 4  ;;  %s82_s26 = sshll.u32 %s5787_s18, 4  ;;  %s57_s5 = int_to_ptr.vmem [resolvable:$true] %s56_s5  ;;  %s5931_s26 = int_to_ptr.vmem [resolvable:$true] %s82_s26 }
  0x4a   :  { %s5680_s30 = scalar_lea.hbm %s7203_s3, 2304 }
  0x4b   :  { %p5681_p4 = scmp.ne.s32.totalorder %s7203_s3, %s5680_s30  ;;  %p5684_p5 = scmp.lt.u32.totalorder %s5680_s30, %s7203_s3 }
  0x4d   :  { %p5686_p6 = pnand %p5684_p5, %p5681_p4 }
  0x4f   :  { %5689 = shalt.err (!%p5686_p6)
}
  0x50   :  { %s5690_s1 = scalar_lea.vmem %s57_s5, 2304  ;;  %p5695_p8 = scmp.lt.s32.totalorder %s57_s5, %s57_s5 }
  0x51   :  { %p5691_p7 = scmp.ne.s32.totalorder %s57_s5, %s5690_s1  ;;  %p5696_p9 = scmp.lt.s32.totalorder %s5690_s1, %s5690_s1 }
  0x53   :  { %p5697_p10 = por %p5696_p9, %p5695_p8 }
  0x55   :  { %p5698_p11 = pnand %p5697_p10, %p5691_p7 }
  0x57   :  { %5701 = shalt.err (!%p5698_p11)
}
  0x58   :  { %62 = dma.hbm_to_vmem [thread:$0]  %s7203_s3, 2304, %s57_s5, [#allocation6], %s5779_s28, %s5779_s28, %s5780_s29  }
  0x59   :  { %s5702_s23 = scalar_lea.hbm %s7206_s6, 2048 }
  0x5a   :  { %p5703_p12 = scmp.ne.s32.totalorder %s7206_s6, %s5702_s23  ;;  %p5706_p13 = scmp.lt.u32.totalorder %s5702_s23, %s7206_s6 }
  0x5c   :  { %p5708_p0 = pnand %p5706_p13, %p5703_p12 }
  0x5e   :  { %5711 = shalt.err (!%p5708_p0)
}
  0x5f   :  { %s5712_s19 = scalar_lea.vmem %s5931_s26, 2048  ;;  %p5717_p2 = scmp.lt.s32.totalorder %s5931_s26, %s5931_s26 }
  0x60   :  { %p5713_p1 = scmp.ne.s32.totalorder %s5931_s26, %s5712_s19  ;;  %p5718_p3 = scmp.lt.s32.totalorder %s5712_s19, %s5712_s19 }
  0x62   :  { %p5719_p4 = por %p5718_p3, %p5717_p2 }
  0x64   :  { %p5720_p5 = pnand %p5719_p4, %p5713_p1 }
  0x66   :  { %5723 = shalt.err (!%p5720_p5)
}
  0x67   :  { %88 = dma.hbm_to_vmem [thread:$0]  %s7206_s6, 2048, %s5931_s26, [#allocation9], %s5779_s28, %s5779_s28, %s5780_s29  }
  0x68   :  { %s5788_s30 = smov [#allocation13]   ;;  %s5789_s15 = smov [#allocation14]  }
  0x69   :  { %s112_s16 = sshll.u32 %s5788_s30, 4  ;;  %s126_s17 = sshll.u32 %s5789_s15, 4  ;;  %s113_s16 = int_to_ptr.vmem [resolvable:$true] %s112_s16  ;;  %s5968_s17 = int_to_ptr.vmem [resolvable:$true] %s126_s17 }
  0x6a   :  { %s5724_s27 = scalar_lea.hbm %s7211_s11, 2048 }
  0x6b   :  { %p5725_p6 = scmp.ne.s32.totalorder %s7211_s11, %s5724_s27  ;;  %p5728_p7 = scmp.lt.u32.totalorder %s5724_s27, %s7211_s11 }
  0x6d   :  { %p5730_p8 = pnand %p5728_p7, %p5725_p6 }
  0x6f   :  { %5733 = shalt.err (!%p5730_p8)
}
  0x70   :  { %s5734_s6 = scalar_lea.vmem %s113_s16, 2048  ;;  %p5739_p10 = scmp.lt.s32.totalorder %s113_s16, %s113_s16 }
  0x71   :  { %p5735_p9 = scmp.ne.s32.totalorder %s113_s16, %s5734_s6  ;;  %p5740_p11 = scmp.lt.s32.totalorder %s5734_s6, %s5734_s6 }
  0x73   :  { %p5741_p12 = por %p5740_p11, %p5739_p10 }
  0x75   :  { %p5742_p13 = pnand %p5741_p12, %p5735_p9 }
  0x77   :  { %5745 = shalt.err (!%p5742_p13)
}
  0x78   :  { %118 = dma.hbm_to_vmem [thread:$0]  %s7211_s11, 2048, %s113_s16, [#allocation12], %s5779_s28, %s5779_s28, %s5780_s29  }
  0x79   :  { %s5746_s2 = scalar_lea.hbm %s7213_s13, 2048 }
  0x7a   :  { %p5747_p0 = scmp.ne.s32.totalorder %s7213_s13, %s5746_s2  ;;  %p5750_p1 = scmp.lt.u32.totalorder %s5746_s2, %s7213_s13 }
  0x7c   :  { %p5752_p2 = pnand %p5750_p1, %p5747_p0 }
  0x7e   :  { %5755 = shalt.err (!%p5752_p2)
}
  0x7f   :  { %s5756_s15 = scalar_lea.vmem %s5968_s17, 2048  ;;  %p5761_p4 = scmp.lt.s32.totalorder %s5968_s17, %s5968_s17 }
  0x80   :  { %p5757_p3 = scmp.ne.s32.totalorder %s5968_s17, %s5756_s15  ;;  %p5762_p5 = scmp.lt.s32.totalorder %s5756_s15, %s5756_s15 }
  0x82   :  { %p5763_p6 = por %p5762_p5, %p5761_p4 }
  0x84   :  { %p5764_p7 = pnand %p5763_p6, %p5757_p3 }
  0x86   :  { %5767 = shalt.err (!%p5764_p7)
}
  0x87   :  { %132 = dma.hbm_to_vmem [thread:$0]  %s7213_s13, 2048, %s5968_s17, [#allocation15], %s5779_s28, %s5779_s28, %s5780_s29  }
  0x88   :  { %5768 = dma.done.wait [#allocation4], 5120  }
  0x89   :  { %5769 = vsyncadd [#allocation4], 4294962176 }
  0x8a   :  { %5770 = dma.done.wait [#allocation6], 4608  }
  0x8b   :  { %5771 = vsyncadd [#allocation6], 4294962688 }
  0x8c   :  { %5772 = dma.done.wait [#allocation9], 12288  }
  0x8d   :  { %5773 = vsyncadd [#allocation9], 4294955008 }
  0x8e   :  { %5774 = dma.done.wait [#allocation12], 4096  }
  0x8f   :  { %5775 = vsyncadd [#allocation12], 4294963200 }
  0x90   :  { %5776 = dma.done.wait [#allocation15], 2048  }
  0x91   :  { %5777 = vsyncadd [#allocation15], 4294965248  ;;  %v5790_v0 = vmov 0.0   ;;  %vm274_vm0 = vcmask 1043456   ;;  %v194_v1 = vld [vmem:[#allocation3 + $0x48] sm:$0xff]  ;;  %v196_v2 = vld [vmem:[#allocation3 + $0x58] sm:$0xff] }
  0x92   :  { %345 = vmatprep.mubr.f32.mxu0 %v5790_v0  ;;  %v193_v3 = vld [vmem:[#allocation3 + $0x40] sm:$0xff]  ;;  %v4880_v4 = vpack.c.bf16 %v196_v2, %v194_v1  ;;  %v195_v5 = vld [vmem:[#allocation3 + $0x50] sm:$0xff]  ;;  %v198_v6 = vld [vmem:[#allocation3 + $0x68] sm:$0xff]  ;;  %vm5791_vm1 = vmmov 1   ;;  %vm201_vm3 = vcmask 228352   ;;  %vm1830_vm4 = vcmask 130048  }
  0x93   :  { %v200_v7 = vld [vmem:[#allocation3 + $0x78] sm:$0xf]  ;;  %v4882_v8 = vpack.c.bf16 %v195_v5, %v193_v3  ;;  %vm6006_vm2 = vmpackc.low %vm274_vm0, %vm5791_vm1  ;;  %v197_v11 = vld [vmem:[#allocation3 + $0x60] sm:$0xff]  ;;  %vm5793_vm5 = vmmov 0   ;;  %s7219_s6 = sld [smem:[#allocation21_spill]] }
  0x94   :  { %v4884_v9 = vpack.c.bf16 %v200_v7, %v198_v6  ;;  %v199_v12 = vld [vmem:[#allocation3 + $0x70] sm:$0xf]  ;;  %4881 = vmatprep.subr.bf16.mxu0 %v4880_v4  ;;  %v184_v13 = vld [vmem:[#allocation3 + $0x8] sm:$0xff]  ;;  %v186_v14 = vld [vmem:[#allocation3 + $0x18] sm:$0xff] }
  0x95   :  { %4883 = vmatpush1.bf16.msra.mxu0 %v4882_v8  ;;  %v4887_v15 = vpack.c.bf16 %v199_v12, %v197_v11  ;;  %v4890_v16 = vpack.c.bf16 %v186_v14, %v184_v13  ;;  %v183_v17 = vld [vmem:[#allocation3] sm:$0xff]  ;;  %v185_v18 = vld [vmem:[#allocation3 + $0x10] sm:$0xff]  ;;  %v6017_v19 = vld [vmem:[%s7200_s0 + $0x8] sm:$0xff] }
  0x96   :  { %4886 = vmatprep.subr.msk.bf16.mxu0 %vm6006_vm2, %v4884_v9  ;;  %v4892_v20 = vpack.c.bf16 %v185_v18, %v183_v17  ;;  %v188_v21 = vld [vmem:[#allocation3 + $0x28] sm:$0xff]  ;;  %v190_v22 = vld [vmem:[#allocation3 + $0x38] sm:$0xf]  ;;  %v187_v24 = vld [vmem:[#allocation3 + $0x20] sm:$0xff] }
  0x97   :  { %v4894_v23 = vpack.c.bf16 %v190_v22, %v188_v21  ;;  %v189_v25 = vld [vmem:[#allocation3 + $0x30] sm:$0xf]  ;;  %v734_v28 = vld [vmem:[#allocation3 + $0x88] sm:$0xff]  ;;  %v736_v29 = vld [vmem:[#allocation3 + $0x98] sm:$0xff] }
  0x98   :  { %v6025_v26 = vld [vmem:[%s7200_s0 + $0x10] sm:$0xff]  ;;  %v4897_v27 = vpack.c.bf16 %v189_v25, %v187_v24  ;;  %v4900_v30 = vpack.c.bf16 %v736_v29, %v734_v28  ;;  %v6035_v31 = vld [vmem:[%s7200_s0 + $0x18] sm:$0xff]  ;;  %v6045_v32 = vld [vmem:[%s7200_s0 + $0x20] sm:$0xff]  ;;  %v5792_v28 = vmov 0.0|0.0  }
  0x99   :  { %4889 = vmatpush1.bf16.msk.msra.mxu0 %vm6006_vm2, %v4887_v15  ;;  %v6053_v33 = vld [vmem:[%s7200_s0 + $0x28] sm:$0xff]  ;;  %v6061_v34 = vld [vmem:[%s7200_s0 + $0x30] sm:$0xff]  ;;  %v6069_v35 = vld [vmem:[%s7200_s0 + $0x38] sm:$0xff]  ;;  %4930 = vmatprep.subr.bf16.mxu1 %v5792_v28 }
  0x9a   :  { %4891 = vmatprep.subr.bf16.mxu0 %v4890_v16  ;;  %v6077_v36 = vld [vmem:[%s7200_s0 + $0x40] sm:$0xff]  ;;  %v6085_v37 = vld [vmem:[%s7200_s0 + $0x48] sm:$0xff]  ;;  %v6093_v38 = vld [vmem:[%s7200_s0 + $0x50] sm:$0xff] }
  0x9b   :  { %v6101_v39 = vld [vmem:[%s7200_s0 + $0x58] sm:$0xff]  ;;  %v6109_v40 = vld [vmem:[%s7200_s0 + $0x60] sm:$0xff]  ;;  %v6117_v41 = vld [vmem:[%s7200_s0 + $0x68] sm:$0xff] }
  0x9c   :  { %3863 = vmatmul.mubr.msk.f32.vlgmr.msra.gmra.mrb[0].mxu0 %vm201_vm3, %v6017_v19  ;;  %v6125_v42 = vld [vmem:[%s7200_s0 + $0x70] sm:$0xff]  ;;  %v6133_v43 = vld [vmem:[%s7200_s0 + $0x78] sm:$0xff]  ;;  %v6141_v44 = vld [vmem:[%s7200_s0 + $0x80] sm:$0xff] }
  0x9d   :  { %4893 = vmatpush1.bf16.msra.mxu0 %v4892_v20  ;;  %351 = vmatprep.mubr.f32.mxu0 %v5790_v0  ;;  %v6149_v45 = vld [vmem:[%s7200_s0 + $0x88] sm:$0xff]  ;;  %v6157_v46 = vld [vmem:[%s7200_s0 + $0x90] sm:$0xff]  ;;  %v6165_v47 = vld [vmem:[%s7200_s0 + $0x98] sm:$0xff] }
  0x9e   :  { %4896 = vmatprep.subr.msk.bf16.mxu0 %vm6006_vm2, %v4894_v23  ;;  %v6173_v48 = vld [vmem:[%s7200_s0 + $0xa0] sm:$0xff]  ;;  %v6181_v49 = vld [vmem:[%s7200_s0 + $0xa8] sm:$0xff]  ;;  %v6189_v50 = vld [vmem:[%s7200_s0 + $0xb0] sm:$0xff] }
  0x9f   :  { %v6197_v51 = vld [vmem:[%s7200_s0 + $0xb8] sm:$0xff]  ;;  %v6205_v52 = vld [vmem:[%s7200_s0 + $0xc0] sm:$0xff]  ;;  %v735_v54 = vld [vmem:[#allocation3 + $0x90] sm:$0xff] }
  0xa0   :  { %3864 = vmatmul.mubr.msk.f32.gmra.mrb[2].mxu0 %vm201_vm3, %v6025_v26  ;;  %v733_v53 = vld [vmem:[#allocation3 + $0x80] sm:$0xff]  ;;  %v738_v55 = vld [vmem:[#allocation3 + $0xa8] sm:$0xff]  ;;  %v740_v56 = vld [vmem:[#allocation3 + $0xb8] sm:$0xf] }
  0xa1   :  { %357 = vmatprep.mubr.f32.mxu0 %v5790_v0  ;;  %4899 = vmatpush1.bf16.msk.msra.mxu0 %vm6006_vm2, %v4897_v27  ;;  %v159_v57 = vld [vmem:[%s7200_s0] sm:$0xff]  ;;  %v4902_v58 = vpack.c.bf16 %v735_v54, %v733_v53  ;;  %v4904_v59 = vpack.c.bf16 %v740_v56, %v738_v55  ;;  %v739_v61 = vld [vmem:[#allocation3 + $0xb0] sm:$0xf]  ;;  %v1102_v62 = vld [vmem:[#allocation3 + $0xc8] sm:$0xff] }
  0xa2   :  { %4901 = vmatprep.subr.bf16.mxu0 %v4900_v30  ;;  %v737_v60 = vld [vmem:[#allocation3 + $0xa0] sm:$0xff]  ;;  %v1104_v63 = vld [vmem:[#allocation3 + $0xd8] sm:$0xff]  ;;  %v1103_v4 = vld [vmem:[#allocation3 + $0xd0] sm:$0xff] }
  0xa3   :  { %v4907_v1 = vpack.c.bf16 %v739_v61, %v737_v60  ;;  %v4910_v2 = vpack.c.bf16 %v1104_v63, %v1102_v62  ;;  %v1101_v3 = vld [vmem:[#allocation3 + $0xc0] sm:$0xff]  ;;  %v1106_v5 = vld [vmem:[#allocation3 + $0xe8] sm:$0xff]  ;;  %v1108_v6 = vld [vmem:[#allocation3 + $0xf8] sm:$0xf] }
  0xa4   :  { %3865 = vmatmul.mubr.msk.f32.gmra.mrb[4].mxu0 %vm201_vm3, %v6035_v31  ;;  %v4912_v7 = vpack.c.bf16 %v1103_v4, %v1101_v3  ;;  %v4914_v8 = vpack.c.bf16 %v1108_v6, %v1106_v5  ;;  %v1105_v9 = vld [vmem:[#allocation3 + $0xe0] sm:$0xff]  ;;  %v1107_v11 = vld [vmem:[#allocation3 + $0xf0] sm:$0xf]  ;;  %v1470_v12 = vld [vmem:[#allocation3 + $0x108] sm:$0xff] }
  0xa5   :  { %363 = vmatprep.mubr.f32.mxu0 %v5790_v0  ;;  %v1472_v13 = vld [vmem:[#allocation3 + $0x118] sm:$0xff]  ;;  %v4917_v14 = vpack.c.bf16 %v1107_v11, %v1105_v9  ;;  %v6364_v16 = vld [vmem:[%s7200_s0 + $0xc8] sm:$0xff]  ;;  %v1469_v17 = vld [vmem:[#allocation3 + $0x100] sm:$0xff] }
  0xa6   :  { %v4920_v15 = vpack.c.bf16 %v1472_v13, %v1470_v12  ;;  %v1471_v18 = vld [vmem:[#allocation3 + $0x110] sm:$0xff]  ;;  %v1476_v20 = vld [vmem:[#allocation3 + $0x138] sm:$0xf]  ;;  %v1473_v23 = vld [vmem:[#allocation3 + $0x120] sm:$0xff] }
  0xa7   :  { %v4922_v21 = vpack.c.bf16 %v1471_v18, %v1469_v17  ;;  %v1475_v24 = vld [vmem:[#allocation3 + $0x130] sm:$0xf]  ;;  %v1812_v10 = vld [vmem:[#allocation5] sm:$0xff]  ;;  %v1815_v30 = vld [vmem:[#allocation5 + $0x18] sm:$0xff] }
  0xa8   :  { %3866 = vmatmul.mubr.msk.f32.gmra.mrb[6].mxu0 %vm201_vm3, %v6045_v32  ;;  %v4927_v25 = vpack.c.bf16 %v1475_v24, %v1473_v23  ;;  %v1814_v27 = vld [vmem:[#allocation5 + $0x10] sm:$0xff]  ;;  %v1816_v53 = vld [vmem:[#allocation5 + $0x20] sm:$0xff]  ;;  %v1817_v54 = vld [vmem:[#allocation5 + $0x28] sm:$0xff] }
  0xa9   :  { %369 = vmatprep.mubr.f32.mxu0 %v5790_v0  ;;  %v4937_v55 = vpack.c.bf16 %v1817_v54, %v1816_v53  ;;  %v1818_v56 = vld [vmem:[#allocation5 + $0x30] sm:$0xff]  ;;  %v1821_v60 = vld [vmem:[#allocation5 + $0x48] sm:$0xff]  ;;  %v1823_v63 = vld [vmem:[#allocation5 + $0x58] sm:$0xff] }
  0xaa   :  { %v1822_v62 = vld [vmem:[#allocation5 + $0x50] sm:$0xff]  ;;  %v1825_v3 = vld [vmem:[#allocation5 + $0x68] sm:$0xff]  ;;  %v1827_v6 = vld [vmem:[#allocation5 + $0x78] sm:$0xff] }
  0xab   :  { %v1826_v5 = vld [vmem:[#allocation5 + $0x70] sm:$0xff]  ;;  %v2098_v18 = vld [vmem:[#allocation7 + $0x50] sm:$0xff]  ;;  %v2101_v24 = vld [vmem:[#allocation7 + $0x68] sm:$0xff] }
  0xac   :  { %3867 = vmatmul.mubr.msk.f32.gmra.mrb[8].mxu0 %vm201_vm3, %v6053_v33  ;;  %v2096_v13 = vld [vmem:[#allocation7 + $0x40] sm:$0xff] }
  0xad   :  { %375 = vmatprep.mubr.f32.mxu0 %v5790_v0  ;;  %v2100_v23 = vld [vmem:[#allocation7 + $0x60] sm:$0xff] }
  0xae   :  { %v2104_v54 = vld [vmem:[#allocation7 + $0x80] sm:$0xff] }
  0xb0   :  { %3868 = vmatmul.mubr.msk.f32.gmra.mrb[10].mxu0 %vm201_vm3, %v6061_v34 }
  0xb1   :  { %381 = vmatprep.mubr.f32.mxu0 %v5790_v0 }
  0xb4   :  { %3869 = vmatmul.mubr.msk.f32.gmra.mrb[12].mxu0 %vm201_vm3, %v6069_v35 }
  0xb5   :  { %387 = vmatprep.mubr.f32.mxu0 %v5790_v0 }
  0xb8   :  { %3870 = vmatmul.mubr.msk.f32.gmra.mrb[14].mxu0 %vm201_vm3, %v6077_v36 }
  0xb9   :  { %393 = vmatprep.mubr.f32.mxu0 %v5790_v0 }
  0xbc   :  { %3871 = vmatmul.mubr.msk.f32.gmra.mrb[16].mxu0 %vm201_vm3, %v6085_v37 }
  0xbd   :  { %399 = vmatprep.mubr.f32.mxu0 %v5790_v0 }
  0xc0   :  { %3872 = vmatmul.mubr.msk.f32.gmra.mrb[18].mxu0 %vm201_vm3, %v6093_v38 }
  0xc1   :  { %405 = vmatprep.mubr.f32.mxu0 %v5790_v0 }
  0xc4   :  { %3873 = vmatmul.mubr.msk.f32.gmra.mrb[20].mxu0 %vm201_vm3, %v6101_v39 }
  0xc5   :  { %411 = vmatprep.mubr.f32.mxu0 %v5790_v0 }
  0xc8   :  { %3874 = vmatmul.mubr.msk.f32.gmra.mrb[22].mxu0 %vm201_vm3, %v6109_v40 }
  0xc9   :  { %417 = vmatprep.mubr.f32.mxu0 %v5790_v0 }
  0xcc   :  { %3875 = vmatmul.mubr.msk.f32.gmra.mrb[24].mxu0 %vm201_vm3, %v6117_v41 }
  0xcd   :  { %423 = vmatprep.mubr.f32.mxu0 %v5790_v0 }
  0xd0   :  { %3876 = vmatmul.mubr.msk.f32.gmra.mrb[26].mxu0 %vm201_vm3, %v6125_v42 }
  0xd1   :  { %429 = vmatprep.mubr.f32.mxu0 %v5790_v0 }
  0xd4   :  { %3877 = vmatmul.mubr.msk.f32.gmra.mrb[28].mxu0 %vm201_vm3, %v6133_v43 }
  0xd5   :  { %435 = vmatprep.mubr.f32.mxu0 %v5790_v0 }
  0xd8   :  { %3878 = vmatmul.mubr.msk.f32.gmra.mrb[30].mxu0 %vm201_vm3, %v6141_v44 }
  0xd9   :  { %441 = vmatprep.mubr.f32.mxu0 %v5790_v0 }
  0xdc   :  { %3879 = vmatmul.mubr.msk.f32.gmra.mrb[32].mxu0 %vm201_vm3, %v6149_v45 }
  0xdd   :  { %447 = vmatprep.mubr.f32.mxu0 %v5790_v0 }
  0xe0   :  { %3880 = vmatmul.mubr.msk.f32.gmra.mrb[34].mxu0 %vm201_vm3, %v6157_v46 }
  0xe1   :  { %453 = vmatprep.mubr.f32.mxu0 %v5790_v0 }
  0xe4   :  { %3881 = vmatmul.mubr.msk.f32.gmra.mrb[36].mxu0 %vm201_vm3, %v6165_v47 }
  0xe5   :  { %459 = vmatprep.mubr.f32.mxu0 %v5790_v0 }
  0xe8   :  { %3882 = vmatmul.mubr.msk.f32.gmra.mrb[38].mxu0 %vm201_vm3, %v6173_v48 }
  0xe9   :  { %465 = vmatprep.mubr.f32.mxu0 %v5790_v0 }
  0xec   :  { %3883 = vmatmul.mubr.msk.f32.gmra.mrb[40].mxu0 %vm201_vm3, %v6181_v49 }
  0xed   :  { %471 = vmatprep.mubr.f32.mxu0 %v5790_v0 }
  0xf0   :  { %3884 = vmatmul.mubr.msk.f32.gmra.mrb[42].mxu0 %vm201_vm3, %v6189_v50 }
  0xf1   :  { %477 = vmatprep.mubr.f32.mxu0 %v5790_v0 }
  0xf4   :  { %3885 = vmatmul.mubr.msk.f32.gmra.mrb[44].mxu0 %vm201_vm3, %v6197_v51 }
  0xf5   :  { %483 = vmatprep.mubr.f32.mxu0 %v5790_v0 }
  0xf8   :  { %3886 = vmatmul.mubr.msk.f32.gmra.mrb[46].mxu0 %vm201_vm3, %v6205_v52 }
  0xf9   :  { %563 = vmatprep.mubr.f32.mxu0 %v5790_v0 }
  0xfc   :  { %3889 = vmatmul.mubr.msk.f32.vlgmr.msra.gmra.mrb[0].mxu0 %vm201_vm3, %v159_v57  ;;  %v1819_v57 = vld [vmem:[#allocation5 + $0x38] sm:$0xff] }
  0xfd   :  { %4903 = vmatpush1.bf16.msra.mxu0 %v4902_v58  ;;  %569 = vmatprep.mubr.f32.mxu0 %v5790_v0  ;;  %v4940_v58 = vpack.c.bf16 %v1819_v57, %v1818_v56 }
  0xfe   :  { %4906 = vmatprep.subr.msk.bf16.mxu0 %vm6006_vm2, %v4904_v59  ;;  %v1820_v59 = vld [vmem:[#allocation5 + $0x40] sm:$0xff] }
  0xff   :  { %v4943_v61 = vpack.c.bf16 %v1821_v60, %v1820_v59 }
 0x100   :  { %3890 = vmatmul.mubr.msk.f32.gmra.mrb[2].mxu0 %vm201_vm3, %v6017_v19  ;;  %v1474_v19 = vld [vmem:[#allocation3 + $0x128] sm:$0xff] }
 0x101   :  { %575 = vmatprep.mubr.f32.mxu0 %v5790_v0  ;;  %4909 = vmatpush1.bf16.msk.msra.mxu0 %vm6006_vm2, %v4907_v1  ;;  %v4924_v22 = vpack.c.bf16 %v1476_v20, %v1474_v19  ;;  %v4946_v1 = vpack.c.bf16 %v1823_v63, %v1822_v62  ;;  %v2099_v19 = vld [vmem:[#allocation7 + $0x58] sm:$0xff] }
 0x102   :  { %4911 = vmatprep.subr.bf16.mxu0 %v4910_v2  ;;  %v1824_v2 = vld [vmem:[#allocation5 + $0x60] sm:$0xff] }
 0x103   :  { %v4949_v4 = vpack.c.bf16 %v1825_v3, %v1824_v2 }
 0x104   :  { %3891 = vmatmul.mubr.msk.f32.gmra.mrb[4].mxu0 %vm201_vm3, %v6025_v26 }
 0x105   :  { %581 = vmatprep.mubr.f32.mxu0 %v5790_v0 }
 0x108   :  { %3892 = vmatmul.mubr.msk.f32.gmra.mrb[6].mxu0 %vm201_vm3, %v6035_v31 }
 0x109   :  { %587 = vmatprep.mubr.f32.mxu0 %v5790_v0 }
 0x10c   :  { %3893 = vmatmul.mubr.msk.f32.gmra.mrb[8].mxu0 %vm201_vm3, %v6045_v32 }
 0x10d   :  { %593 = vmatprep.mubr.f32.mxu0 %v5790_v0 }
 0x110   :  { %3894 = vmatmul.mubr.msk.f32.gmra.mrb[10].mxu0 %vm201_vm3, %v6053_v33 }
 0x111   :  { %599 = vmatprep.mubr.f32.mxu0 %v5790_v0 }
 0x114   :  { %3895 = vmatmul.mubr.msk.f32.gmra.mrb[12].mxu0 %vm201_vm3, %v6061_v34 }
 0x115   :  { %605 = vmatprep.mubr.f32.mxu0 %v5790_v0 }
 0x118   :  { %3896 = vmatmul.mubr.msk.f32.gmra.mrb[14].mxu0 %vm201_vm3, %v6069_v35 }
 0x119   :  { %611 = vmatprep.mubr.f32.mxu0 %v5790_v0 }
 0x11c   :  { %3897 = vmatmul.mubr.msk.f32.gmra.mrb[16].mxu0 %vm201_vm3, %v6077_v36 }
 0x11d   :  { %617 = vmatprep.mubr.f32.mxu0 %v5790_v0 }
 0x120   :  { %3898 = vmatmul.mubr.msk.f32.gmra.mrb[18].mxu0 %vm201_vm3, %v6085_v37 }
 0x121   :  { %623 = vmatprep.mubr.f32.mxu0 %v5790_v0 }
 0x124   :  { %3899 = vmatmul.mubr.msk.f32.gmra.mrb[20].mxu0 %vm201_vm3, %v6093_v38 }
 0x125   :  { %629 = vmatprep.mubr.f32.mxu0 %v5790_v0 }
 0x128   :  { %3900 = vmatmul.mubr.msk.f32.gmra.mrb[22].mxu0 %vm201_vm3, %v6101_v39 }
 0x129   :  { %635 = vmatprep.mubr.f32.mxu0 %v5790_v0 }
 0x12c   :  { %3901 = vmatmul.mubr.msk.f32.gmra.mrb[24].mxu0 %vm201_vm3, %v6109_v40 }
 0x12d   :  { %641 = vmatprep.mubr.f32.mxu0 %v5790_v0 }
 0x130   :  { %3902 = vmatmul.mubr.msk.f32.gmra.mrb[26].mxu0 %vm201_vm3, %v6117_v41 }
 0x131   :  { %647 = vmatprep.mubr.f32.mxu0 %v5790_v0 }
 0x134   :  { %3903 = vmatmul.mubr.msk.f32.gmra.mrb[28].mxu0 %vm201_vm3, %v6125_v42 }
 0x135   :  { %653 = vmatprep.mubr.f32.mxu0 %v5790_v0 }
 0x138   :  { %3904 = vmatmul.mubr.msk.f32.gmra.mrb[30].mxu0 %vm201_vm3, %v6133_v43 }
 0x139   :  { %659 = vmatprep.mubr.f32.mxu0 %v5790_v0 }
 0x13c   :  { %3905 = vmatmul.mubr.msk.f32.gmra.mrb[32].mxu0 %vm201_vm3, %v6141_v44 }
 0x13d   :  { %665 = vmatprep.mubr.f32.mxu0 %v5790_v0 }
 0x140   :  { %3906 = vmatmul.mubr.msk.f32.gmra.mrb[34].mxu0 %vm201_vm3, %v6149_v45 }
 0x141   :  { %671 = vmatprep.mubr.f32.mxu0 %v5790_v0 }
 0x144   :  { %3907 = vmatmul.mubr.msk.f32.gmra.mrb[36].mxu0 %vm201_vm3, %v6157_v46 }
 0x145   :  { %677 = vmatprep.mubr.f32.mxu0 %v5790_v0 }
 0x148   :  { %3908 = vmatmul.mubr.msk.f32.gmra.mrb[38].mxu0 %vm201_vm3, %v6165_v47 }
 0x149   :  { %683 = vmatprep.mubr.f32.mxu0 %v5790_v0 }
 0x14c   :  { %3909 = vmatmul.mubr.msk.f32.gmra.mrb[40].mxu0 %vm201_vm3, %v6173_v48 }
 0x14d   :  { %689 = vmatprep.mubr.f32.mxu0 %v5790_v0 }
 0x150   :  { %3910 = vmatmul.mubr.msk.f32.gmra.mrb[42].mxu0 %vm201_vm3, %v6181_v49 }
 0x151   :  { %695 = vmatprep.mubr.f32.mxu0 %v5790_v0 }
 0x154   :  { %3911 = vmatmul.mubr.msk.f32.gmra.mrb[44].mxu0 %vm201_vm3, %v6189_v50 }
 0x155   :  { %701 = vmatprep.mubr.f32.mxu0 %v5790_v0 }
 0x158   :  { %3912 = vmatmul.mubr.msk.f32.gmra.mrb[46].mxu0 %vm201_vm3, %v6197_v51 }
 0x159   :  { %883 = vmatprep.mubr.f32.mxu0 %v5790_v0 }
 0x15c   :  { %3915 = vmatmul.mubr.msk.f32.vlgmr.msra.gmra.mrb[0].mxu0 %vm201_vm3, %v6025_v26  ;;  %v1813_v26 = vld [vmem:[#allocation5 + $0x8] sm:$0xff] }
 0x15d   :  { %4913 = vmatpush1.bf16.msra.mxu0 %v4912_v7  ;;  %889 = vmatprep.mubr.f32.mxu0 %v5790_v0  ;;  %v4931_v29 = vpack.c.bf16 %v1813_v26, %v1812_v10  ;;  %v4952_v7 = vpack.c.bf16 %v1827_v6, %v1826_v5  ;;  %v4976_v10 = vpack.c.bf16 %v2101_v24, %v2100_v23  ;;  %v2408_v24 = vld [vmem:[#allocation8 + $0xe0] sm:$0xff] }
 0x15e   :  { %4916 = vmatprep.subr.msk.bf16.mxu0 %vm6006_vm2, %v4914_v8  ;;  %v1099_v8 = vld [vmem:[%s7200_s0 + $0xd0] sm:$0xff] }
 0x15f   :  { %4932 = vmatpush1.bf16.msra.mxu1 %v4931_v29  ;;  %v2103_v29 = vld [vmem:[#allocation7 + $0x78] sm:$0xff] }
 0x160   :  { %3916 = vmatmul.mubr.msk.f32.gmra.mrb[2].mxu0 %vm201_vm3, %v6035_v31  ;;  %4933 = vmatprep.subr.bf16.mxu1 %v5792_v28 }
 0x161   :  { %895 = vmatprep.mubr.f32.mxu0 %v5790_v0  ;;  %4919 = vmatpush1.bf16.msk.msra.mxu0 %vm6006_vm2, %v4917_v14  ;;  %v2097_v14 = vld [vmem:[#allocation7 + $0x48] sm:$0xff] }
 0x162   :  { %4921 = vmatprep.subr.bf16.mxu0 %v4920_v15 }
 0x164   :  { %3917 = vmatmul.mubr.msk.f32.gmra.mrb[4].mxu0 %vm201_vm3, %v6045_v32 }
 0x165   :  { %901 = vmatprep.mubr.f32.mxu0 %v5790_v0 }
 0x168   :  { %3918 = vmatmul.mubr.msk.f32.gmra.mrb[6].mxu0 %vm201_vm3, %v6053_v33 }
 0x169   :  { %907 = vmatprep.mubr.f32.mxu0 %v5790_v0 }
 0x16c   :  { %3919 = vmatmul.mubr.msk.f32.gmra.mrb[8].mxu0 %vm201_vm3, %v6061_v34 }
 0x16d   :  { %913 = vmatprep.mubr.f32.mxu0 %v5790_v0 }
 0x170   :  { %3920 = vmatmul.mubr.msk.f32.gmra.mrb[10].mxu0 %vm201_vm3, %v6069_v35 }
 0x171   :  { %919 = vmatprep.mubr.f32.mxu0 %v5790_v0 }
 0x174   :  { %3921 = vmatmul.mubr.msk.f32.gmra.mrb[12].mxu0 %vm201_vm3, %v6077_v36 }
 0x175   :  { %925 = vmatprep.mubr.f32.mxu0 %v5790_v0 }
 0x178   :  { %3922 = vmatmul.mubr.msk.f32.gmra.mrb[14].mxu0 %vm201_vm3, %v6085_v37 }
 0x179   :  { %931 = vmatprep.mubr.f32.mxu0 %v5790_v0 }
 0x17c   :  { %3923 = vmatmul.mubr.msk.f32.gmra.mrb[16].mxu0 %vm201_vm3, %v6093_v38 }
 0x17d   :  { %937 = vmatprep.mubr.f32.mxu0 %v5790_v0 }
 0x180   :  { %3924 = vmatmul.mubr.msk.f32.gmra.mrb[18].mxu0 %vm201_vm3, %v6101_v39 }
 0x181   :  { %943 = vmatprep.mubr.f32.mxu0 %v5790_v0 }
 0x184   :  { %3925 = vmatmul.mubr.msk.f32.gmra.mrb[20].mxu0 %vm201_vm3, %v6109_v40 }
 0x185   :  { %949 = vmatprep.mubr.f32.mxu0 %v5790_v0 }
 0x188   :  { %3926 = vmatmul.mubr.msk.f32.gmra.mrb[22].mxu0 %vm201_vm3, %v6117_v41 }
 0x189   :  { %955 = vmatprep.mubr.f32.mxu0 %v5790_v0 }
 0x18c   :  { %3927 = vmatmul.mubr.msk.f32.gmra.mrb[24].mxu0 %vm201_vm3, %v6125_v42 }
 0x18d   :  { %961 = vmatprep.mubr.f32.mxu0 %v5790_v0 }
 0x190   :  { %3928 = vmatmul.mubr.msk.f32.gmra.mrb[26].mxu0 %vm201_vm3, %v6133_v43 }
 0x191   :  { %967 = vmatprep.mubr.f32.mxu0 %v5790_v0 }
 0x194   :  { %3929 = vmatmul.mubr.msk.f32.gmra.mrb[28].mxu0 %vm201_vm3, %v6141_v44 }
 0x195   :  { %973 = vmatprep.mubr.f32.mxu0 %v5790_v0 }
 0x198   :  { %3930 = vmatmul.mubr.msk.f32.gmra.mrb[30].mxu0 %vm201_vm3, %v6149_v45 }
 0x199   :  { %979 = vmatprep.mubr.f32.mxu0 %v5790_v0 }
 0x19c   :  { %3931 = vmatmul.mubr.msk.f32.gmra.mrb[32].mxu0 %vm201_vm3, %v6157_v46 }
 0x19d   :  { %985 = vmatprep.mubr.f32.mxu0 %v5790_v0 }
 0x1a0   :  { %3932 = vmatmul.mubr.msk.f32.gmra.mrb[34].mxu0 %vm201_vm3, %v6165_v47 }
 0x1a1   :  { %991 = vmatprep.mubr.f32.mxu0 %v5790_v0 }
 0x1a4   :  { %3933 = vmatmul.mubr.msk.f32.gmra.mrb[36].mxu0 %vm201_vm3, %v6173_v48 }
 0x1a5   :  { %997 = vmatprep.mubr.f32.mxu0 %v5790_v0 }
 0x1a8   :  { %3934 = vmatmul.mubr.msk.f32.gmra.mrb[38].mxu0 %vm201_vm3, %v6181_v49 }
 0x1a9   :  { %1003 = vmatprep.mubr.f32.mxu0 %v5790_v0 }
 0x1ac   :  { %3935 = vmatmul.mubr.msk.f32.gmra.mrb[40].mxu0 %vm201_vm3, %v6189_v50 }
 0x1ad   :  { %1009 = vmatprep.mubr.f32.mxu0 %v5790_v0 }
 0x1b0   :  { %3936 = vmatmul.mubr.msk.f32.gmra.mrb[42].mxu0 %vm201_vm3, %v6197_v51 }
 0x1b1   :  { %1015 = vmatprep.mubr.f32.mxu0 %v5790_v0 }
 0x1b4   :  { %3937 = vmatmul.mubr.msk.f32.gmra.mrb[44].mxu0 %vm201_vm3, %v6205_v52 }
 0x1b5   :  { %1021 = vmatprep.mubr.f32.mxu0 %v5790_v0 }
 0x1b8   :  { %3938 = vmatmul.mubr.msk.f32.gmra.mrb[46].mxu0 %vm201_vm3, %v6364_v16 }
 0x1b9   :  { %1251 = vmatprep.mubr.f32.mxu0 %v5790_v0 }
 0x1bc   :  { %3941 = vmatmul.mubr.msk.f32.vlgmr.msra.gmra.mrb[0].mxu0 %vm201_vm3, %v6035_v31  ;;  %v4934_v31 = vpack.c.bf16 %v1815_v30, %v1814_v27  ;;  %v2102_v27 = vld [vmem:[#allocation7 + $0x70] sm:$0xff] }
 0x1bd   :  { %4923 = vmatpush1.bf16.msra.mxu0 %v4922_v21  ;;  %1257 = vmatprep.mubr.f32.mxu0 %v5790_v0  ;;  %v4973_v21 = vpack.c.bf16 %v2099_v19, %v2098_v18  ;;  %v2404_v18 = vld [vmem:[#allocation8 + $0xc0] sm:$0xff]  ;;  %v2405_v19 = vld [vmem:[#allocation8 + $0xc8] sm:$0xff] }
 0x1be   :  { %4926 = vmatprep.subr.msk.bf16.mxu0 %vm6006_vm2, %v4924_v22  ;;  %4935 = vmatpush1.bf16.msra.mxu1 %v4934_v31  ;;  %v4979_v31 = vpack.c.bf16 %v2103_v29, %v2102_v27  ;;  %v2411_v27 = vld [vmem:[#allocation8 + $0xf8] sm:$0xff] }
 0x1bf   :  { %4936 = vmatprep.subr.bf16.mxu1 %v5792_v28 }
 0x1c0   :  { %3942 = vmatmul.mubr.msk.f32.gmra.mrb[2].mxu0 %vm201_vm3, %v6045_v32 }
 0x1c1   :  { %1263 = vmatprep.mubr.f32.mxu0 %v5790_v0  ;;  %4929 = vmatpush1.bf16.msk.msra.mxu0 %vm6006_vm2, %v4927_v25 }
 0x1c2   :  { %5256 = vmatprep.subr.bf16.mxu0 %v5792_v28  ;;  %4938 = vmatpush1.bf16.msra.mxu1 %v4937_v55  ;;  %v2105_v55 = vld [vmem:[#allocation7 + $0x88] sm:$0xff] }
 0x1c3   :  { %4939 = vmatprep.subr.bf16.mxu1 %v5792_v28  ;;  %v4982_v57 = vpack.c.bf16 %v2105_v55, %v2104_v54 }
 0x1c4   :  { %3943 = vmatmul.mubr.msk.f32.gmra.mrb[4].mxu0 %vm201_vm3, %v6053_v33 }
 0x1c5   :  { %1269 = vmatprep.mubr.f32.mxu0 %v5790_v0 }
 0x1c6   :  { %4941 = vmatpush1.bf16.msra.mxu1 %v4940_v58 }
 0x1c7   :  { %4942 = vmatprep.subr.bf16.mxu1 %v5792_v28 }
 0x1c8   :  { %3944 = vmatmul.mubr.msk.f32.gmra.mrb[6].mxu0 %vm201_vm3, %v6061_v34 }
 0x1c9   :  { %1275 = vmatprep.mubr.f32.mxu0 %v5790_v0 }
 0x1ca   :  { %4944 = vmatpush1.bf16.msra.mxu1 %v4943_v61 }
 0x1cb   :  { %4945 = vmatprep.subr.bf16.mxu1 %v5792_v28 }
 0x1cc   :  { %3945 = vmatmul.mubr.msk.f32.gmra.mrb[8].mxu0 %vm201_vm3, %v6069_v35 }
 0x1cd   :  { %1281 = vmatprep.mubr.f32.mxu0 %v5790_v0 }
 0x1ce   :  { %4947 = vmatpush1.bf16.msra.mxu1 %v4946_v1 }
 0x1cf   :  { %4948 = vmatprep.subr.bf16.mxu1 %v5792_v28 }
 0x1d0   :  { %3946 = vmatmul.mubr.msk.f32.gmra.mrb[10].mxu0 %vm201_vm3, %v6077_v36 }
 0x1d1   :  { %1287 = vmatprep.mubr.f32.mxu0 %v5790_v0 }
 0x1d2   :  { %4950 = vmatpush1.bf16.msra.mxu1 %v4949_v4 }
 0x1d3   :  { %4951 = vmatprep.subr.bf16.mxu1 %v5792_v28 }
 0x1d4   :  { %3947 = vmatmul.mubr.msk.f32.gmra.mrb[12].mxu0 %vm201_vm3, %v6085_v37 }
 0x1d5   :  { %1293 = vmatprep.mubr.f32.mxu0 %v5790_v0 }
 0x1d6   :  { %4953 = vmatpush1.bf16.msra.mxu1 %v4952_v7 }
 0x1d7   :  { %4954 = vmatprep.subr.bf16.mxu1 %v5792_v28 }
 0x1d8   :  { %3948 = vmatmul.mubr.msk.f32.gmra.mrb[14].mxu0 %vm201_vm3, %v6093_v38 }
 0x1d9   :  { %1299 = vmatprep.mubr.f32.mxu0 %v5790_v0 }
 0x1dc   :  { %3949 = vmatmul.mubr.msk.f32.gmra.mrb[16].mxu0 %vm201_vm3, %v6101_v39 }
 0x1dd   :  { %1305 = vmatprep.mubr.f32.mxu0 %v5790_v0 }
 0x1e0   :  { %3950 = vmatmul.mubr.msk.f32.gmra.mrb[18].mxu0 %vm201_vm3, %v6109_v40 }
 0x1e1   :  { %1311 = vmatprep.mubr.f32.mxu0 %v5790_v0 }
 0x1e4   :  { %3951 = vmatmul.mubr.msk.f32.gmra.mrb[20].mxu0 %vm201_vm3, %v6117_v41 }
 0x1e5   :  { %1317 = vmatprep.mubr.f32.mxu0 %v5790_v0 }
 0x1e8   :  { %3952 = vmatmul.mubr.msk.f32.gmra.mrb[22].mxu0 %vm201_vm3, %v6125_v42 }
 0x1e9   :  { %1323 = vmatprep.mubr.f32.mxu0 %v5790_v0 }
 0x1ec   :  { %3953 = vmatmul.mubr.msk.f32.gmra.mrb[24].mxu0 %vm201_vm3, %v6133_v43 }
 0x1ed   :  { %1329 = vmatprep.mubr.f32.mxu0 %v5790_v0 }
 0x1f0   :  { %3954 = vmatmul.mubr.msk.f32.gmra.mrb[26].mxu0 %vm201_vm3, %v6141_v44 }
 0x1f1   :  { %1335 = vmatprep.mubr.f32.mxu0 %v5790_v0 }
 0x1f4   :  { %3955 = vmatmul.mubr.msk.f32.gmra.mrb[28].mxu0 %vm201_vm3, %v6149_v45 }
 0x1f5   :  { %1341 = vmatprep.mubr.f32.mxu0 %v5790_v0 }
 0x1f8   :  { %3956 = vmatmul.mubr.msk.f32.gmra.mrb[30].mxu0 %vm201_vm3, %v6157_v46 }
 0x1f9   :  { %1347 = vmatprep.mubr.f32.mxu0 %v5790_v0 }
 0x1fc   :  { %3957 = vmatmul.mubr.msk.f32.gmra.mrb[32].mxu0 %vm201_vm3, %v6165_v47 }
 0x1fd   :  { %1353 = vmatprep.mubr.f32.mxu0 %v5790_v0 }
 0x200   :  { %3958 = vmatmul.mubr.msk.f32.gmra.mrb[34].mxu0 %vm201_vm3, %v6173_v48 }
 0x201   :  { %1359 = vmatprep.mubr.f32.mxu0 %v5790_v0 }
 0x204   :  { %3959 = vmatmul.mubr.msk.f32.gmra.mrb[36].mxu0 %vm201_vm3, %v6181_v49 }
 0x205   :  { %1365 = vmatprep.mubr.f32.mxu0 %v5790_v0 }
 0x208   :  { %3960 = vmatmul.mubr.msk.f32.gmra.mrb[38].mxu0 %vm201_vm3, %v6189_v50 }
 0x209   :  { %1371 = vmatprep.mubr.f32.mxu0 %v5790_v0 }
 0x20c   :  { %3961 = vmatmul.mubr.msk.f32.gmra.mrb[40].mxu0 %vm201_vm3, %v6197_v51 }
 0x20d   :  { %1377 = vmatprep.mubr.f32.mxu0 %v5790_v0 }
 0x210   :  { %3962 = vmatmul.mubr.msk.f32.gmra.mrb[42].mxu0 %vm201_vm3, %v6205_v52 }
 0x211   :  { %1383 = vmatprep.mubr.f32.mxu0 %v5790_v0 }
 0x214   :  { %3963 = vmatmul.mubr.msk.f32.gmra.mrb[44].mxu0 %vm201_vm3, %v6364_v16 }
 0x215   :  { %1389 = vmatprep.mubr.f32.mxu0 %v5790_v0 }
 0x218   :  { %3964 = vmatmul.mubr.msk.f32.gmra.mrb[46].mxu0 %vm201_vm3, %v1099_v8 }
 0x219   :  { %1619 = vmatprep.mubr.f32.mxu0 %v5790_v0 }
 0x21c   :  { %3967 = vmatmul.mubr.msk.f32.vlgmr.msra.gmra.mrb[0].mxu0 %vm201_vm3, %v6045_v32  ;;  %v1828_v32 = vld [vmem:[#allocation5 + $0x80] sm:$0xff] }
 0x21d   :  { %1625 = vmatprep.mubr.f32.mxu0 %v5790_v0 }
 0x220   :  { %3968 = vmatmul.mubr.msk.f32.gmra.mrb[2].mxu0 %vm201_vm3, %v6053_v33  ;;  %v1829_v33 = vld [vmem:[#allocation5 + $0x88] sm:$0xff] }
 0x221   :  { %1631 = vmatprep.mubr.f32.mxu0 %v5790_v0 }
 0x224   :  { %3969 = vmatmul.mubr.msk.f32.gmra.mrb[4].mxu0 %vm201_vm3, %v6061_v34  ;;  %v4955_v34 = vpack.c.bf16 %v1829_v33, %v1828_v32 }
 0x225   :  { %1637 = vmatprep.mubr.f32.mxu0 %v5790_v0 }
 0x226   :  { %4956 = vmatpush1.bf16.msra.mxu1 %v4955_v34 }
 0x227   :  { %4957 = vmatprep.subr.bf16.mxu1 %v5792_v28 }
 0x228   :  { %3970 = vmatmul.mubr.msk.f32.gmra.mrb[6].mxu0 %vm201_vm3, %v6069_v35  ;;  %v1467_v35 = vld [vmem:[%s7200_s0 + $0xd8] sm:$0xff] }
 0x229   :  { %1643 = vmatprep.mubr.f32.mxu0 %v5790_v0 }
 0x22c   :  { %3971 = vmatmul.mubr.msk.f32.gmra.mrb[8].mxu0 %vm201_vm3, %v6077_v36  ;;  %v2088_v36 = vld [vmem:[#allocation7] sm:$0xff] }
 0x22d   :  { %1649 = vmatprep.mubr.f32.mxu0 %v5790_v0 }
 0x230   :  { %3972 = vmatmul.mubr.msk.f32.gmra.mrb[10].mxu0 %vm201_vm3, %v6085_v37  ;;  %v2089_v37 = vld [vmem:[#allocation7 + $0x8] sm:$0xff] }
 0x231   :  { %1655 = vmatprep.mubr.f32.mxu0 %v5790_v0 }
 0x234   :  { %3973 = vmatmul.mubr.msk.f32.gmra.mrb[12].mxu0 %vm201_vm3, %v6093_v38 }
 0x235   :  { %1661 = vmatprep.mubr.f32.mxu0 %v5790_v0 }
 0x238   :  { %3974 = vmatmul.mubr.msk.f32.gmra.mrb[14].mxu0 %vm201_vm3, %v6101_v39  ;;  %v4958_v39 = vpack.c.bf16 %v2089_v37, %v2088_v36 }
 0x239   :  { %1667 = vmatprep.mubr.f32.mxu0 %v5790_v0 }
 0x23c   :  { %3975 = vmatmul.mubr.msk.f32.gmra.mrb[16].mxu0 %vm201_vm3, %v6109_v40 }
 0x23d   :  { %1673 = vmatprep.mubr.f32.mxu0 %v5790_v0 }
 0x240   :  { %3976 = vmatmul.mubr.msk.f32.gmra.mrb[18].mxu0 %vm201_vm3, %v6117_v41  ;;  %v2090_v41 = vld [vmem:[#allocation7 + $0x10] sm:$0xff] }
 0x241   :  { %1679 = vmatprep.mubr.f32.mxu0 %v5790_v0 }
 0x244   :  { %3977 = vmatmul.mubr.msk.f32.gmra.mrb[20].mxu0 %vm201_vm3, %v6125_v42  ;;  %v2091_v42 = vld [vmem:[#allocation7 + $0x18] sm:$0xff] }
 0x245   :  { %1685 = vmatprep.mubr.f32.mxu0 %v5790_v0 }
 0x248   :  { %3978 = vmatmul.mubr.msk.f32.gmra.mrb[22].mxu0 %vm201_vm3, %v6133_v43 }
 0x249   :  { %1691 = vmatprep.mubr.f32.mxu0 %v5790_v0 }
 0x24c   :  { %3979 = vmatmul.mubr.msk.f32.gmra.mrb[24].mxu0 %vm201_vm3, %v6141_v44  ;;  %v4961_v44 = vpack.c.bf16 %v2091_v42, %v2090_v41 }
 0x24d   :  { %1697 = vmatprep.mubr.f32.mxu0 %v5790_v0 }
 0x250   :  { %3980 = vmatmul.mubr.msk.f32.gmra.mrb[26].mxu0 %vm201_vm3, %v6149_v45 }
 0x251   :  { %1703 = vmatprep.mubr.f32.mxu0 %v5790_v0 }
 0x254   :  { %3981 = vmatmul.mubr.msk.f32.gmra.mrb[28].mxu0 %vm201_vm3, %v6157_v46  ;;  %v2092_v46 = vld [vmem:[#allocation7 + $0x20] sm:$0xff] }
 0x255   :  { %1709 = vmatprep.mubr.f32.mxu0 %v5790_v0 }
 0x258   :  { %3982 = vmatmul.mubr.msk.f32.gmra.mrb[30].mxu0 %vm201_vm3, %v6165_v47  ;;  %v2093_v47 = vld [vmem:[#allocation7 + $0x28] sm:$0xff] }
 0x259   :  { %1715 = vmatprep.mubr.f32.mxu0 %v5790_v0 }
 0x25c   :  { %3983 = vmatmul.mubr.msk.f32.gmra.mrb[32].mxu0 %vm201_vm3, %v6173_v48 }
 0x25d   :  { %1721 = vmatprep.mubr.f32.mxu0 %v5790_v0 }
 0x260   :  { %3984 = vmatmul.mubr.msk.f32.gmra.mrb[34].mxu0 %vm201_vm3, %v6181_v49  ;;  %v4964_v49 = vpack.c.bf16 %v2093_v47, %v2092_v46 }
 0x261   :  { %1727 = vmatprep.mubr.f32.mxu0 %v5790_v0 }
 0x264   :  { %3985 = vmatmul.mubr.msk.f32.gmra.mrb[36].mxu0 %vm201_vm3, %v6189_v50 }
 0x265   :  { %1733 = vmatprep.mubr.f32.mxu0 %v5790_v0 }
 0x268   :  { %3986 = vmatmul.mubr.msk.f32.gmra.mrb[38].mxu0 %vm201_vm3, %v6197_v51  ;;  %v2094_v51 = vld [vmem:[#allocation7 + $0x30] sm:$0xff] }
 0x269   :  { %1739 = vmatprep.mubr.f32.mxu0 %v5790_v0 }
 0x26c   :  { %3987 = vmatmul.mubr.msk.f32.gmra.mrb[40].mxu0 %vm201_vm3, %v6205_v52  ;;  %v2095_v52 = vld [vmem:[#allocation7 + $0x38] sm:$0xff] }
 0x26d   :  { %1745 = vmatprep.mubr.f32.mxu0 %v5790_v0  ;;  %v4967_v11 = vpack.c.bf16 %v2095_v52, %v2094_v51 }
 0x270   :  { %3988 = vmatmul.mubr.msk.f32.gmra.mrb[42].mxu0 %vm201_vm3, %v6364_v16  ;;  %v4970_v16 = vpack.c.bf16 %v2097_v14, %v2096_v13 }
 0x271   :  { %1751 = vmatprep.mubr.f32.mxu0 %v5790_v0 }
 0x274   :  { %3989 = vmatmul.mubr.msk.f32.gmra.mrb[44].mxu0 %vm201_vm3, %v1099_v8 }
 0x275   :  { %1757 = vmatprep.mubr.f32.mxu0 %v5790_v0 }
 0x278   :  { %3990 = vmatmul.mubr.msk.f32.gmra.mrb[46].mxu0 %vm201_vm3, %v1467_v35 }
 0x279   :  { %4772 = vmatprep.mubr.msk.f32.mxu0 %vm5793_vm5, %v5790_v0 }
 0x2ef   :  { %v6530_v38 = vpop.f32.mrb[0].mxu0 }
 0x2f0   :  { %v6532_v40 = vpop.f32.mrb[1].mxu0 }
 0x2f1   :  { %3991 = vmatprep.mubr.msk.f32.mxu1 %vm1830_vm4, %v6532_v40 }
 0x2f2   :  { %1968 = vmatmul.mubr.f32.vlgmr.msra.gmra.mrb[0].mxu1 %v6530_v38 }
 0x2f3   :  { %v6537_v43 = vpop.f32.mrb[2].mxu0  ;;  %4959 = vmatpush1.bf16.msra.mxu1 %v4958_v39 }
 0x2f4   :  { %v6539_v45 = vpop.f32.mrb[3].mxu0  ;;  %4960 = vmatprep.subr.bf16.mxu1 %v5792_v28 }
 0x2f5   :  { %3992 = vmatprep.mubr.msk.f32.mxu1 %vm1830_vm4, %v6539_v45 }
 0x2f6   :  { %1973 = vmatmul.mubr.f32.gmra.mrb[2].mxu1 %v6537_v43 }
 0x2f7   :  { %v6545_v48 = vpop.f32.mrb[4].mxu0  ;;  %4962 = vmatpush1.bf16.msra.mxu1 %v4961_v44 }
 0x2f8   :  { %v6547_v50 = vpop.f32.mrb[5].mxu0  ;;  %4963 = vmatprep.subr.bf16.mxu1 %v5792_v28 }
 0x2f9   :  { %3993 = vmatprep.mubr.msk.f32.mxu1 %vm1830_vm4, %v6547_v50 }
 0x2fa   :  { %1978 = vmatmul.mubr.f32.gmra.mrb[4].mxu1 %v6545_v48 }
 0x2fb   :  { %v6553_v9 = vpop.f32.mrb[6].mxu0  ;;  %4965 = vmatpush1.bf16.msra.mxu1 %v4964_v49 }
 0x2fc   :  { %v6555_v12 = vpop.f32.mrb[7].mxu0  ;;  %4966 = vmatprep.subr.bf16.mxu1 %v5792_v28 }
 0x2fd   :  { %3994 = vmatprep.mubr.msk.f32.mxu1 %vm1830_vm4, %v6555_v12 }
 0x2fe   :  { %1983 = vmatmul.mubr.f32.gmra.mrb[6].mxu1 %v6553_v9 }
 0x2ff   :  { %v6561_v15 = vpop.f32.mrb[8].mxu0  ;;  %4968 = vmatpush1.bf16.msra.mxu1 %v4967_v11 }
 0x300   :  { %v6563_v17 = vpop.f32.mrb[9].mxu0  ;;  %4969 = vmatprep.subr.bf16.mxu1 %v5792_v28 }
 0x301   :  { %3995 = vmatprep.mubr.msk.f32.mxu1 %vm1830_vm4, %v6563_v17 }
 0x302   :  { %1988 = vmatmul.mubr.f32.gmra.mrb[8].mxu1 %v6561_v15 }
 0x303   :  { %v6569_v20 = vpop.f32.mrb[10].mxu0  ;;  %4971 = vmatpush1.bf16.msra.mxu1 %v4970_v16  ;;  %v2403_v16 = vld [vmem:[#allocation8 + $0xb8] sm:$0xff] }
 0x304   :  { %v6571_v22 = vpop.f32.mrb[11].mxu0  ;;  %4972 = vmatprep.subr.bf16.mxu1 %v5792_v28 }
 0x305   :  { %3996 = vmatprep.mubr.msk.f32.mxu1 %vm1830_vm4, %v6571_v22 }
 0x306   :  { %1993 = vmatmul.mubr.f32.gmra.mrb[10].mxu1 %v6569_v20 }
 0x307   :  { %v6577_v25 = vpop.f32.mrb[12].mxu0  ;;  %4974 = vmatpush1.bf16.msra.mxu1 %v4973_v21  ;;  %v2406_v21 = vld [vmem:[#allocation8 + $0xd0] sm:$0xff] }
 0x308   :  { %v6579_v26 = vpop.f32.mrb[13].mxu0  ;;  %4975 = vmatprep.subr.bf16.mxu1 %v5792_v28 }
 0x309   :  { %3997 = vmatprep.mubr.msk.f32.mxu1 %vm1830_vm4, %v6579_v26 }
 0x30a   :  { %1998 = vmatmul.mubr.f32.gmra.mrb[12].mxu1 %v6577_v25 }
 0x30b   :  { %v6585_v30 = vpop.f32.mrb[14].mxu0  ;;  %4977 = vmatpush1.bf16.msra.mxu1 %v4976_v10 }
 0x30c   :  { %v6587_v53 = vpop.f32.mrb[15].mxu0  ;;  %4978 = vmatprep.subr.bf16.mxu1 %v5792_v28 }
 0x30d   :  { %3998 = vmatprep.mubr.msk.f32.mxu1 %vm1830_vm4, %v6587_v53 }
 0x30e   :  { %2003 = vmatmul.mubr.f32.gmra.mrb[14].mxu1 %v6585_v30 }
 0x30f   :  { %v6593_v56 = vpop.f32.mrb[16].mxu0  ;;  %4980 = vmatpush1.bf16.msra.mxu1 %v4979_v31 }
 0x310   :  { %v6595_v58 = vpop.f32.mrb[17].mxu0  ;;  %4981 = vmatprep.subr.bf16.mxu1 %v5792_v28 }
 0x311   :  { %3999 = vmatprep.mubr.msk.f32.mxu1 %vm1830_vm4, %v6595_v58 }
 0x312   :  { %2008 = vmatmul.mubr.f32.gmra.mrb[16].mxu1 %v6593_v56 }
 0x313   :  { %v6601_v59 = vpop.f32.mrb[18].mxu0  ;;  %4983 = vmatpush1.bf16.msra.mxu1 %v4982_v57 }
 0x314   :  { %v6603_v60 = vpop.f32.mrb[19].mxu0 }
 0x315   :  { %4000 = vmatprep.mubr.msk.f32.mxu1 %vm1830_vm4, %v6603_v60 }
 0x316   :  { %2013 = vmatmul.mubr.f32.gmra.mrb[18].mxu1 %v6601_v59 }
 0x317   :  { %v6608_v61 = vpop.f32.mrb[20].mxu0 }
 0x318   :  { %v6610_v62 = vpop.f32.mrb[21].mxu0 }
 0x319   :  { %4001 = vmatprep.mubr.msk.f32.mxu1 %vm1830_vm4, %v6610_v62 }
 0x31a   :  { %2018 = vmatmul.mubr.f32.gmra.mrb[20].mxu1 %v6608_v61 }
 0x31b   :  { %v6615_v63 = vpop.f32.mrb[22].mxu0 }
 0x31c   :  { %v6617_v1 = vpop.f32.mrb[23].mxu0 }
 0x31d   :  { %4002 = vmatprep.mubr.msk.f32.mxu1 %vm1830_vm4, %v6617_v1 }
 0x31e   :  { %2023 = vmatmul.mubr.f32.gmra.mrb[22].mxu1 %v6615_v63 }
 0x31f   :  { %v6622_v2 = vpop.f32.mrb[24].mxu0 }
 0x320   :  { %v6624_v3 = vpop.f32.mrb[25].mxu0 }
 0x321   :  { %4003 = vmatprep.mubr.msk.f32.mxu1 %vm1830_vm4, %v6624_v3 }
 0x322   :  { %2028 = vmatmul.mubr.f32.gmra.mrb[24].mxu1 %v6622_v2 }
 0x323   :  { %v6629_v4 = vpop.f32.mrb[26].mxu0 }
 0x324   :  { %v6631_v5 = vpop.f32.mrb[27].mxu0 }
 0x325   :  { %4004 = vmatprep.mubr.msk.f32.mxu1 %vm1830_vm4, %v6631_v5 }
 0x326   :  { %2033 = vmatmul.mubr.f32.gmra.mrb[26].mxu1 %v6629_v4 }
 0x327   :  { %v6636_v6 = vpop.f32.mrb[28].mxu0 }
 0x328   :  { %v6638_v7 = vpop.f32.mrb[29].mxu0 }
 0x329   :  { %4005 = vmatprep.mubr.msk.f32.mxu1 %vm1830_vm4, %v6638_v7 }
 0x32a   :  { %2038 = vmatmul.mubr.f32.gmra.mrb[28].mxu1 %v6636_v6 }
 0x32b   :  { %v6643_v8 = vpop.f32.mrb[30].mxu0 }
 0x32c   :  { %v6645_v32 = vpop.f32.mrb[31].mxu0 }
 0x32d   :  { %4006 = vmatprep.mubr.msk.f32.mxu1 %vm1830_vm4, %v6645_v32 }
 0x32e   :  { %2043 = vmatmul.mubr.f32.gmra.mrb[30].mxu1 %v6643_v8 }
 0x32f   :  { %v6650_v33 = vpop.f32.mrb[32].mxu0 }
 0x330   :  { %v6652_v34 = vpop.f32.mrb[33].mxu0 }
 0x331   :  { %4007 = vmatprep.mubr.msk.f32.mxu1 %vm1830_vm4, %v6652_v34 }
 0x332   :  { %2048 = vmatmul.mubr.f32.gmra.mrb[32].mxu1 %v6650_v33 }
 0x333   :  { %v6657_v35 = vpop.f32.mrb[34].mxu0 }
 0x334   :  { %v6659_v36 = vpop.f32.mrb[35].mxu0 }
 0x335   :  { %4008 = vmatprep.mubr.msk.f32.mxu1 %vm1830_vm4, %v6659_v36 }
 0x336   :  { %2053 = vmatmul.mubr.f32.gmra.mrb[34].mxu1 %v6657_v35 }
 0x337   :  { %v6664_v37 = vpop.f32.mrb[36].mxu0 }
 0x338   :  { %v6666_v39 = vpop.f32.mrb[37].mxu0 }
 0x339   :  { %4009 = vmatprep.mubr.msk.f32.mxu1 %vm1830_vm4, %v6666_v39 }
 0x33a   :  { %2058 = vmatmul.mubr.f32.gmra.mrb[36].mxu1 %v6664_v37 }
 0x33b   :  { %v6671_v41 = vpop.f32.mrb[38].mxu0 }
 0x33c   :  { %v6673_v42 = vpop.f32.mrb[39].mxu0 }
 0x33d   :  { %4010 = vmatprep.mubr.msk.f32.mxu1 %vm1830_vm4, %v6673_v42 }
 0x33e   :  { %2063 = vmatmul.mubr.f32.gmra.mrb[38].mxu1 %v6671_v41 }
 0x33f   :  { %v6678_v44 = vpop.f32.mrb[40].mxu0 }
 0x340   :  { %v6680_v46 = vpop.f32.mrb[41].mxu0 }
 0x341   :  { %4011 = vmatprep.mubr.msk.f32.mxu1 %vm1830_vm4, %v6680_v46 }
 0x342   :  { %2068 = vmatmul.mubr.f32.gmra.mrb[40].mxu1 %v6678_v44 }
 0x343   :  { %v6685_v47 = vpop.f32.mrb[42].mxu0 }
 0x344   :  { %v6687_v49 = vpop.f32.mrb[43].mxu0 }
 0x345   :  { %4012 = vmatprep.mubr.msk.f32.mxu1 %vm1830_vm4, %v6687_v49 }
 0x346   :  { %2073 = vmatmul.mubr.f32.gmra.mrb[42].mxu1 %v6685_v47 }
 0x347   :  { %v6692_v51 = vpop.f32.mrb[44].mxu0 }
 0x348   :  { %v6694_v52 = vpop.f32.mrb[45].mxu0 }
 0x349   :  { %4013 = vmatprep.mubr.msk.f32.mxu1 %vm1830_vm4, %v6694_v52 }
 0x34a   :  { %2078 = vmatmul.mubr.f32.gmra.mrb[44].mxu1 %v6692_v51 }
 0x34b   :  { %v6699_v11 = vpop.f32.mrb[46].mxu0 }
 0x34c   :  { %v6701_v13 = vpop.f32.mrb[47].mxu0 }
 0x34d   :  { %4014 = vmatprep.mubr.msk.f32.mxu1 %vm1830_vm4, %v6701_v13 }
 0x34e   :  { %2083 = vmatmul.mubr.f32.gmra.mrb[46].mxu1 %v6699_v11 }
 0x34f   :  { %4015 = vmatprep.mubr.msk.f32.mxu1 %vm1830_vm4, %v6532_v40  ;;  %v2397_v40 = vld [vmem:[#allocation8 + $0x88] sm:$0xff] }
 0x352   :  { %2171 = vmatmul.mubr.f32.vlgmr.msra.gmra.mrb[48].mxu1 %v6530_v38  ;;  %v2396_v38 = vld [vmem:[#allocation8 + $0x80] sm:$0xff] }
 0x353   :  { %4016 = vmatprep.mubr.msk.f32.mxu1 %vm1830_vm4, %v6539_v45  ;;  %v2398_v45 = vld [vmem:[#allocation8 + $0x90] sm:$0xff] }
 0x356   :  { %2176 = vmatmul.mubr.f32.gmra.mrb[50].mxu1 %v6537_v43  ;;  %v4984_v43 = vpack.c.bf16 %v2397_v40, %v2396_v38 }
 0x357   :  { %4017 = vmatprep.mubr.msk.f32.mxu1 %vm1830_vm4, %v6547_v50 }
 0x358   :  { %4985 = vmatprep.subr.bf16.mxu1 %v4984_v43 }
 0x359   :  { %4987 = vmatpush3.bf16.msra.mxu1 %v4984_v43 }
 0x35a   :  { %2181 = vmatmul.mubr.f32.gmra.mrb[52].mxu1 %v6545_v48  ;;  %v2399_v48 = vld [vmem:[#allocation8 + $0x98] sm:$0xff] }
 0x35b   :  { %4018 = vmatprep.mubr.msk.f32.mxu1 %vm1830_vm4, %v6555_v12  ;;  %v4988_v50 = vpack.c.bf16 %v2399_v48, %v2398_v45  ;;  %v2401_v12 = vld [vmem:[#allocation8 + $0xa8] sm:$0xff] }
 0x35d   :  { %4989 = vmatprep.subr.bf16.mxu1 %v4988_v50 }
 0x35e   :  { %2186 = vmatmul.mubr.f32.gmra.mrb[54].mxu1 %v6553_v9  ;;  %v2400_v9 = vld [vmem:[#allocation8 + $0xa0] sm:$0xff] }
 0x35f   :  { %4019 = vmatprep.mubr.msk.f32.mxu1 %vm1830_vm4, %v6563_v17  ;;  %4991 = vmatpush3.bf16.msra.mxu1 %v4988_v50  ;;  %v4992_v14 = vpack.c.bf16 %v2401_v12, %v2400_v9 }
 0x361   :  { %4993 = vmatprep.subr.bf16.mxu1 %v4992_v14 }
 0x362   :  { %2191 = vmatmul.mubr.f32.gmra.mrb[56].mxu1 %v6561_v15  ;;  %v2402_v15 = vld [vmem:[#allocation8 + $0xb0] sm:$0xff] }
 0x363   :  { %4020 = vmatprep.mubr.msk.f32.mxu1 %vm1830_vm4, %v6571_v22  ;;  %4995 = vmatpush3.bf16.msra.mxu1 %v4992_v14  ;;  %v4996_v17 = vpack.c.bf16 %v2403_v16, %v2402_v15  ;;  %v2407_v22 = vld [vmem:[#allocation8 + $0xd8] sm:$0xff] }
 0x364   :  { %v5004_v23 = vpack.c.bf16 %v2407_v22, %v2406_v21 }
 0x365   :  { %4997 = vmatprep.subr.bf16.mxu1 %v4996_v17 }
 0x366   :  { %2196 = vmatmul.mubr.f32.gmra.mrb[58].mxu1 %v6569_v20  ;;  %v5000_v20 = vpack.c.bf16 %v2405_v19, %v2404_v18 }
 0x367   :  { %4021 = vmatprep.mubr.msk.f32.mxu1 %vm1830_vm4, %v6579_v26  ;;  %4999 = vmatpush3.bf16.msra.mxu1 %v4996_v17  ;;  %v2410_v26 = vld [vmem:[#allocation8 + $0xf0] sm:$0xff] }
 0x368   :  { %5001 = vmatprep.subr.bf16.mxu1 %v5000_v20  ;;  %v5012_v29 = vpack.c.bf16 %v2411_v27, %v2410_v26 }
 0x36a   :  { %2201 = vmatmul.mubr.f32.gmra.mrb[60].mxu1 %v6577_v25  ;;  %v2409_v25 = vld [vmem:[#allocation8 + $0xe8] sm:$0xff] }
 0x36b   :  { %4022 = vmatprep.mubr.msk.f32.mxu1 %vm1830_vm4, %v6587_v53  ;;  %5003 = vmatpush3.bf16.msra.mxu1 %v5000_v20  ;;  %v5008_v10 = vpack.c.bf16 %v2409_v25, %v2408_v24 }
 0x36c   :  { %5005 = vmatprep.subr.bf16.mxu1 %v5004_v23 }
 0x36e   :  { %2206 = vmatmul.mubr.f32.gmra.mrb[62].mxu1 %v6585_v30 }
 0x36f   :  { %4023 = vmatprep.mubr.msk.f32.mxu1 %vm1830_vm4, %v6595_v58  ;;  %5007 = vmatpush3.bf16.msra.mxu1 %v5004_v23 }
 0x370   :  { %5009 = vmatprep.subr.bf16.mxu1 %v5008_v10 }
 0x372   :  { %2211 = vmatmul.mubr.f32.gmra.mrb[64].mxu1 %v6593_v56 }
 0x373   :  { %4024 = vmatprep.mubr.msk.f32.mxu1 %vm1830_vm4, %v6603_v60  ;;  %5011 = vmatpush3.bf16.msra.mxu1 %v5008_v10  ;;  %v2379_v60 = vld [vmem:[#allocation8 + $0x8] sm:$0xff] }
 0x374   :  { %5013 = vmatprep.subr.bf16.mxu1 %v5012_v29 }
 0x376   :  { %2216 = vmatmul.mubr.f32.gmra.mrb[66].mxu1 %v6601_v59  ;;  %v2378_v59 = vld [vmem:[#allocation8] sm:$0xff] }
 0x377   :  { %4025 = vmatprep.mubr.msk.f32.mxu1 %vm1830_vm4, %v6610_v62  ;;  %5015 = vmatpush3.bf16.msra.mxu1 %v5012_v29 }
 0x37a   :  { %2221 = vmatmul.mubr.f32.gmra.mrb[68].mxu1 %v6608_v61  ;;  %v6778_v61 = vpack.c.bf16 %v2379_v60, %v2378_v59  ;;  %v6826_v59 = vld [vmem:[%s7204_s4] ss:$0 sm:$0xff] }
 0x37b   :  { %4026 = vmatprep.mubr.msk.f32.mxu1 %vm1830_vm4, %v6617_v1 }
 0x37c   :  { %5017 = vmatprep.subr.bf16.mxu1 %v6778_v61 }
 0x37e   :  { %2226 = vmatmul.mubr.f32.gmra.mrb[70].mxu1 %v6615_v63 }
 0x37f   :  { %4027 = vmatprep.mubr.msk.f32.mxu1 %vm1830_vm4, %v6624_v3 }
 0x382   :  { %2231 = vmatmul.mubr.f32.gmra.mrb[72].mxu1 %v6622_v2 }
 0x383   :  { %4028 = vmatprep.mubr.msk.f32.mxu1 %vm1830_vm4, %v6631_v5 }
 0x386   :  { %2236 = vmatmul.mubr.f32.gmra.mrb[74].mxu1 %v6629_v4 }
 0x387   :  { %4029 = vmatprep.mubr.msk.f32.mxu1 %vm1830_vm4, %v6638_v7 }
 0x38a   :  { %2241 = vmatmul.mubr.f32.gmra.mrb[76].mxu1 %v6636_v6 }
 0x38b   :  { %4030 = vmatprep.mubr.msk.f32.mxu1 %vm1830_vm4, %v6645_v32 }
 0x38e   :  { %2246 = vmatmul.mubr.f32.gmra.mrb[78].mxu1 %v6643_v8 }
 0x38f   :  { %4031 = vmatprep.mubr.msk.f32.mxu1 %vm1830_vm4, %v6652_v34 }
 0x392   :  { %2251 = vmatmul.mubr.f32.gmra.mrb[80].mxu1 %v6650_v33 }
 0x393   :  { %4032 = vmatprep.mubr.msk.f32.mxu1 %vm1830_vm4, %v6659_v36 }
 0x396   :  { %2256 = vmatmul.mubr.f32.gmra.mrb[82].mxu1 %v6657_v35 }
 0x397   :  { %4033 = vmatprep.mubr.msk.f32.mxu1 %vm1830_vm4, %v6666_v39 }
 0x39a   :  { %2261 = vmatmul.mubr.f32.gmra.mrb[84].mxu1 %v6664_v37 }
 0x39b   :  { %4034 = vmatprep.mubr.msk.f32.mxu1 %vm1830_vm4, %v6673_v42 }
 0x39e   :  { %2266 = vmatmul.mubr.f32.gmra.mrb[86].mxu1 %v6671_v41 }
 0x39f   :  { %4035 = vmatprep.mubr.msk.f32.mxu1 %vm1830_vm4, %v6680_v46 }
 0x3a2   :  { %2271 = vmatmul.mubr.f32.gmra.mrb[88].mxu1 %v6678_v44 }
 0x3a3   :  { %4036 = vmatprep.mubr.msk.f32.mxu1 %vm1830_vm4, %v6687_v49 }
 0x3a6   :  { %2276 = vmatmul.mubr.f32.gmra.mrb[90].mxu1 %v6685_v47 }
 0x3a7   :  { %4037 = vmatprep.mubr.msk.f32.mxu1 %vm1830_vm4, %v6694_v52 }
 0x3aa   :  { %2281 = vmatmul.mubr.f32.gmra.mrb[92].mxu1 %v6692_v51 }
 0x3ab   :  { %4038 = vmatprep.mubr.msk.f32.mxu1 %vm1830_vm4, %v6701_v13 }
 0x3ae   :  { %2286 = vmatmul.mubr.f32.gmra.mrb[94].mxu1 %v6699_v11 }
 0x3c5   :  { %v1969_v30 = vpop.f32.mrb[0].mxu1 }
 0x3c6   :  { %v1971_v31 = vpop.f32.mrb[1].mxu1 }
 0x3c9   :  { %v1974_v53 = vpop.f32.mrb[2].mxu1 }
 0x3ca   :  { %v1976_v54 = vpop.f32.mrb[3].mxu1 }
 0x3cd   :  { %v1979_v55 = vpop.f32.mrb[4].mxu1 }
 0x3ce   :  { %v1981_v56 = vpop.f32.mrb[5].mxu1 }
 0x3d1   :  { %v1984_v57 = vpop.f32.mrb[6].mxu1 }
 0x3d2   :  { %v1986_v58 = vpop.f32.mrb[7].mxu1 }
 0x3d5   :  { %v6780_v62 = vpop.f32.mrb[8].mxu1 }
 0x3d6   :  { %v1991_v63 = vpop.f32.mrb[9].mxu1 }
 0x3d9   :  { %v6783_v1 = vpop.f32.mrb[10].mxu1 }
 0x3da   :  { %v1996_v2 = vpop.f32.mrb[11].mxu1 }
 0x3dd   :  { %v6785_v3 = vpop.f32.mrb[12].mxu1 }
 0x3de   :  { %v2001_v4 = vpop.f32.mrb[13].mxu1 }
 0x3e1   :  { %v6787_v5 = vpop.f32.mrb[14].mxu1 }
 0x3e2   :  { %v2006_v6 = vpop.f32.mrb[15].mxu1 }
 0x3e5   :  { %v6789_v7 = vpop.f32.mrb[16].mxu1 }
 0x3e6   :  { %v2011_v8 = vpop.f32.mrb[17].mxu1 }
 0x3e7   :  { %v2380_v8 = vld [vmem:[#allocation8 + $0x10] sm:$0xff] }
 0x3e9   :  { %v6791_v32 = vpop.f32.mrb[18].mxu1 }
 0x3ea   :  { %v2016_v33 = vpop.f32.mrb[19].mxu1 }
 0x3eb   :  { %v2381_v33 = vld [vmem:[#allocation8 + $0x18] sm:$0xff] }
 0x3ed   :  { %v6793_v34 = vpop.f32.mrb[20].mxu1 }
 0x3ee   :  { %v2021_v35 = vpop.f32.mrb[21].mxu1 }
 0x3f1   :  { %v6795_v36 = vpop.f32.mrb[22].mxu1 }
 0x3f2   :  { %v2026_v37 = vpop.f32.mrb[23].mxu1 }
 0x3f5   :  { %v6797_v39 = vpop.f32.mrb[24].mxu1 }
 0x3f6   :  { %v2031_v41 = vpop.f32.mrb[25].mxu1 }
 0x3f9   :  { %v6799_v42 = vpop.f32.mrb[26].mxu1 }
 0x3fa   :  { %v2036_v44 = vpop.f32.mrb[27].mxu1 }
 0x3fb   :  { %v5020_v44 = vpack.c.bf16 %v2381_v33, %v2380_v8  ;;  %v2393_v33 = vld [vmem:[#allocation8 + $0x78] sm:$0xff] }
 0x3fd   :  { %v6801_v46 = vpop.f32.mrb[28].mxu1 }
 0x3fe   :  { %v2041_v47 = vpop.f32.mrb[29].mxu1 }
 0x401   :  { %v6803_v49 = vpop.f32.mrb[30].mxu1 }
 0x402   :  { %v2046_v51 = vpop.f32.mrb[31].mxu1 }
 0x403   :  { %v2382_v51 = vld [vmem:[#allocation8 + $0x20] sm:$0xff] }
 0x405   :  { %v6805_v52 = vpop.f32.mrb[32].mxu1 }
 0x406   :  { %v2051_v11 = vpop.f32.mrb[33].mxu1 }
 0x407   :  { %v2383_v11 = vld [vmem:[#allocation8 + $0x28] sm:$0xff] }
 0x409   :  { %v6807_v13 = vpop.f32.mrb[34].mxu1 }
 0x40a   :  { %v2056_v38 = vpop.f32.mrb[35].mxu1 }
 0x40d   :  { %v6809_v40 = vpop.f32.mrb[36].mxu1 }
 0x40e   :  { %v2061_v43 = vpop.f32.mrb[37].mxu1 }
 0x411   :  { %v6811_v45 = vpop.f32.mrb[38].mxu1 }
 0x412   :  { %v2066_v48 = vpop.f32.mrb[39].mxu1 }
 0x413   :  { %v5024_v48 = vpack.c.bf16 %v2383_v11, %v2382_v51  ;;  %v2631_v51 = vld [vmem:[#allocation8 + $0x100] sm:$0xff]  ;;  %v2632_v11 = vld [vmem:[#allocation8 + $0x108] sm:$0xff] }
 0x415   :  { %v6813_v50 = vpop.f32.mrb[40].mxu1 }
 0x416   :  { %v2071_v9 = vpop.f32.mrb[41].mxu1 }
 0x419   :  { %v6815_v12 = vpop.f32.mrb[42].mxu1 }
 0x41a   :  { %v2076_v14 = vpop.f32.mrb[43].mxu1 }
 0x41b   :  { %v2384_v14 = vld [vmem:[#allocation8 + $0x30] sm:$0xff] }
 0x41d   :  { %v6817_v15 = vpop.f32.mrb[44].mxu1 }
 0x41e   :  { %v2081_v16 = vpop.f32.mrb[45].mxu1 }
 0x421   :  { %v6819_v17 = vpop.f32.mrb[46].mxu1 }
 0x422   :  { %v2086_v18 = vpop.f32.mrb[47].mxu1 }
 0x425   :  { %v2172_v19 = vpop.f32.mrb[48].mxu1 }
 0x426   :  { %v2291_v20 = vmax.f32 %v1969_v30, %v2172_v19  ;;  %v2174_v21 = vpop.f32.mrb[49].mxu1 }
 0x429   :  { %v2177_v22 = vpop.f32.mrb[50].mxu1 }
 0x42a   :  { %v2292_v23 = vmax.f32 %v1974_v53, %v2177_v22  ;;  %v2179_v24 = vpop.f32.mrb[51].mxu1  ;;  %v2386_v22 = vld [vmem:[#allocation8 + $0x40] sm:$0xff] }
 0x42c   :  { %v6821_v25 = vmax.f32 %v2291_v20, %v2292_v23  ;;  %v2387_v23 = vld [vmem:[#allocation8 + $0x48] sm:$0xff] }
 0x42d   :  { %v2182_v10 = vpop.f32.mrb[52].mxu1 }
 0x42e   :  { %v2293_v26 = vmax.f32 %v1979_v55, %v2182_v10  ;;  %v2184_v27 = vpop.f32.mrb[53].mxu1 }
 0x431   :  { %v2187_v29 = vpop.f32.mrb[54].mxu1 }
 0x432   :  { %v2294_v31 = vmax.f32 %v1984_v57, %v2187_v29  ;;  %v2189_v54 = vpop.f32.mrb[55].mxu1  ;;  %v2389_v29 = vld [vmem:[#allocation8 + $0x58] sm:$0xff] }
 0x434   :  { %v2326_v56 = vmax.f32 %v2293_v26, %v2294_v31  ;;  %v5032_v26 = vpack.c.bf16 %v2387_v23, %v2386_v22 }
 0x435   :  { %v2192_v58 = vpop.f32.mrb[56].mxu1 }
 0x436   :  { %v2295_v30 = vmax.f32 %v6780_v62, %v2192_v58  ;;  %v2194_v60 = vpop.f32.mrb[57].mxu1  ;;  %v6830_v53 = vadd.f32 %v6826_v59, %v2326_v56 }
 0x437   :  { %v2390_v60 = vld [vmem:[#allocation8 + $0x60] sm:$0xff] }
 0x438   :  { %v2328_v63 = vmax.f32 %v6830_v53, 0.0 }
 0x439   :  { %v2197_v55 = vpop.f32.mrb[58].mxu1 }
 0x43a   :  { %v2296_v2 = vmax.f32 %v6783_v1, %v2197_v55  ;;  %v2199_v57 = vpop.f32.mrb[59].mxu1  ;;  %4394 = vmatprep.mubr.f32.mxu1 %v2328_v63  ;;  %v2391_v55 = vld [vmem:[#allocation8 + $0x68] sm:$0xff] }
 0x43c   :  { %v2330_v4 = vmax.f32 %v2295_v30, %v2296_v2 }
 0x43d   :  { %v2202_v6 = vpop.f32.mrb[60].mxu1 }
 0x43e   :  { %v2331_v35 = vadd.f32 %v6826_v59, %v2330_v4  ;;  %v2297_v62 = vmax.f32 %v6785_v3, %v2202_v6  ;;  %v2204_v37 = vpop.f32.mrb[61].mxu1  ;;  %v2385_v3 = vld [vmem:[#allocation8 + $0x38] sm:$0xff]  ;;  %v5040_v6 = vpack.c.bf16 %v2391_v55, %v2390_v60 }
 0x43f   :  { %v2634_v60 = vld [vmem:[#allocation8 + $0x118] sm:$0xff] }
 0x440   :  { %v6838_v41 = vmax.f32 %v2331_v35, 0.0 }
 0x441   :  { %v2207_v47 = vpop.f32.mrb[62].mxu1 }
 0x442   :  { %v2298_v1 = vmax.f32 %v6787_v5, %v2207_v47  ;;  %v2209_v38 = vpop.f32.mrb[63].mxu1  ;;  %4395 = vmatmul.mubr.f32.vlgmr.msra.gmra.mrb[96].mxu1 %v6838_v41  ;;  %v5028_v5 = vpack.c.bf16 %v2385_v3, %v2384_v14 }
 0x443   :  { %5019 = vmatpush3.bf16.msra.mxu1 %v6778_v61 }
 0x444   :  { %v2334_v43 = vmax.f32 %v2297_v62, %v2298_v1  ;;  %5021 = vmatprep.subr.bf16.mxu1 %v5020_v44 }
 0x445   :  { %v2212_v9 = vpop.f32.mrb[64].mxu1 }
 0x446   :  { %v2335_v16 = vadd.f32 %v6826_v59, %v2334_v43  ;;  %v2299_v18 = vmax.f32 %v6789_v7, %v2212_v9  ;;  %v2214_v19 = vpop.f32.mrb[65].mxu1  ;;  %v2388_v7 = vld [vmem:[#allocation8 + $0x50] sm:$0xff] }
 0x447   :  { %5023 = vmatpush3.bf16.msra.mxu1 %v5020_v44 }
 0x448   :  { %v6845_v20 = vmax.f32 %v2335_v16, 0.0  ;;  %5025 = vmatprep.subr.bf16.mxu1 %v5024_v48 }
 0x449   :  { %v2217_v21 = vpop.f32.mrb[66].mxu1 }
 0x44a   :  { %v2300_v61 = vmax.f32 %v6791_v32, %v2217_v21  ;;  %v2219_v24 = vpop.f32.mrb[67].mxu1  ;;  %4397 = vmatprep.mubr.f32.mxu1 %v6845_v20  ;;  %v5036_v32 = vpack.c.bf16 %v2389_v29, %v2388_v7  ;;  %v2323_v7 = vadd.f32 %v6826_v59, %v6821_v25 }
 0x44b   :  { %5027 = vmatpush3.bf16.msra.mxu1 %v5024_v48  ;;  %v5048_v48 = vpack.c.bf16 %v2632_v11, %v2631_v51 }
 0x44c   :  { %v2338_v10 = vmax.f32 %v2299_v18, %v2300_v61  ;;  %5029 = vmatprep.subr.bf16.mxu1 %v5028_v5 }
 0x44d   :  { %v2222_v27 = vpop.f32.mrb[68].mxu1 }
 0x44e   :  { %v2339_v31 = vadd.f32 %v6826_v59, %v2338_v10  ;;  %v2301_v54 = vmax.f32 %v6793_v34, %v2222_v27  ;;  %v2224_v56 = vpop.f32.mrb[69].mxu1  ;;  %v2392_v34 = vld [vmem:[#allocation8 + $0x70] sm:$0xff] }
 0x44f   :  { %5031 = vmatpush3.bf16.msra.mxu1 %v5028_v5 }
 0x450   :  { %v6851_v58 = vmax.f32 %v2339_v31, 0.0  ;;  %5033 = vmatprep.subr.bf16.mxu1 %v5032_v26 }
 0x451   :  { %v2227_v30 = vpop.f32.mrb[70].mxu1 }
 0x452   :  { %v2302_v2 = vmax.f32 %v6795_v36, %v2227_v30  ;;  %v2229_v57 = vpop.f32.mrb[71].mxu1  ;;  %4398 = vmatmul.mubr.f32.gmra.mrb[98].mxu1 %v6851_v58  ;;  %v5044_v36 = vpack.c.bf16 %v2393_v33, %v2392_v34  ;;  %v2633_v30 = vld [vmem:[#allocation8 + $0x110] sm:$0xff] }
 0x453   :  { %5035 = vmatpush3.bf16.msra.mxu1 %v5032_v26  ;;  %v5052_v25 = vpack.c.bf16 %v2634_v60, %v2633_v30  ;;  %v2637_v33 = vld [vmem:[#allocation8 + $0x130] sm:$0xff]  ;;  %v2780_v60 = vld [vmem:[#allocation8 + $0x1d8] sm:$0xff] }
 0x454   :  { %v2342_v4 = vmax.f32 %v2301_v54, %v2302_v2  ;;  %5037 = vmatprep.subr.bf16.mxu1 %v5036_v32  ;;  %v2779_v30 = vld [vmem:[#allocation8 + $0x1d0] sm:$0xff] }
 0x455   :  { %v2232_v8 = vpop.f32.mrb[72].mxu1 }
 0x456   :  { %v2343_v35 = vadd.f32 %v6826_v59, %v2342_v4  ;;  %v2303_v62 = vmax.f32 %v6797_v39, %v2232_v8  ;;  %v2234_v37 = vpop.f32.mrb[73].mxu1  ;;  %v2635_v4 = vld [vmem:[#allocation8 + $0x120] sm:$0xff] }
 0x457   :  { %5039 = vmatpush3.bf16.msra.mxu1 %v5036_v32  ;;  %v2324_v32 = vmax.f32 %v2323_v7, 0.0 }
 0x458   :  { %v6857_v44 = vmax.f32 %v2343_v35, 0.0  ;;  %5041 = vmatprep.subr.bf16.mxu1 %v5040_v6  ;;  %v2638_v35 = vld [vmem:[#allocation8 + $0x138] sm:$0xff] }
 0x459   :  { %v2237_v47 = vpop.f32.mrb[74].mxu1  ;;  %v5060_v53 = vpack.c.bf16 %v2638_v35, %v2637_v33  ;;  %v2910_v33 = vld [vmem:[#allocation8 + $0x218] sm:$0xff]  ;;  %v2911_v35 = vld [vmem:[#allocation8 + $0x220] sm:$0xff] }
 0x45a   :  { %v2304_v1 = vmax.f32 %v6799_v42, %v2237_v47  ;;  %v2239_v38 = vpop.f32.mrb[75].mxu1  ;;  %4400 = vmatprep.mubr.f32.mxu1 %v6857_v44  ;;  %v2640_v47 = vld [vmem:[#allocation8 + $0x148] sm:$0xff] }
 0x45b   :  { %5043 = vmatpush3.bf16.msra.mxu1 %v5040_v6  ;;  %v2636_v6 = vld [vmem:[#allocation8 + $0x128] sm:$0xff]  ;;  %v2641_v38 = vld [vmem:[#allocation8 + $0x150] sm:$0xff] }
 0x45c   :  { %v2346_v43 = vmax.f32 %v2303_v62, %v2304_v1  ;;  %5045 = vmatprep.subr.bf16.mxu1 %v5044_v36 }
 0x45d   :  { %v2242_v9 = vpop.f32.mrb[76].mxu1 }
 0x45e   :  { %v2347_v39 = vadd.f32 %v6826_v59, %v2346_v43  ;;  %v2305_v14 = vmax.f32 %v6801_v46, %v2242_v9  ;;  %v2244_v3 = vpop.f32.mrb[77].mxu1  ;;  %v2642_v43 = vld [vmem:[#allocation8 + $0x158] sm:$0xff] }
 0x45f   :  { %5047 = vmatpush3.bf16.msra.mxu1 %v5044_v36  ;;  %v2639_v36 = vld [vmem:[#allocation8 + $0x140] sm:$0xff]  ;;  %v2644_v3 = vld [vmem:[#allocation8 + $0x168] sm:$0xff] }
 0x460   :  { %v6863_v16 = vmax.f32 %v2347_v39, 0.0  ;;  %5049 = vmatprep.subr.bf16.mxu1 %v5048_v48  ;;  %v5068_v39 = vpack.c.bf16 %v2642_v43, %v2641_v38  ;;  %v2917_v38 = vld [vmem:[#allocation8 + $0x250] sm:$0xff]  ;;  %v2918_v43 = vld [vmem:[#allocation8 + $0x258] sm:$0xff] }
 0x461   :  { %v2247_v18 = vpop.f32.mrb[78].mxu1 }
 0x462   :  { %v2306_v42 = vmax.f32 %v6803_v49, %v2247_v18  ;;  %v2249_v19 = vpop.f32.mrb[79].mxu1  ;;  %4401 = vmatmul.mubr.f32.gmra.mrb[100].mxu1 %v6863_v16 }
 0x463   :  { %v2646_v19 = vld [vmem:[#allocation8 + $0x178] sm:$0xff] }
 0x464   :  { %v2350_v5 = vmax.f32 %v2305_v14, %v2306_v42  ;;  %v2643_v14 = vld [vmem:[#allocation8 + $0x160] sm:$0xff]  ;;  %v2645_v42 = vld [vmem:[#allocation8 + $0x170] sm:$0xff] }
 0x465   :  { %v2252_v21 = vpop.f32.mrb[80].mxu1  ;;  %v5072_v18 = vpack.c.bf16 %v2644_v3, %v2643_v14  ;;  %v2921_v14 = vld [vmem:[#allocation8 + $0x270] sm:$0xff]  ;;  %v2922_v3 = vld [vmem:[#allocation8 + $0x278] sm:$0xff] }
 0x466   :  { %v2351_v22 = vadd.f32 %v6826_v59, %v2350_v5  ;;  %v2307_v23 = vmax.f32 %v6805_v52, %v2252_v21  ;;  %v2254_v61 = vpop.f32.mrb[81].mxu1  ;;  %v2769_v5 = vld [vmem:[#allocation8 + $0x180] sm:$0xff]  ;;  %v2770_v21 = vld [vmem:[#allocation8 + $0x188] sm:$0xff] }
 0x468   :  { %v6869_v24 = vmax.f32 %v2351_v22, 0.0  ;;  %v5080_v22 = vpack.c.bf16 %v2770_v21, %v2769_v5  ;;  %v3038_v5 = vld [vmem:[#allocation10 + $0x10] sm:$0xff]  ;;  %v3039_v21 = vld [vmem:[#allocation10 + $0x18] sm:$0xff] }
 0x469   :  { %v2257_v46 = vpop.f32.mrb[82].mxu1 }
 0x46a   :  { %v2308_v10 = vmax.f32 %v6807_v13, %v2257_v46  ;;  %v2259_v26 = vpop.f32.mrb[83].mxu1  ;;  %4403 = vmatprep.mubr.f32.mxu1 %v6869_v24  ;;  %v2773_v46 = vld [vmem:[#allocation8 + $0x1a0] sm:$0xff] }
 0x46c   :  { %v2354_v27 = vmax.f32 %v2307_v23, %v2308_v10  ;;  %v2772_v23 = vld [vmem:[#allocation8 + $0x198] sm:$0xff]  ;;  %v2774_v10 = vld [vmem:[#allocation8 + $0x1a8] sm:$0xff] }
 0x46d   :  { %v2262_v49 = vpop.f32.mrb[84].mxu1  ;;  %v5088_v26 = vpack.c.bf16 %v2774_v10, %v2773_v46  ;;  %v3043_v46 = vld [vmem:[#allocation10 + $0x38] sm:$0xff] }
 0x46e   :  { %v2355_v29 = vadd.f32 %v6826_v59, %v2354_v27  ;;  %v2309_v31 = vmax.f32 %v6809_v40, %v2262_v49  ;;  %v2264_v54 = vpop.f32.mrb[85].mxu1  ;;  %v2775_v27 = vld [vmem:[#allocation8 + $0x1b0] sm:$0xff]  ;;  %v2776_v49 = vld [vmem:[#allocation8 + $0x1b8] sm:$0xff] }
 0x46f   :  { %v2778_v54 = vld [vmem:[#allocation8 + $0x1c8] sm:$0xff] }
 0x470   :  { %v6877_v52 = vmax.f32 %v2355_v29, 0.0  ;;  %v5092_v29 = vpack.c.bf16 %v2776_v49, %v2775_v27  ;;  %v3044_v27 = vld [vmem:[#allocation10 + $0x40] sm:$0xff]  ;;  %v3045_v49 = vld [vmem:[#allocation10 + $0x48] sm:$0xff] }
 0x471   :  { %v2267_v56 = vpop.f32.mrb[86].mxu1 }
 0x472   :  { %v2310_v13 = vmax.f32 %v6811_v45, %v2267_v56  ;;  %v2269_v55 = vpop.f32.mrb[87].mxu1  ;;  %4404 = vmatmul.mubr.f32.gmra.mrb[102].mxu1 %v6877_v52  ;;  %v5056_v45 = vpack.c.bf16 %v2636_v6, %v2635_v4  ;;  %v2784_v4 = vld [vmem:[#allocation8 + $0x1f8] sm:$0xff] }
 0x473   :  { %4438 = vmatprep.mubr.f32.mxu1 %v2324_v32  ;;  %v2781_v55 = vld [vmem:[#allocation8 + $0x1e0] sm:$0xff] }
 0x474   :  { %v6881_v2 = vmax.f32 %v2309_v31, %v2310_v13  ;;  %v2777_v31 = vld [vmem:[#allocation8 + $0x1c0] sm:$0xff]  ;;  %v5100_v13 = vpack.c.bf16 %v2780_v60, %v2779_v30  ;;  %v3158_v30 = vld [vmem:[#allocation11 + $0x8] sm:$0xff] }
 0x475   :  { %v2272_v57 = vpop.f32.mrb[88].mxu1  ;;  %v5096_v32 = vpack.c.bf16 %v2778_v54, %v2777_v31  ;;  %v3049_v31 = vld [vmem:[#allocation10 + $0x68] sm:$0xff]  ;;  %v3051_v54 = vld [vmem:[#allocation10 + $0x78] sm:$0xff] }
 0x476   :  { %v2311_v40 = vmax.f32 %v6813_v50, %v2272_v57  ;;  %v2274_v8 = vpop.f32.mrb[89].mxu1  ;;  %4439 = vmatmul.mubr.f32.vlgmr.msra.gmra.mrb[96].mxu1 %v2328_v63  ;;  %v2359_v7 = vadd.f32 %v6826_v59, %v6881_v2  ;;  %v2782_v2 = vld [vmem:[#allocation8 + $0x1e8] sm:$0xff]  ;;  %v2783_v57 = vld [vmem:[#allocation8 + $0x1f0] sm:$0xff] }
 0x477   :  { %5051 = vmatpush3.bf16.msra.mxu1 %v5048_v48  ;;  %4441 = vmatprep.mubr.f32.mxu1 %v6838_v41  ;;  %v5108_v6 = vpack.c.bf16 %v2784_v4, %v2783_v57  ;;  %v2908_v8 = vld [vmem:[#allocation8 + $0x208] sm:$0xff]  ;;  %v3161_v4 = vld [vmem:[#allocation11 + $0x20] sm:$0xff] }
 0x478   :  { %5053 = vmatprep.subr.bf16.mxu1 %v5052_v25  ;;  %v6908_v56 = vmax.f32 %v2359_v7, 0.0  ;;  %v3046_v7 = vld [vmem:[#allocation10 + $0x50] sm:$0xff] }
 0x479   :  { %v2277_v34 = vpop.f32.mrb[90].mxu1 }
 0x47a   :  { %v2312_v62 = vmax.f32 %v6815_v12, %v2277_v34  ;;  %v2279_v37 = vpop.f32.mrb[91].mxu1  ;;  %4442 = vmatmul.mubr.f32.gmra.mrb[98].mxu1 %v6845_v20  ;;  %v5064_v12 = vpack.c.bf16 %v2640_v47, %v2639_v36  ;;  %v2909_v34 = vld [vmem:[#allocation8 + $0x210] sm:$0xff] }
 0x47b   :  { %5055 = vmatpush3.bf16.msra.mxu1 %v5052_v25  ;;  %4444 = vmatprep.mubr.f32.mxu1 %v6851_v58  ;;  %v5104_v25 = vpack.c.bf16 %v2782_v2, %v2781_v55  ;;  %v3160_v55 = vld [vmem:[#allocation11 + $0x18] sm:$0xff] }
 0x47c   :  { %v6890_v50 = vmax.f32 %v2311_v40, %v2312_v62  ;;  %5057 = vmatprep.subr.bf16.mxu1 %v5056_v45  ;;  %v2907_v40 = vld [vmem:[#allocation8 + $0x200] sm:$0xff]  ;;  %v2912_v62 = vld [vmem:[#allocation8 + $0x228] sm:$0xff] }
 0x47d   :  { %v2282_v63 = vpop.f32.mrb[92].mxu1  ;;  %v5120_v37 = vpack.c.bf16 %v2912_v62, %v2911_v35 }
 0x47e   :  { %v2313_v51 = vmax.f32 %v6817_v15, %v2282_v63  ;;  %v2284_v11 = vpop.f32.mrb[93].mxu1  ;;  %4445 = vmatmul.mubr.f32.gmra.mrb[100].mxu1 %v6857_v44  ;;  %v2914_v63 = vld [vmem:[#allocation8 + $0x238] sm:$0xff]  ;;  %v2363_v36 = vadd.f32 %v6826_v59, %v6890_v50  ;;  %v2919_v50 = vld [vmem:[#allocation8 + $0x260] sm:$0xff] }
 0x47f   :  { %5059 = vmatpush3.bf16.msra.mxu1 %v5056_v45  ;;  %4447 = vmatprep.mubr.f32.mxu1 %v6863_v16  ;;  %v5112_v45 = vpack.c.bf16 %v2908_v8, %v2907_v40  ;;  %v2916_v11 = vld [vmem:[#allocation8 + $0x248] sm:$0xff] }
 0x480   :  { %5061 = vmatprep.subr.bf16.mxu1 %v5060_v53 }
 0x481   :  { %v2287_v1 = vpop.f32.mrb[94].mxu1 }
 0x482   :  { %v2314_v48 = vmax.f32 %v6819_v17, %v2287_v1  ;;  %v2289_v9 = vpop.f32.mrb[95].mxu1  ;;  %4448 = vmatmul.mubr.f32.gmra.mrb[102].mxu1 %v6869_v24  ;;  %v5076_v17 = vpack.c.bf16 %v2646_v19, %v2645_v42  ;;  %v3036_v42 = vld [vmem:[#allocation10] sm:$0xff]  ;;  %v3037_v19 = vld [vmem:[#allocation10 + $0x8] sm:$0xff] }
 0x483   :  { %5063 = vmatpush3.bf16.msra.mxu1 %v5060_v53  ;;  %4482 = vmatprep.mubr.f32.mxu1 %v6838_v41  ;;  %v2771_v41 = vld [vmem:[#allocation8 + $0x190] sm:$0xff]  ;;  %v2920_v9 = vld [vmem:[#allocation8 + $0x268] sm:$0xff] }
 0x484   :  { %v6898_v15 = vmax.f32 %v2313_v51, %v2314_v48  ;;  %5065 = vmatprep.subr.bf16.mxu1 %v5064_v12  ;;  %v5084_v61 = vpack.c.bf16 %v2772_v23, %v2771_v41  ;;  %v2913_v53 = vld [vmem:[#allocation8 + $0x230] sm:$0xff]  ;;  %v2915_v51 = vld [vmem:[#allocation8 + $0x240] sm:$0xff]  ;;  %v5132_v48 = vpack.c.bf16 %v2918_v43, %v2917_v38  ;;  %v3041_v41 = vld [vmem:[#allocation10 + $0x28] sm:$0xff] }
 0x485   :  { %v5124_v47 = vpack.c.bf16 %v2914_v63, %v2913_v53  ;;  %v5128_v1 = vpack.c.bf16 %v2916_v11, %v2915_v51  ;;  %v3166_v53 = vld [vmem:[#allocation11 + $0x48] sm:$0xff]  ;;  %v3167_v51 = vld [vmem:[#allocation11 + $0x50] sm:$0xff]  ;;  %v3168_v11 = vld [vmem:[#allocation11 + $0x58] sm:$0xff] }
 0x486   :  { %v2367_v10 = vadd.f32 %v6826_v59, %v6898_v15  ;;  %v3050_v15 = vld [vmem:[#allocation10 + $0x70] sm:$0xff]  ;;  %v3170_v38 = vld [vmem:[#allocation11 + $0x68] sm:$0xff] }
 0x487   :  { %5067 = vmatpush3.bf16.msra.mxu1 %v5064_v12  ;;  %v2364_v12 = vmax.f32 %v2363_v36, 0.0 }
 0x488   :  { %5069 = vmatprep.subr.bf16.mxu1 %v5068_v39 }
 0x48b   :  { %5071 = vmatpush3.bf16.msra.mxu1 %v5068_v39  ;;  %v5136_v39 = vpack.c.bf16 %v2920_v9, %v2919_v50  ;;  %v3172_v50 = vld [vmem:[#allocation11 + $0x78] sm:$0xff] }
 0x48c   :  { %5073 = vmatprep.subr.bf16.mxu1 %v5072_v18 }
 0x48f   :  { %5075 = vmatpush3.bf16.msra.mxu1 %v5072_v18  ;;  %v5140_v18 = vpack.c.bf16 %v2922_v3, %v2921_v14  ;;  %v4058_v14 = vld [vmem:[%s7209_s9 + $0x108] sm:$0xff] }
 0x490   :  { %5077 = vmatprep.subr.bf16.mxu1 %v5076_v17 }
 0x493   :  { %5079 = vmatpush3.bf16.msra.mxu1 %v5076_v17  ;;  %v5144_v17 = vpack.c.bf16 %v3037_v19, %v3036_v42  ;;  %v4042_v42 = vld [vmem:[%s7209_s9 + $0x88] sm:$0xff] }
 0x494   :  { %5081 = vmatprep.subr.bf16.mxu1 %v5080_v22 }
 0x496   :  { %4483 = vmatmul.mubr.f32.vlgmr.msra.gmra.mrb[96].mxu1 %v6845_v20 }
 0x497   :  { %4485 = vmatprep.mubr.f32.mxu1 %v6851_v58  ;;  %5083 = vmatpush3.bf16.msra.mxu1 %v5080_v22  ;;  %v3040_v22 = vld [vmem:[#allocation10 + $0x20] sm:$0xff] }
 0x498   :  { %5085 = vmatprep.subr.bf16.mxu1 %v5084_v61  ;;  %v5152_v23 = vpack.c.bf16 %v3041_v41, %v3040_v22  ;;  %v4060_v22 = vld [vmem:[%s7209_s9 + $0x118] sm:$0xff]  ;;  %v4045_v41 = vld [vmem:[%s7209_s9 + $0xa0] sm:$0xff] }
 0x49a   :  { %4486 = vmatmul.mubr.f32.gmra.mrb[98].mxu1 %v6857_v44 }
 0x49b   :  { %4488 = vmatprep.mubr.f32.mxu1 %v6863_v16  ;;  %5087 = vmatpush3.bf16.msra.mxu1 %v5084_v61  ;;  %v3042_v61 = vld [vmem:[#allocation10 + $0x30] sm:$0xff] }
 0x49c   :  { %5089 = vmatprep.subr.bf16.mxu1 %v5088_v26 }
 0x49e   :  { %4489 = vmatmul.mubr.f32.gmra.mrb[100].mxu1 %v6869_v24 }
 0x49f   :  { %4491 = vmatprep.mubr.f32.mxu1 %v6877_v52  ;;  %5091 = vmatpush3.bf16.msra.mxu1 %v5088_v26  ;;  %v5156_v26 = vpack.c.bf16 %v3043_v46, %v3042_v61  ;;  %v4061_v46 = vld [vmem:[%s7209_s9 + $0x120] sm:$0xff] }
 0x4a0   :  { %5093 = vmatprep.subr.bf16.mxu1 %v5092_v29 }
 0x4a2   :  { %4492 = vmatmul.mubr.f32.gmra.mrb[102].mxu1 %v6908_v56 }
 0x4a3   :  { %5095 = vmatpush3.bf16.msra.mxu1 %v5092_v29  ;;  %4526 = vmatprep.mubr.f32.mxu1 %v6845_v20  ;;  %v5116_v20 = vpack.c.bf16 %v2910_v33, %v2909_v34  ;;  %v3047_v29 = vld [vmem:[#allocation10 + $0x58] sm:$0xff]  ;;  %v3163_v34 = vld [vmem:[#allocation11 + $0x30] sm:$0xff] }
 0x4a4   :  { %5097 = vmatprep.subr.bf16.mxu1 %v5096_v32  ;;  %v3164_v33 = vld [vmem:[#allocation11 + $0x38] sm:$0xff] }
 0x4a5   :  { %v5188_v62 = vpack.c.bf16 %v3164_v33, %v3163_v34  ;;  %v4070_v34 = vld [vmem:[%s7209_s9 + $0x168] sm:$0xff] }
 0x4a7   :  { %5099 = vmatpush3.bf16.msra.mxu1 %v5096_v32  ;;  %v3157_v32 = vld [vmem:[#allocation11] sm:$0xff] }
 0x4a8   :  { %5101 = vmatprep.subr.bf16.mxu1 %v5100_v13  ;;  %v5176_v60 = vpack.c.bf16 %v3158_v30, %v3157_v32  ;;  %v4065_v32 = vld [vmem:[%s7209_s9 + $0x140] sm:$0xff]  ;;  %v4066_v30 = vld [vmem:[%s7209_s9 + $0x148] sm:$0xff] }
 0x4ab   :  { %5103 = vmatpush3.bf16.msra.mxu1 %v5100_v13  ;;  %v3159_v13 = vld [vmem:[#allocation11 + $0x10] sm:$0xff] }
 0x4ac   :  { %5105 = vmatprep.subr.bf16.mxu1 %v5104_v25  ;;  %v5180_v57 = vpack.c.bf16 %v3160_v55, %v3159_v13  ;;  %v4053_v13 = vld [vmem:[%s7209_s9 + $0xe0] sm:$0xff]  ;;  %v4054_v55 = vld [vmem:[%s7209_s9 + $0xe8] sm:$0xff] }
 0x4af   :  { %5107 = vmatpush3.bf16.msra.mxu1 %v5104_v25 }
 0x4b0   :  { %5109 = vmatprep.subr.bf16.mxu1 %v5108_v6 }
 0x4b3   :  { %5111 = vmatpush3.bf16.msra.mxu1 %v5108_v6  ;;  %v3162_v6 = vld [vmem:[#allocation11 + $0x28] sm:$0xff] }
 0x4b4   :  { %5113 = vmatprep.subr.bf16.mxu1 %v5112_v45 }
 0x4b6   :  { %4527 = vmatmul.mubr.f32.vlgmr.msra.gmra.mrb[96].mxu1 %v6851_v58 }
 0x4b7   :  { %4529 = vmatprep.mubr.f32.mxu1 %v6857_v44  ;;  %5115 = vmatpush3.bf16.msra.mxu1 %v5112_v45  ;;  %v5184_v45 = vpack.c.bf16 %v3162_v6, %v3161_v4  ;;  %v4055_v6 = vld [vmem:[%s7209_s9 + $0xf0] sm:$0xff] }
 0x4b8   :  { %5117 = vmatprep.subr.bf16.mxu1 %v5116_v20 }
 0x4ba   :  { %4530 = vmatmul.mubr.f32.gmra.mrb[98].mxu1 %v6863_v16 }
 0x4bb   :  { %4532 = vmatprep.mubr.f32.mxu1 %v6869_v24  ;;  %5119 = vmatpush3.bf16.msra.mxu1 %v5116_v20 }
 0x4bc   :  { %5121 = vmatprep.subr.bf16.mxu1 %v5120_v37 }
 0x4be   :  { %4533 = vmatmul.mubr.f32.gmra.mrb[100].mxu1 %v6877_v52 }
 0x4bf   :  { %4535 = vmatprep.mubr.f32.mxu1 %v6908_v56  ;;  %5123 = vmatpush3.bf16.msra.mxu1 %v5120_v37  ;;  %v3165_v37 = vld [vmem:[#allocation11 + $0x40] sm:$0xff] }
 0x4c0   :  { %5125 = vmatprep.subr.bf16.mxu1 %v5124_v47 }
 0x4c2   :  { %4536 = vmatmul.mubr.f32.gmra.mrb[102].mxu1 %v2364_v12 }
 0x4c3   :  { %5127 = vmatpush3.bf16.msra.mxu1 %v5124_v47  ;;  %4570 = vmatprep.mubr.f32.mxu1 %v6851_v58  ;;  %v5148_v58 = vpack.c.bf16 %v3039_v21, %v3038_v5  ;;  %v5192_v47 = vpack.c.bf16 %v3166_v53, %v3165_v37  ;;  %v4044_v5 = vld [vmem:[%s7209_s9 + $0x98] sm:$0xff] }
 0x4c4   :  { %5129 = vmatprep.subr.bf16.mxu1 %v5128_v1 }
 0x4c7   :  { %5131 = vmatpush3.bf16.msra.mxu1 %v5128_v1  ;;  %v3169_v1 = vld [vmem:[#allocation11 + $0x60] sm:$0xff] }
 0x4c8   :  { %5133 = vmatprep.subr.bf16.mxu1 %v5132_v48  ;;  %v5200_v43 = vpack.c.bf16 %v3170_v38, %v3169_v1 }
 0x4cb   :  { %5135 = vmatpush3.bf16.msra.mxu1 %v5132_v48  ;;  %v3171_v48 = vld [vmem:[#allocation11 + $0x70] sm:$0xff] }
 0x4cc   :  { %5137 = vmatprep.subr.bf16.mxu1 %v5136_v39  ;;  %v5204_v9 = vpack.c.bf16 %v3172_v50, %v3171_v48 }
 0x4cf   :  { %5139 = vmatpush3.bf16.msra.mxu1 %v5136_v39  ;;  %v4057_v39 = vld [vmem:[%s7209_s9 + $0x100] sm:$0xff] }
 0x4d0   :  { %5141 = vmatprep.subr.bf16.mxu1 %v5140_v18  ;;  %v5257_v3 = vpack.c.bf16 %v4058_v14, %v4057_v39 }
 0x4d2   :  { %5258 = vmatpush3.bf16.msra.mxu0 %v5257_v3 }
 0x4d3   :  { %5143 = vmatpush3.bf16.msra.mxu1 %v5140_v18  ;;  %v4041_v18 = vld [vmem:[%s7209_s9 + $0x80] sm:$0xff]  ;;  %5259 = vmatprep.subr.bf16.mxu0 %v5792_v28 }
 0x4d4   :  { %5145 = vmatprep.subr.bf16.mxu1 %v5144_v17  ;;  %v5209_v19 = vpack.c.bf16 %v4042_v42, %v4041_v18 }
 0x4d6   :  { %4571 = vmatmul.mubr.f32.vlgmr.msra.gmra.mrb[96].mxu1 %v6857_v44  ;;  %v2368_v44 = vmax.f32 %v2367_v10, 0.0  ;;  %v4062_v10 = vld [vmem:[%s7209_s9 + $0x128] sm:$0xff] }
 0x4d7   :  { %4573 = vmatprep.mubr.f32.mxu1 %v6863_v16  ;;  %5147 = vmatpush3.bf16.msra.mxu1 %v5144_v17  ;;  %v5160_v16 = vpack.c.bf16 %v3045_v49, %v3044_v27  ;;  %v4043_v17 = vld [vmem:[%s7209_s9 + $0x90] sm:$0xff] }
 0x4d8   :  { %5149 = vmatprep.subr.bf16.mxu1 %v5148_v58  ;;  %v5212_v21 = vpack.c.bf16 %v4044_v5, %v4043_v17  ;;  %v4063_v49 = vld [vmem:[%s7209_s9 + $0x130] sm:$0xff]  ;;  %v3297_v17 = vld [vmem:[%s7209_s9 + $0x8] sm:$0xff]  ;;  %v4040_v5 = vld [vmem:[%s7208_s8] ss:$0 sm:$0xff] }
 0x4da   :  { %4574 = vmatmul.mubr.f32.gmra.mrb[98].mxu1 %v6869_v24  ;;  %v5164_v24 = vpack.c.bf16 %v3047_v29, %v3046_v7  ;;  %v4048_v7 = vld [vmem:[%s7209_s9 + $0xb8] sm:$0xff] }
 0x4db   :  { %4576 = vmatprep.mubr.f32.mxu1 %v6877_v52  ;;  %5151 = vmatpush3.bf16.msra.mxu1 %v5148_v58  ;;  %v3048_v52 = vld [vmem:[#allocation10 + $0x60] sm:$0xff]  ;;  %v4059_v58 = vld [vmem:[%s7209_s9 + $0x110] sm:$0xff] }
 0x4dc   :  { %5153 = vmatprep.subr.bf16.mxu1 %v5152_v23  ;;  %v5168_v59 = vpack.c.bf16 %v3049_v31, %v3048_v52  ;;  %v5260_v61 = vpack.c.bf16 %v4060_v22, %v4059_v58  ;;  %v4049_v52 = vld [vmem:[%s7209_s9 + $0xc0] sm:$0xff]  ;;  %v4050_v31 = vld [vmem:[%s7209_s9 + $0xc8] sm:$0xff] }
 0x4de   :  { %4577 = vmatmul.mubr.f32.gmra.mrb[100].mxu1 %v6908_v56  ;;  %v5172_v56 = vpack.c.bf16 %v3051_v54, %v3050_v15  ;;  %5261 = vmatpush3.bf16.msra.mxu0 %v5260_v61  ;;  %v4051_v15 = vld [vmem:[%s7209_s9 + $0xd0] sm:$0xff]  ;;  %v4052_v54 = vld [vmem:[%s7209_s9 + $0xd8] sm:$0xff] }
 0x4df   :  { %4579 = vmatprep.mubr.f32.mxu1 %v2364_v12  ;;  %5155 = vmatpush3.bf16.msra.mxu1 %v5152_v23  ;;  %v5196_v12 = vpack.c.bf16 %v3168_v11, %v3167_v51  ;;  %v4046_v23 = vld [vmem:[%s7209_s9 + $0xa8] sm:$0xff] }
 0x4e0   :  { %5157 = vmatprep.subr.bf16.mxu1 %v5156_v26  ;;  %v5215_v27 = vpack.c.bf16 %v4046_v23, %v4045_v41  ;;  %5262 = vmatprep.subr.bf16.mxu0 %v5792_v28 }
 0x4e2   :  { %4580 = vmatmul.mubr.f32.gmra.mrb[102].mxu1 %v2368_v44  ;;  %v4064_v44 = vld [vmem:[%s7209_s9 + $0x138] sm:$0xff] }
 0x4e3   :  { %5159 = vmatpush3.bf16.msra.mxu1 %v5156_v26  ;;  %v5263_v26 = vpack.c.bf16 %v4062_v10, %v4061_v46  ;;  %v5266_v29 = vpack.c.bf16 %v4064_v44, %v4063_v49 }
 0x4e4   :  { %5161 = vmatprep.subr.bf16.mxu1 %v5160_v16 }
 0x4e5   :  { %5264 = vmatpush3.bf16.msra.mxu0 %v5263_v26  ;;  %v3298_v26 = vld [vmem:[%s7209_s9 + $0x10] sm:$0xff] }
 0x4e6   :  { %5265 = vmatprep.subr.bf16.mxu0 %v5792_v28 }
 0x4e7   :  { %5163 = vmatpush3.bf16.msra.mxu1 %v5160_v16  ;;  %v4047_v16 = vld [vmem:[%s7209_s9 + $0xb0] sm:$0xff] }
 0x4e8   :  { %5165 = vmatprep.subr.bf16.mxu1 %v5164_v24 }
 0x4e9   :  { %5267 = vmatpush3.bf16.msra.mxu0 %v5266_v29 }
 0x4ea   :  { %5268 = vmatprep.subr.bf16.mxu0 %v5792_v28 }
 0x4eb   :  { %5167 = vmatpush3.bf16.msra.mxu1 %v5164_v24  ;;  %v5218_v24 = vpack.c.bf16 %v4048_v7, %v4047_v16 }
 0x4ec   :  { %5169 = vmatprep.subr.bf16.mxu1 %v5168_v59 }
 0x4ef   :  { %5171 = vmatpush3.bf16.msra.mxu1 %v5168_v59  ;;  %v5221_v59 = vpack.c.bf16 %v4050_v31, %v4049_v52  ;;  %v3300_v31 = vld [vmem:[%s7209_s9 + $0x20] sm:$0xff] }
 0x4f0   :  { %5173 = vmatprep.subr.bf16.mxu1 %v5172_v56 }
 0x4f3   :  { %5175 = vmatpush3.bf16.msra.mxu1 %v5172_v56  ;;  %v5224_v56 = vpack.c.bf16 %v4052_v54, %v4051_v15 }
 0x4f4   :  { %5177 = vmatprep.subr.bf16.mxu1 %v5176_v60 }
 0x5a9   :  { %v4572_v2 = vpop.f32.mrb[96].mxu1 }
 0x5aa   :  { %v2989_v25 = vpop.f32.mrb[97].mxu1 }
 0x5ab   :  { %4614 = vmatprep.mubr.f32.mxu1 %v2989_v25 }
 0x5ac   :  { %4615 = vmatmul.mubr.f32.vlgmr.msra.gmra.mrb[104].mxu1 %v4572_v2 }
 0x5ad   :  { %5179 = vmatpush3.bf16.msra.mxu1 %v5176_v60  ;;  %v4575_v40 = vpop.f32.mrb[98].mxu1  ;;  %v5269_v60 = vpack.c.bf16 %v4066_v30, %v4065_v32  ;;  %v3303_v32 = vld [vmem:[%s7209_s9 + $0x38] sm:$0xff] }
 0x5ae   :  { %v2999_v8 = vpop.f32.mrb[99].mxu1  ;;  %5181 = vmatprep.subr.bf16.mxu1 %v5180_v57 }
 0x5af   :  { %4617 = vmatprep.mubr.f32.mxu1 %v2999_v8  ;;  %5270 = vmatpush3.bf16.msra.mxu0 %v5269_v60  ;;  %v3304_v60 = vld [vmem:[%s7209_s9 + $0x40] sm:$0xff] }
 0x5b0   :  { %4618 = vmatmul.mubr.f32.gmra.mrb[106].mxu1 %v4575_v40  ;;  %5271 = vmatprep.subr.bf16.mxu0 %v5792_v28 }
 0x5b1   :  { %5183 = vmatpush3.bf16.msra.mxu1 %v5180_v57  ;;  %v4578_v20 = vpop.f32.mrb[100].mxu1  ;;  %v4068_v57 = vld [vmem:[%s7209_s9 + $0x158] sm:$0xff] }
 0x5b2   :  { %v3009_v35 = vpop.f32.mrb[101].mxu1  ;;  %5185 = vmatprep.subr.bf16.mxu1 %v5184_v45 }
 0x5b3   :  { %4620 = vmatprep.mubr.f32.mxu1 %v3009_v35 }
 0x5b4   :  { %4621 = vmatmul.mubr.f32.gmra.mrb[108].mxu1 %v4578_v20 }
 0x5b5   :  { %5187 = vmatpush3.bf16.msra.mxu1 %v5184_v45  ;;  %v4581_v63 = vpop.f32.mrb[102].mxu1  ;;  %v4069_v45 = vld [vmem:[%s7209_s9 + $0x160] sm:$0xff] }
 0x5b6   :  { %v3019_v36 = vpop.f32.mrb[103].mxu1  ;;  %5189 = vmatprep.subr.bf16.mxu1 %v5188_v62  ;;  %v5275_v33 = vpack.c.bf16 %v4070_v34, %v4069_v45  ;;  %v3311_v45 = vld [vmem:[%s7209_s9 + $0x78] sm:$0xff] }
 0x5b7   :  { %4623 = vmatprep.mubr.f32.mxu1 %v3019_v36 }
 0x5b8   :  { %4624 = vmatmul.mubr.f32.gmra.mrb[110].mxu1 %v4581_v63 }
 0x5b9   :  { %5191 = vmatpush3.bf16.msra.mxu1 %v5188_v62  ;;  %4658 = vmatprep.mubr.f32.mxu1 %v2989_v25  ;;  %v4067_v25 = vld [vmem:[%s7209_s9 + $0x150] sm:$0xff] }
 0x5ba   :  { %5193 = vmatprep.subr.bf16.mxu1 %v5192_v47  ;;  %v5272_v4 = vpack.c.bf16 %v4068_v57, %v4067_v25  ;;  %v3307_v25 = vld [vmem:[%s7209_s9 + $0x58] sm:$0xff] }
 0x5bc   :  { %5273 = vmatpush3.bf16.msra.mxu0 %v5272_v4  ;;  %v3308_v4 = vld [vmem:[%s7209_s9 + $0x60] sm:$0xff] }
 0x5bd   :  { %5195 = vmatpush3.bf16.msra.mxu1 %v5192_v47  ;;  %5274 = vmatprep.subr.bf16.mxu0 %v5792_v28 }
 0x5be   :  { %5197 = vmatprep.subr.bf16.mxu1 %v5196_v12 }
 0x5c0   :  { %5276 = vmatpush3.bf16.msra.mxu0 %v5275_v33 }
 0x5c1   :  { %5199 = vmatpush3.bf16.msra.mxu1 %v5196_v12  ;;  %5277 = vmatprep.subr.bf16.mxu0 %v5792_v28 }
 0x5c2   :  { %5201 = vmatprep.subr.bf16.mxu1 %v5200_v43 }
 0x5c5   :  { %5203 = vmatpush3.bf16.msra.mxu1 %v5200_v43 }
 0x5c6   :  { %5205 = vmatprep.subr.bf16.mxu1 %v5204_v9 }
 0x5c9   :  { %5207 = vmatpush3.bf16.msra.mxu1 %v5204_v9 }
 0x5ca   :  { %5208 = vmatprep.subr.bf16.mxu1 %v5792_v28 }
 0x5cc   :  { %4659 = vmatmul.mubr.f32.vlgmr.msra.gmra.mrb[112].mxu1 %v4572_v2  ;;  %v5227_v2 = vpack.c.bf16 %v4054_v55, %v4053_v13  ;;  %v3305_v13 = vld [vmem:[%s7209_s9 + $0x48] sm:$0xff] }
 0x5cd   :  { %4661 = vmatprep.mubr.f32.mxu1 %v2999_v8  ;;  %5210 = vmatpush3.bf16.msra.mxu1 %v5209_v19  ;;  %v3296_v19 = vld [vmem:[%s7209_s9] sm:$0xff]  ;;  %v5245_v55 = vpack.c.bf16 %v3305_v13, %v3304_v60  ;;  %v3758_v13 = vld [vmem:[#allocation14 + $0x8] sm:$0xff] }
 0x5ce   :  { %5211 = vmatprep.subr.bf16.mxu1 %v5792_v28  ;;  %v5233_v23 = vpack.c.bf16 %v3297_v17, %v3296_v19  ;;  %v4087_v19 = vld [vmem:[%s7209_s9 + $0x1f0] sm:$0xff]  ;;  %v4088_v17 = vld [vmem:[%s7209_s9 + $0x1f8] sm:$0xff]  ;;  %v3757_v60 = vld [vmem:[#allocation14] sm:$0xff] }
 0x5d0   :  { %4662 = vmatmul.mubr.f32.gmra.mrb[114].mxu1 %v4575_v40  ;;  %v4056_v40 = vld [vmem:[%s7209_s9 + $0xf8] sm:$0xff] }
 0x5d1   :  { %4664 = vmatprep.mubr.f32.mxu1 %v3009_v35  ;;  %5213 = vmatpush3.bf16.msra.mxu1 %v5212_v21  ;;  %v5230_v8 = vpack.c.bf16 %v4056_v40, %v4055_v6  ;;  %v4072_v35 = vld [vmem:[%s7209_s9 + $0x178] sm:$0xff]  ;;  %v3309_v6 = vld [vmem:[%s7209_s9 + $0x68] sm:$0xff] }
 0x5d2   :  { %5214 = vmatprep.subr.bf16.mxu1 %v5792_v28  ;;  %v5251_v40 = vpack.c.bf16 %v3309_v6, %v3308_v4  ;;  %v3761_v4 = vld [vmem:[#allocation14 + $0x20] sm:$0xff]  ;;  %v3762_v6 = vld [vmem:[#allocation14 + $0x28] sm:$0xff] }
 0x5d4   :  { %4665 = vmatmul.mubr.f32.gmra.mrb[116].mxu1 %v4578_v20  ;;  %v4071_v20 = vld [vmem:[%s7209_s9 + $0x170] sm:$0xff] }
 0x5d5   :  { %4667 = vmatprep.mubr.f32.mxu1 %v3019_v36  ;;  %5216 = vmatpush3.bf16.msra.mxu1 %v5215_v27  ;;  %v5278_v62 = vpack.c.bf16 %v4072_v35, %v4071_v20  ;;  %v3299_v27 = vld [vmem:[%s7209_s9 + $0x18] sm:$0xff]  ;;  %v4073_v20 = vld [vmem:[%s7209_s9 + $0x180] sm:$0xff]  ;;  %v4074_v35 = vld [vmem:[%s7209_s9 + $0x188] sm:$0xff] }
 0x5d6   :  { %5217 = vmatprep.subr.bf16.mxu1 %v5792_v28  ;;  %v5236_v29 = vpack.c.bf16 %v3299_v27, %v3298_v26  ;;  %v3668_v26 = vld [vmem:[#allocation13 + $0x28] sm:$0xff] }
 0x5d7   :  { %5279 = vmatpush3.bf16.msra.mxu0 %v5278_v62  ;;  %v5281_v62 = vpack.c.bf16 %v4074_v35, %v4073_v20  ;;  %v3766_v20 = vld [vmem:[#allocation14 + $0x48] sm:$0xff] }
 0x5d8   :  { %4668 = vmatmul.mubr.f32.gmra.mrb[118].mxu1 %v4581_v63  ;;  %5304 = vmatprep.subr.bf16.mxu0 %v5792_v28 }
 0x5d9   :  { %5219 = vmatpush3.bf16.msra.mxu1 %v5218_v24  ;;  %4702 = vmatprep.mubr.msk.f32.mxu1 %vm5793_vm5, %v5790_v0 }
 0x5da   :  { %5220 = vmatprep.subr.bf16.mxu1 %v5792_v28 }
 0x5dd   :  { %5222 = vmatpush3.bf16.msra.mxu1 %v5221_v59  ;;  %v3301_v59 = vld [vmem:[%s7209_s9 + $0x28] sm:$0xff] }
 0x5de   :  { %5223 = vmatprep.subr.bf16.mxu1 %v5792_v28  ;;  %v5239_v54 = vpack.c.bf16 %v3301_v59, %v3300_v31  ;;  %v3675_v59 = vld [vmem:[#allocation13 + $0x60] sm:$0xff] }
 0x5e1   :  { %5225 = vmatpush3.bf16.msra.mxu1 %v5224_v56  ;;  %v3302_v56 = vld [vmem:[%s7209_s9 + $0x30] sm:$0xff] }
 0x5e2   :  { %5226 = vmatprep.subr.bf16.mxu1 %v5792_v28  ;;  %v5242_v30 = vpack.c.bf16 %v3303_v32, %v3302_v56  ;;  %v3677_v56 = vld [vmem:[#allocation13 + $0x70] sm:$0xff]  ;;  %v3678_v32 = vld [vmem:[#allocation13 + $0x78] sm:$0xff] }
 0x5e5   :  { %5228 = vmatpush3.bf16.msra.mxu1 %v5227_v2  ;;  %v3306_v2 = vld [vmem:[%s7209_s9 + $0x50] sm:$0xff] }
 0x5e6   :  { %5229 = vmatprep.subr.bf16.mxu1 %v5792_v28  ;;  %v5248_v57 = vpack.c.bf16 %v3307_v25, %v3306_v2  ;;  %v5329_v2 = vpack.c.bf16 %v3758_v13, %v3757_v60  ;;  %v3760_v25 = vld [vmem:[#allocation14 + $0x18] sm:$0xff] }
 0x5e9   :  { %5231 = vmatpush3.bf16.msra.mxu1 %v5230_v8  ;;  %v3310_v8 = vld [vmem:[%s7209_s9 + $0x70] sm:$0xff] }
 0x5ea   :  { %5232 = vmatprep.subr.bf16.mxu1 %v5792_v28  ;;  %v5254_v34 = vpack.c.bf16 %v3311_v45, %v3310_v8  ;;  %v3763_v8 = vld [vmem:[#allocation14 + $0x30] sm:$0xff]  ;;  %v3764_v45 = vld [vmem:[#allocation14 + $0x38] sm:$0xff] }
 0x67f   :  { %v4616_v37 = vpop.f32.mrb[104].mxu1 }
 0x680   :  { %v3118_v53 = vpop.f32.mrb[105].mxu1 }
 0x683   :  { %v4619_v63 = vpop.f32.mrb[106].mxu1 }
 0x684   :  { %v3128_v36 = vpop.f32.mrb[107].mxu1 }
 0x687   :  { %v4622_v47 = vpop.f32.mrb[108].mxu1 }
 0x688   :  { %v3138_v51 = vpop.f32.mrb[109].mxu1 }
 0x68b   :  { %v4625_v11 = vpop.f32.mrb[110].mxu1 }
 0x68c   :  { %v3148_v12 = vpop.f32.mrb[111].mxu1 }
 0x69f   :  { %v4660_v1 = vpop.f32.mrb[112].mxu1 }
 0x6a0   :  { %v3279_v38 = vmax.f32 %v4616_v37, %v4660_v1  ;;  %v3239_v43 = vpop.f32.mrb[113].mxu1  ;;  %v4080_v1 = vld [vmem:[%s7209_s9 + $0x1b8] sm:$0xff] }
 0x6a1   :  { %v3278_v48 = vmax.f32 %v3118_v53, %v3239_v43  ;;  %v4075_v53 = vld [vmem:[%s7209_s9 + $0x190] sm:$0xff]  ;;  %v4081_v43 = vld [vmem:[%s7209_s9 + $0x1c0] sm:$0xff] }
 0x6a3   :  { %v7045_v50 = vmax.f32 %v3278_v48, %v3279_v38  ;;  %v4663_v9 = vpop.f32.mrb[114].mxu1  ;;  %v4082_v48 = vld [vmem:[%s7209_s9 + $0x1c8] sm:$0xff] }
 0x6a4   :  { %v3281_v39 = vmax.f32 %v4619_v63, %v4663_v9  ;;  %v3249_v14 = vpop.f32.mrb[115].mxu1  ;;  %v4076_v63 = vld [vmem:[%s7209_s9 + $0x198] sm:$0xff]  ;;  %v4083_v9 = vld [vmem:[%s7209_s9 + $0x1d0] sm:$0xff] }
 0x6a5   :  { %v3280_v3 = vmax.f32 %v3128_v36, %v3249_v14  ;;  %v3294_v33 = vadd.f32 %v4040_v5, %v7045_v50  ;;  %v5284_v36 = vpack.c.bf16 %v4076_v63, %v4075_v53  ;;  %v5293_v50 = vpack.c.bf16 %v4082_v48, %v4081_v43  ;;  %v3769_v63 = vld [vmem:[#allocation14 + $0x60] sm:$0xff] }
 0x6a7   :  { %v3312_v18 = vmax.f32 %v3280_v3, %v3281_v39  ;;  %v4666_v42 = vpop.f32.mrb[116].mxu1  ;;  %v3295_v37 = vmax.f32 %v3294_v33, 0.0  ;;  %v4084_v39 = vld [vmem:[%s7209_s9 + $0x1d8] sm:$0xff]  ;;  %v4085_v3 = vld [vmem:[%s7209_s9 + $0x1e0] sm:$0xff] }
 0x6a8   :  { %v3283_v21 = vmax.f32 %v4622_v47, %v4666_v42  ;;  %v3259_v58 = vpop.f32.mrb[117].mxu1  ;;  %v4077_v47 = vld [vmem:[%s7209_s9 + $0x1a0] sm:$0xff]  ;;  %v5296_v14 = vpack.c.bf16 %v4084_v39, %v4083_v9 }
 0x6a9   :  { %v3313_v22 = vadd.f32 %v4040_v5, %v3312_v18  ;;  %v3282_v41 = vmax.f32 %v3138_v51, %v3259_v58  ;;  %v4078_v51 = vld [vmem:[%s7209_s9 + $0x1a8] sm:$0xff]  ;;  %v3663_v58 = vld [vmem:[#allocation13] sm:$0xff] }
 0x6aa   :  { %v4086_v18 = vld [vmem:[%s7209_s9 + $0x1e8] sm:$0xff]  ;;  %v3765_v33 = vld [vmem:[#allocation14 + $0x40] sm:$0xff] }
 0x6ab   :  { %v3314_v61 = vmax.f32 %v3313_v22, 0.0  ;;  %v3472_v46 = vmax.f32 %v3282_v41, %v3283_v21  ;;  %v4669_v10 = vpop.f32.mrb[118].mxu1  ;;  %v5299_v42 = vpack.c.bf16 %v4086_v18, %v4085_v3  ;;  %v3664_v22 = vld [vmem:[#allocation13 + $0x8] sm:$0xff]  ;;  %v3665_v41 = vld [vmem:[#allocation13 + $0x10] sm:$0xff]  ;;  %v5341_v35 = vpack.c.bf16 %v3766_v20, %v3765_v33  ;;  %v4089_v39 = vld [vmem:[%s7210_s10] ss:$0 sm:$0xff] }
 0x6ac   :  { %v3285_v49 = vmax.f32 %v4625_v11, %v4669_v10  ;;  %v3269_v44 = vpop.f32.mrb[119].mxu1  ;;  %v5287_v11 = vpack.c.bf16 %v4078_v51, %v4077_v47  ;;  %v3667_v10 = vld [vmem:[#allocation13 + $0x20] sm:$0xff] }
 0x6ad   :  { %v3473_v16 = vadd.f32 %v4040_v5, %v3472_v46  ;;  %v3284_v7 = vmax.f32 %v3148_v12, %v3269_v44  ;;  %4703 = vmatmul.mubr.f32.vlgmr.msra.gmra.mrb[120].mxu1 %v3314_v61  ;;  %v4079_v12 = vld [vmem:[%s7209_s9 + $0x1b0] sm:$0xff]  ;;  %v3666_v61 = vld [vmem:[#allocation13 + $0x18] sm:$0xff]  ;;  %v5311_v27 = vpack.c.bf16 %v3668_v26, %v3667_v10 }
 0x6ae   :  { %5234 = vmatpush3.bf16.msra.mxu1 %v5233_v23  ;;  %4737 = vmatprep.mubr.msk.f32.mxu1 %vm5793_vm5, %v5790_v0  ;;  %v5290_v38 = vpack.c.bf16 %v4080_v1, %v4079_v12  ;;  %v5305_v23 = vpack.c.bf16 %v3664_v22, %v3663_v58  ;;  %v5308_v46 = vpack.c.bf16 %v3666_v61, %v3665_v41  ;;  %v3670_v44 = vld [vmem:[#allocation13 + $0x38] sm:$0xff] }
 0x6af   :  { %v3474_v24 = vmax.f32 %v3473_v16, 0.0  ;;  %v3563_v52 = vmax.f32 %v3284_v7, %v3285_v49  ;;  %5235 = vmatprep.subr.bf16.mxu1 %v5792_v28  ;;  %v3669_v49 = vld [vmem:[#allocation13 + $0x30] sm:$0xff]  ;;  %v3672_v7 = vld [vmem:[#allocation13 + $0x48] sm:$0xff] }
 0x6b0   :  { %v5314_v16 = vpack.c.bf16 %v3670_v44, %v3669_v49 }
 0x6b1   :  { %v7071_v15 = vadd.f32 %v4040_v5, %v3563_v52  ;;  %4773 = vmatmul.mubr.f32.vlgmr.msra.gmra.mrb[48].mxu0 %v3474_v24  ;;  %v5302_v5 = vpack.c.bf16 %v4088_v17, %v4087_v19  ;;  %v3673_v24 = vld [vmem:[#allocation13 + $0x50] sm:$0xff]  ;;  %v3674_v52 = vld [vmem:[#allocation13 + $0x58] sm:$0xff] }
 0x6b2   :  { %5237 = vmatpush3.bf16.msra.mxu1 %v5236_v29  ;;  %4842 = vmatprep.mubr.msk.f32.mxu0 %vm5793_vm5, %v5790_v0  ;;  %v5320_v31 = vpack.c.bf16 %v3674_v52, %v3673_v24  ;;  %v3771_v19 = vld [vmem:[#allocation14 + $0x70] sm:$0xff] }
 0x6b3   :  { %5238 = vmatprep.subr.bf16.mxu1 %v5792_v28  ;;  %v3565_v21 = vmax.f32 %v7071_v15, 0.0  ;;  %5306 = vmatpush3.bf16.msra.mxu0 %v5305_v23  ;;  %v3676_v15 = vld [vmem:[#allocation13 + $0x68] sm:$0xff]  ;;  %v4091_v23 = vld [vmem:[%s7214_s14] ss:$0 sm:$0xff] }
 0x6b4   :  { %5307 = vmatprep.subr.bf16.mxu0 %v5792_v28 }
 0x6b6   :  { %5240 = vmatpush3.bf16.msra.mxu1 %v5239_v54  ;;  %v5323_v54 = vpack.c.bf16 %v3676_v15, %v3675_v59 }
 0x6b7   :  { %5241 = vmatprep.subr.bf16.mxu1 %v5792_v28  ;;  %5309 = vmatpush3.bf16.msra.mxu0 %v5308_v46 }
 0x6b8   :  { %5310 = vmatprep.subr.bf16.mxu0 %v5792_v28 }
 0x6ba   :  { %5243 = vmatpush3.bf16.msra.mxu1 %v5242_v30  ;;  %v5326_v30 = vpack.c.bf16 %v3678_v32, %v3677_v56 }
 0x6bb   :  { %5244 = vmatprep.subr.bf16.mxu1 %v5792_v28  ;;  %5312 = vmatpush3.bf16.msra.mxu0 %v5311_v27 }
 0x6bc   :  { %5313 = vmatprep.subr.bf16.mxu0 %v5792_v28 }
 0x6be   :  { %5246 = vmatpush3.bf16.msra.mxu1 %v5245_v55  ;;  %v3759_v55 = vld [vmem:[#allocation14 + $0x10] sm:$0xff] }
 0x6bf   :  { %5247 = vmatprep.subr.bf16.mxu1 %v5792_v28  ;;  %5315 = vmatpush3.bf16.msra.mxu0 %v5314_v16 }
 0x6c0   :  { %5316 = vmatprep.subr.bf16.mxu0 %v5792_v28 }
 0x6c2   :  { %5249 = vmatpush3.bf16.msra.mxu1 %v5248_v57  ;;  %v5332_v57 = vpack.c.bf16 %v3760_v25, %v3759_v55 }
 0x6c3   :  { %5250 = vmatprep.subr.bf16.mxu1 %v5792_v28 }
 0x6c6   :  { %5252 = vmatpush3.bf16.msra.mxu1 %v5251_v40  ;;  %v5335_v40 = vpack.c.bf16 %v3762_v6, %v3761_v4 }
 0x6c7   :  { %5253 = vmatprep.subr.bf16.mxu1 %v5792_v28 }
 0x6ca   :  { %5255 = vmatpush3.bf16.msra.mxu1 %v5254_v34  ;;  %v5338_v34 = vpack.c.bf16 %v3764_v45, %v3763_v8 }
 0x6cb   :  { %5280 = vmatprep.subr.bf16.mxu1 %v5792_v28 }
 0x6cd   :  { %4738 = vmatmul.mubr.f32.vlgmr.msra.gmra.mrb[122].mxu1 %v3295_v37  ;;  %v3768_v37 = vld [vmem:[#allocation14 + $0x58] sm:$0xff] }
 0x6ce   :  { %5282 = vmatpush3.bf16.msra.mxu1 %v5281_v62  ;;  %4807 = vmatprep.mubr.msk.f32.mxu1 %vm5793_vm5, %v5790_v0  ;;  %v3767_v62 = vld [vmem:[#allocation14 + $0x50] sm:$0xff] }
 0x6cf   :  { %5283 = vmatprep.subr.bf16.mxu1 %v5792_v28  ;;  %v5344_v53 = vpack.c.bf16 %v3768_v37, %v3767_v62 }
 0x6d2   :  { %5285 = vmatpush3.bf16.msra.mxu1 %v5284_v36  ;;  %v3770_v36 = vld [vmem:[#allocation14 + $0x68] sm:$0xff] }
 0x6d3   :  { %5286 = vmatprep.subr.bf16.mxu1 %v5792_v28  ;;  %v5347_v47 = vpack.c.bf16 %v3770_v36, %v3769_v63 }
 0x6d6   :  { %5288 = vmatpush3.bf16.msra.mxu1 %v5287_v11 }
 0x6d7   :  { %5289 = vmatprep.subr.bf16.mxu1 %v5792_v28 }
 0x6da   :  { %5291 = vmatpush3.bf16.msra.mxu1 %v5290_v38 }
 0x6db   :  { %5292 = vmatprep.subr.bf16.mxu1 %v5792_v28 }
 0x6de   :  { %5294 = vmatpush3.bf16.msra.mxu1 %v5293_v50 }
 0x6df   :  { %5295 = vmatprep.subr.bf16.mxu1 %v5792_v28 }
 0x6e2   :  { %5297 = vmatpush3.bf16.msra.mxu1 %v5296_v14 }
 0x6e3   :  { %5298 = vmatprep.subr.bf16.mxu1 %v5792_v28 }
 0x6e6   :  { %5300 = vmatpush3.bf16.msra.mxu1 %v5299_v42 }
 0x6e7   :  { %5301 = vmatprep.subr.bf16.mxu1 %v5792_v28 }
 0x6ea   :  { %5303 = vmatpush3.bf16.msra.mxu1 %v5302_v5  ;;  %v4090_v5 = vld [vmem:[%s7212_s12] ss:$0 sm:$0xff] }
 0x6eb   :  { %5328 = vmatprep.subr.bf16.mxu1 %v5792_v28 }
 0x6ed   :  { %4808 = vmatmul.mubr.f32.vlgmr.msra.gmra.mrb[124].mxu1 %v3565_v21 }
 0x6ee   :  { %4877 = vmatprep.mubr.msk.f32.mxu1 %vm5793_vm5, %v5790_v0  ;;  %v3671_v0 = vld [vmem:[#allocation13 + $0x40] sm:$0xff]  ;;  %5330 = vmatpush3.bf16.msra.mxu1 %v5329_v2 }
 0x6ef   :  { %v5317_v29 = vpack.c.bf16 %v3672_v7, %v3671_v0  ;;  %5331 = vmatprep.subr.bf16.mxu1 %v5792_v28 }
 0x6f1   :  { %5318 = vmatpush3.bf16.msra.mxu0 %v5317_v29 }
 0x6f2   :  { %5319 = vmatprep.subr.bf16.mxu0 %v5792_v28  ;;  %5333 = vmatpush3.bf16.msra.mxu1 %v5332_v57 }
 0x6f3   :  { %5334 = vmatprep.subr.bf16.mxu1 %v5792_v28 }
 0x6f5   :  { %5321 = vmatpush3.bf16.msra.mxu0 %v5320_v31 }
 0x6f6   :  { %5322 = vmatprep.subr.bf16.mxu0 %v5792_v28  ;;  %5336 = vmatpush3.bf16.msra.mxu1 %v5335_v40 }
 0x6f7   :  { %5337 = vmatprep.subr.bf16.mxu1 %v5792_v28 }
 0x6f9   :  { %5324 = vmatpush3.bf16.msra.mxu0 %v5323_v54 }
 0x6fa   :  { %5325 = vmatprep.subr.bf16.mxu0 %v5792_v28  ;;  %5339 = vmatpush3.bf16.msra.mxu1 %v5338_v34 }
 0x6fb   :  { %5340 = vmatprep.subr.bf16.mxu1 %v5792_v28 }
 0x6fd   :  { %5327 = vmatpush3.bf16.msra.mxu0 %v5326_v30 }
 0x6fe   :  { %5342 = vmatpush3.bf16.msra.mxu1 %v5341_v35 }
 0x6ff   :  { %5343 = vmatprep.subr.bf16.mxu1 %v5792_v28 }
 0x702   :  { %5345 = vmatpush3.bf16.msra.mxu1 %v5344_v53 }
 0x703   :  { %5346 = vmatprep.subr.bf16.mxu1 %v5792_v28 }
 0x706   :  { %5348 = vmatpush3.bf16.msra.mxu1 %v5347_v47 }
 0x707   :  { %5349 = vmatprep.subr.bf16.mxu1 %v5792_v28  ;;  %v3772_v28 = vld [vmem:[#allocation14 + $0x78] sm:$0xff] }
 0x708   :  { %v5350_v17 = vpack.c.bf16 %v3772_v28, %v3771_v19 }
 0x70a   :  { %5351 = vmatpush3.bf16.msra.mxu1 %v5350_v17 }
 0x780   :  { %v3398_v51 = vpop.f32.mrb[120].mxu1 }
 0x781   :  { %v4704_v11 = vpop.f32.mrb[121].mxu1 }
 0x784   :  { %v3558_v12 = vpop.f32.mrb[48].mxu0 }
 0x785   :  { %v4774_v1 = vpop.f32.mrb[49].mxu0 }
 0x7a0   :  { %v3468_v38 = vpop.f32.mrb[122].mxu1 }
 0x7a1   :  { %v3469_v43 = vadd.f32 %v3468_v38, %v3398_v51  ;;  %v4739_v48 = vpop.f32.mrb[123].mxu1 }
 0x7a3   :  { %v3562_v50 = vadd.f32 %v3558_v12, %v3469_v43 }
 0x7c0   :  { %v3649_v9 = vpop.f32.mrb[124].mxu1 }
 0x7c1   :  { %v3653_v14 = vadd.f32 %v3649_v9, %v3562_v50  ;;  %v4809_v3 = vpop.f32.mrb[125].mxu1 }
 0x7c3   :  { %v3661_v18 = vadd.f32 %v4089_v39, %v3653_v14 }
 0x7c5   :  { %v3662_v42 = vmax.f32 %v3661_v18, 0.0 }
 0x7c7   :  { %4843 = vmatmul.mubr.f32.vlgmr.msra.gmra.mrb[50].mxu0 %v3662_v42 }
 0x89a   :  { %v3752_v21 = vpop.f32.mrb[50].mxu0 }
 0x89b   :  { %v3753_v58 = vadd.f32 %v4090_v5, %v3752_v21  ;;  %v4844_v22 = vpop.f32.mrb[51].mxu0 }
 0x89d   :  { %v3756_v41 = vmax.f32 %v3753_v58, 0.0 }
 0x89f   :  { %4878 = vmatmul.mubr.f32.vlgmr.msra.gmra.mrb[126].mxu1 %v3756_v41 }
 0x972   :  { %v3846_v61 = vpop.f32.mrb[126].mxu1 }
 0x973   :  { %v3847_v46 = vadd.f32 %v4091_v23, %v3846_v61  ;;  %v4879_v10 = vpop.f32.mrb[127].mxu1 }
 0x975   :  { %v3850_v26 = vmax.f32 %v3847_v46, 0.0 }
 0x977   :  { %3851 = vst [vmem:[%s7219_s6] sm:$0xff] %v3850_v26 }
 0x978   :  { %3856 = vsyncpa [#allocation4], 1 }
 0x979   :  { %3857 = vsyncpa [#allocation6], 1 }
 0x97a   :  { %3858 = vsyncpa [#allocation9], 1 }
 0x97b   :  { %3859 = vsyncpa [#allocation12], 1 }
 0x97c   :  { %3860 = vsyncpa [#allocation15], 1 }

</bundles_post_ra>
